<compile_context>
chip_gen: v6e
topology: v6e:2x2x1
jax: 0.10.0
libtpu: 0.0.40
codegen_flags: <defaults>
</compile_context>

<pallas_src>
import functools

import jax
import jax.numpy as jnp
import numpy as np
from jax.experimental import pallas as pl
from jax.experimental.pallas import tpu as pltpu


def _round_up(x, m):
    return (x + m - 1) // m * m


def _pad_gates_last(w, h, hp):
    """Pad a (..., 4*h) gate-blocked array to (..., 4*hp), zero-padding each
    of the [i, f, g, o] gate chunks independently to width hp."""
    if h == hp:
        return w
    lead = w.shape[:-1]
    w4 = w.reshape(lead + (4, h))
    w4 = jnp.pad(w4, [(0, 0)] * len(lead) + [(0, 0), (0, hp - h)])
    return w4.reshape(lead + (4 * hp,))


def _make_lstm_kernel(t_blk, seq_len, seq_pad, compute_dtype):
    """Recurrence-only LSTM kernel. Consumes precomputed input gates."""

    def kernel(gx_ref, whh_ref, h0_ref, c0_ref, h_all_ref, hn_ref, cn_ref):
        t_idx = pl.program_id(1)

        # h_n / c_n output blocks are resident across the (arbitrary) time axis:
        # use them directly as the running state (no scratch).
        @pl.when(t_idx == 0)
        def _():
            hn_ref[...] = h0_ref[...]
            cn_ref[...] = c0_ref[...]

        h = hn_ref[...]          # (B_BLK, Hp) f32
        c = cn_ref[...]          # (B_BLK, Hp) f32
        hp = h.shape[-1]

        # Fully-unrolled inner loop over T_BLK timesteps (static indices).
        for t in range(t_blk):
            # (B_BLK, 4Hp) f32 precomputed input gates for this timestep.
            gx_t = jnp.squeeze(gx_ref[:, t:t + 1, :], axis=1)
            gates = gx_t + jnp.dot(h.astype(compute_dtype), whh_ref[...],
                                   preferred_element_type=jnp.float32)

            # PyTorch gate order: [i, f, g, o]; all slices are lane-aligned (Hp % 128 == 0).
            i_g = jax.nn.sigmoid(gates[:, 0 * hp:1 * hp])
            f_g = jax.nn.sigmoid(gates[:, 1 * hp:2 * hp])
            g_g = jnp.tanh(gates[:, 2 * hp:3 * hp])
            o_g = jax.nn.sigmoid(gates[:, 3 * hp:4 * hp])

            c_new = f_g * c + i_g * g_g
            h_new = o_g * jnp.tanh(c_new)

            if seq_pad != seq_len:
                # Freeze the state on padded timesteps so (h_n, c_n) match the
                # unpadded sequence.
                valid = (t_idx * t_blk + t) < seq_len
                h = jnp.where(valid, h_new, h)
                c = jnp.where(valid, c_new, c)
            else:
                h, c = h_new, c_new

            h_all_ref[:, t:t + 1, :] = h[:, None, :]

        hn_ref[...] = h
        cn_ref[...] = c

    return kernel


@functools.partial(jax.jit, static_argnames=("compute_dtype", "t_block"))
def target_lstm_forward(x_tokens, params, hidden=None, *,
                        compute_dtype=jnp.bfloat16, t_block=16):
    """x_tokens: int32 (B, S). Returns (logits (B,S,V), (h_n, c_n) each (1,B,H))."""
    emb = params["g_embeddings"]          # (V, E)
    w_ih = params["w_ih"]                 # (E, 4H)
    w_hh = params["w_hh"]                 # (H, 4H)
    b = params["b"]                       # (1, 4H)  (b_ih + b_hh)
    w_out = params["w_out"]               # (H, V)
    b_out = params["b_out"]               # (1, V)

    B, S = x_tokens.shape
    H = w_hh.shape[0]
    V = w_out.shape[1]

    # ---- TPU-friendly padded shapes -----------------------------------------
    Hp = _round_up(H, 128)                # lane-aligned gate slices
    if B <= 128:
        b_blk = _round_up(B, 8)
        Bp = b_blk
    else:
        b_blk = 128
        Bp = _round_up(B, 128)
    t_blk = min(_round_up(t_block, 8), _round_up(S, 8))
    Sp = _round_up(S, t_blk)

    # ---- initial state --------------------------------------------------------
    if hidden is None:
        h0 = jnp.zeros((B, H), jnp.float32)
        c0 = jnp.zeros((B, H), jnp.float32)
    else:
        h0 = hidden[0].reshape(B, H).astype(jnp.float32)
        c0 = hidden[1].reshape(B, H).astype(jnp.float32)
    h0p = jnp.pad(h0, ((0, Bp - B), (0, Hp - H)))
    c0p = jnp.pad(c0, ((0, Bp - B), (0, Hp - H)))

    # ---- hoisted input projection (fused with the embedding gather by XLA) ----
    w_ih_p = _pad_gates_last(w_ih, H, Hp).astype(compute_dtype)        # (E, 4Hp)
    b_p = _pad_gates_last(b, H, Hp).astype(jnp.float32)                # (1, 4Hp)
    embedded = jnp.take(emb.astype(compute_dtype), x_tokens, axis=0)   # (B, S, E)
    gates_x = jnp.einsum("bse,eg->bsg", embedded, w_ih_p,
                         preferred_element_type=jnp.float32) + b_p     # (B, S, 4Hp) f32
    gates_x = jnp.pad(gates_x, ((0, Bp - B), (0, Sp - S), (0, 0)))     # (Bp, Sp, 4Hp)

    # ---- recurrent weight (gate-padded, row-padded, cast for the MXU) ---------
    w_hh_p = _pad_gates_last(w_hh, H, Hp)                              # (H, 4Hp)
    w_hh_p = jnp.pad(w_hh_p, ((0, Hp - H), (0, 0))).astype(compute_dtype)  # (Hp, 4Hp)

    grid = (Bp // b_blk, Sp // t_blk)
    kernel = _make_lstm_kernel(t_blk, S, Sp, compute_dtype)

    h_all, h_n, c_n = pl.pallas_call(
        kernel,
        out_shape=(
            jax.ShapeDtypeStruct((Bp, Sp, Hp), jnp.float32),   # hidden states
            jax.ShapeDtypeStruct((Bp, Hp), jnp.float32),       # h_n
            jax.ShapeDtypeStruct((Bp, Hp), jnp.float32),       # c_n
        ),
        grid_spec=pltpu.PrefetchScalarGridSpec(
            num_scalar_prefetch=0,
            grid=grid,
            in_specs=[
                pl.BlockSpec((b_blk, t_blk, 4 * Hp), lambda bi, ti: (bi, ti, 0)),  # gates_x
                pl.BlockSpec((Hp, 4 * Hp), lambda bi, ti: (0, 0)),                 # W_hh^T
                pl.BlockSpec((b_blk, Hp), lambda bi, ti: (bi, 0)),                 # h0
                pl.BlockSpec((b_blk, Hp), lambda bi, ti: (bi, 0)),                 # c0
            ],
            out_specs=[
                pl.BlockSpec((b_blk, t_blk, Hp), lambda bi, ti: (bi, ti, 0)),      # h_all
                pl.BlockSpec((b_blk, Hp), lambda bi, ti: (bi, 0)),                 # h_n
                pl.BlockSpec((b_blk, Hp), lambda bi, ti: (bi, 0)),                 # c_n
            ],
        ),
        compiler_params=pltpu.CompilerParams(
            dimension_semantics=("parallel", "arbitrary")),
    )(gates_x, w_hh_p, h0p, c0p)

    # ---- hoisted output projection over all timesteps at once -----------------
    h_valid = h_all[:B, :S, :H]                                        # (B, S, H) f32
    logits = jnp.einsum("bsh,hv->bsv", h_valid.astype(compute_dtype),
                        w_out.astype(compute_dtype),
                        preferred_element_type=jnp.float32) + b_out    # (B, S, V) f32

    h_n = h_n[:B, :H][None]                                            # (1, B, H)
    c_n = c_n[:B, :H][None]
    return logits, (h_n, c_n)


def _reference_forward(x_tokens, params, hidden=None):
    """Pure-JAX reference matching torch.nn.LSTM (batch_first) semantics (f32)."""
    emb = params["g_embeddings"]
    w_ih, w_hh, b = params["w_ih"], params["w_hh"], params["b"]
    w_out, b_out = params["w_out"], params["b_out"]
    B, S = x_tokens.shape
    H = w_hh.shape[0]
    h = jnp.zeros((B, H), jnp.float32) if hidden is None else hidden[0][0]
    c = jnp.zeros((B, H), jnp.float32) if hidden is None else hidden[1][0]
    embedded = jnp.take(emb, x_tokens, axis=0)

    def step(carry, x_t):
        h, c = carry
        gates = x_t @ w_ih + h @ w_hh + b[0]
        i_g = jax.nn.sigmoid(gates[:, 0 * H:1 * H])
        f_g = jax.nn.sigmoid(gates[:, 1 * H:2 * H])
        g_g = jnp.tanh(gates[:, 2 * H:3 * H])
        o_g = jax.nn.sigmoid(gates[:, 3 * H:4 * H])
        c_new = f_g * c + i_g * g_g
        h_new = o_g * jnp.tanh(c_new)
        return (h_new, c_new), h_new @ w_out + b_out[0]

    (h, c), logits_tm = jax.lax.scan(step, (h, c),
                                     jnp.transpose(embedded, (1, 0, 2)))
    return jnp.transpose(logits_tm, (1, 0, 2)), (h[None], c[None])


def make_params(key, num_emb, emb_dim, hidden_dim):
    ks = jax.random.split(key, 7)
    scale = 0.1
    return {
        "g_embeddings": scale * jax.random.normal(ks[0], (num_emb, emb_dim), jnp.float32),
        # stored pre-transposed: (in_dim, 4H), gate order [i, f, g, o]
        "w_ih": scale * jax.random.normal(ks[1], (emb_dim, 4 * hidden_dim), jnp.float32),
        "w_hh": scale * jax.random.normal(ks[2], (hidden_dim, 4 * hidden_dim), jnp.float32),
        "b": scale * jax.random.normal(ks[3], (1, 4 * hidden_dim), jnp.float32),
        "w_out": scale * jax.random.normal(ks[4], (hidden_dim, num_emb), jnp.float32),
        "b_out": scale * jax.random.normal(ks[5], (1, num_emb), jnp.float32),
    }


if __name__ == "__main__":
    # Small config consistent with TargetLSTM(num_emb, batch_size, emb_dim,
    # hidden_dim, sequence_length, start_token)
    num_emb, batch_size, emb_dim, hidden_dim, seq_len = 16, 4, 8, 32, 8

    key = jax.random.PRNGKey(0)
    pkey, xkey = jax.random.split(key)
    params = make_params(pkey, num_emb, emb_dim, hidden_dim)
    x = jax.random.randint(xkey, (batch_size, seq_len), 0, num_emb, dtype=jnp.int32)

    ref_logits, (ref_h, ref_c) = _reference_forward(x, params)

    # f32 matmul path: strict check against the pure-JAX reference.
    logits, (h_n, c_n) = target_lstm_forward(x, params, compute_dtype=jnp.float32)
    jax.block_until_ready((logits, h_n, c_n))
    np.testing.assert_allclose(np.asarray(logits), np.asarray(ref_logits),
                               rtol=1e-4, atol=1e-4)
    np.testing.assert_allclose(np.asarray(h_n), np.asarray(ref_h),
                               rtol=1e-4, atol=1e-4)
    np.testing.assert_allclose(np.asarray(c_n), np.asarray(ref_c),
                               rtol=1e-4, atol=1e-4)

    # default bf16-MXU path (v6e/v7x throughput): loose check.
    logits_bf, (h_bf, c_bf) = target_lstm_forward(x, params)
    jax.block_until_ready((logits_bf, h_bf, c_bf))
    np.testing.assert_allclose(np.asarray(logits_bf), np.asarray(ref_logits),
                               rtol=5e-2, atol=5e-2)
    np.testing.assert_allclose(np.asarray(h_bf), np.asarray(ref_h),
                               rtol=5e-2, atol=5e-2)

    assert logits.shape == (batch_size, seq_len, num_emb)
    assert h_n.shape == (1, batch_size, hidden_dim)
    assert c_n.shape == (1, batch_size, hidden_dim)

    print("KERNEL_OK")
</pallas_src>

<mosaic_0001>
module attributes {stable_mosaic.version = 11 : i64} {
  func.func @kernel(%arg0: i32, %arg1: i32, %arg2: memref<8x8x512xf32, #tpu.memory_space<vmem>>, %arg3: memref<128x512xf32, #tpu.memory_space<vmem>>, %arg4: memref<8x128xf32, #tpu.memory_space<vmem>>, %arg5: memref<8x128xf32, #tpu.memory_space<vmem>>, %arg6: memref<8x8x128xf32, #tpu.memory_space<vmem>>, %arg7: memref<8x128xf32, #tpu.memory_space<vmem>>, %arg8: memref<8x128xf32, #tpu.memory_space<vmem>>) attributes {dimension_semantics = [#tpu.dimension_semantics<parallel>, #tpu.dimension_semantics<arbitrary>], iteration_bounds = array<i64: 1, 1>, scalar_prefetch = 0 : i64, scratch_operands = 0 : i64, tpu.core_type = #tpu.core_type<tc>, window_params = [{transform_indices = @transform_0, window_bounds = array<i64: 8, 8, 512>}, {pipeline_mode = #tpu.pipeline_mode<synchronous>, transform_indices = @transform_1, window_bounds = array<i64: 128, 512>}, {transform_indices = @transform_2, window_bounds = array<i64: 8, 128>}, {transform_indices = @transform_3, window_bounds = array<i64: 8, 128>}, {transform_indices = @transform_4, window_bounds = array<i64: 8, 8, 128>}, {transform_indices = @transform_5, window_bounds = array<i64: 8, 128>}, {transform_indices = @transform_6, window_bounds = array<i64: 8, 128>}]} {
    %c0_i32 = arith.constant 0 : i32
    %0 = arith.cmpi eq, %arg1, %c0_i32 : i32
    %1 = arith.extui %0 : i1 to i32
    %c0_i32_0 = arith.constant 0 : i32
    %2 = arith.cmpi ne, %1, %c0_i32_0 : i32
    scf.if %2 {
      %c0_96 = arith.constant 0 : index
      %c0_97 = arith.constant 0 : index
      %263 = vector.load %arg4[%c0_96, %c0_97] : memref<8x128xf32, #tpu.memory_space<vmem>>, vector<8x128xf32>
      %c0_98 = arith.constant 0 : index
      %c0_99 = arith.constant 0 : index
      %264 = vector.load %arg7[%c0_98, %c0_99] : memref<8x128xf32, #tpu.memory_space<vmem>>, vector<8x128xf32>
      tpu.vector_store %arg7[%c0_98, %c0_99], %263 {strides = array<i32>} : memref<8x128xf32, #tpu.memory_space<vmem>>, vector<8x128xf32>,
      %c0_100 = arith.constant 0 : index
      %c0_101 = arith.constant 0 : index
      %265 = vector.load %arg5[%c0_100, %c0_101] : memref<8x128xf32, #tpu.memory_space<vmem>>, vector<8x128xf32>
      %c0_102 = arith.constant 0 : index
      %c0_103 = arith.constant 0 : index
      %266 = vector.load %arg8[%c0_102, %c0_103] : memref<8x128xf32, #tpu.memory_space<vmem>>, vector<8x128xf32>
      tpu.vector_store %arg8[%c0_102, %c0_103], %265 {strides = array<i32>} : memref<8x128xf32, #tpu.memory_space<vmem>>, vector<8x128xf32>,
    } else {
    }
    %c0 = arith.constant 0 : index
    %c0_1 = arith.constant 0 : index
    %3 = vector.load %arg7[%c0, %c0_1] : memref<8x128xf32, #tpu.memory_space<vmem>>, vector<8x128xf32>
    %c0_2 = arith.constant 0 : index
    %c0_3 = arith.constant 0 : index
    %4 = vector.load %arg8[%c0_2, %c0_3] : memref<8x128xf32, #tpu.memory_space<vmem>>, vector<8x128xf32>
    %c0_4 = arith.constant 0 : index
    %c0_5 = arith.constant 0 : index
    %c0_6 = arith.constant 0 : index
    %5 = vector.load %arg2[%c0_4, %c0_5, %c0_6] : memref<8x8x512xf32, #tpu.memory_space<vmem>>, vector<8x1x512xf32>
    %6 = vector.shape_cast %5 : vector<8x1x512xf32> to vector<8x512xf32>
    %c0_7 = arith.constant 0 : index
    %c0_8 = arith.constant 0 : index
    %7 = vector.load %arg3[%c0_7, %c0_8] : memref<128x512xf32, #tpu.memory_space<vmem>>, vector<128x512xf32>
    %cst = arith.constant dense<0.000000e+00> : vector<8x512xf32>
    %8 = tpu.matmul %3, %7, %cst {dimension_numbers = #tpu.dot_dimension_numbers<[1], [0], [0], [1], [0, 0, 1, 1], [], []>} : vector<8x128xf32>, vector<128x512xf32>, vector<8x512xf32> -> vector<8x512xf32>
    %9 = arith.addf %6, %8 : vector<8x512xf32>
    %10 = vector.extract_strided_slice %9 {offsets = [0, 0], sizes = [8, 128], strides = [1, 1]} : vector<8x512xf32> to vector<8x128xf32>
    %11 = arith.negf %10 : vector<8x128xf32>
    %12 = math.exp %11 : vector<8x128xf32>
    %cst_9 = arith.constant 1.000000e+00 : f32
    %13 = vector.broadcast %cst_9 : f32 to vector<8x128xf32>
    %14 = arith.addf %13, %12 : vector<8x128xf32>
    %15 = arith.divf %13, %14 : vector<8x128xf32>
    %16 = vector.extract_strided_slice %9 {offsets = [0, 128], sizes = [8, 128], strides = [1, 1]} : vector<8x512xf32> to vector<8x128xf32>
    %17 = arith.negf %16 : vector<8x128xf32>
    %18 = math.exp %17 : vector<8x128xf32>
    %cst_10 = arith.constant 1.000000e+00 : f32
    %19 = vector.broadcast %cst_10 : f32 to vector<8x128xf32>
    %20 = arith.addf %19, %18 : vector<8x128xf32>
    %21 = arith.divf %19, %20 : vector<8x128xf32>
    %22 = vector.extract_strided_slice %9 {offsets = [0, 256], sizes = [8, 128], strides = [1, 1]} : vector<8x512xf32> to vector<8x128xf32>
    %23 = math.tanh %22 : vector<8x128xf32>
    %24 = vector.extract_strided_slice %9 {offsets = [0, 384], sizes = [8, 128], strides = [1, 1]} : vector<8x512xf32> to vector<8x128xf32>
    %25 = arith.negf %24 : vector<8x128xf32>
    %26 = math.exp %25 : vector<8x128xf32>
    %cst_11 = arith.constant 1.000000e+00 : f32
    %27 = vector.broadcast %cst_11 : f32 to vector<8x128xf32>
    %28 = arith.addf %27, %26 : vector<8x128xf32>
    %29 = arith.divf %27, %28 : vector<8x128xf32>
    %30 = arith.mulf %21, %4 : vector<8x128xf32>
    %31 = arith.mulf %15, %23 : vector<8x128xf32>
    %32 = arith.addf %30, %31 : vector<8x128xf32>
    %33 = math.tanh %32 : vector<8x128xf32>
    %34 = arith.mulf %29, %33 : vector<8x128xf32>
    %35 = vector.shape_cast %34 : vector<8x128xf32> to vector<8x1x128xf32>
    %c0_12 = arith.constant 0 : index
    %c0_13 = arith.constant 0 : index
    %c0_14 = arith.constant 0 : index
    %36 = vector.load %arg6[%c0_12, %c0_13, %c0_14] : memref<8x8x128xf32, #tpu.memory_space<vmem>>, vector<8x1x128xf32>
    tpu.vector_store %arg6[%c0_12, %c0_13, %c0_14], %35 {strides = array<i32>} : memref<8x8x128xf32, #tpu.memory_space<vmem>>, vector<8x1x128xf32>,
    %c0_15 = arith.constant 0 : index
    %c1 = arith.constant 1 : index
    %c0_16 = arith.constant 0 : index
    %37 = vector.load %arg2[%c0_15, %c1, %c0_16] : memref<8x8x512xf32, #tpu.memory_space<vmem>>, vector<8x1x512xf32>
    %38 = vector.shape_cast %37 : vector<8x1x512xf32> to vector<8x512xf32>
    %c0_17 = arith.constant 0 : index
    %c0_18 = arith.constant 0 : index
    %39 = vector.load %arg3[%c0_17, %c0_18] : memref<128x512xf32, #tpu.memory_space<vmem>>, vector<128x512xf32>
    %cst_19 = arith.constant dense<0.000000e+00> : vector<8x512xf32>
    %40 = tpu.matmul %34, %39, %cst_19 {dimension_numbers = #tpu.dot_dimension_numbers<[1], [0], [0], [1], [0, 0, 1, 1], [], []>} : vector<8x128xf32>, vector<128x512xf32>, vector<8x512xf32> -> vector<8x512xf32>
    %41 = arith.addf %38, %40 : vector<8x512xf32>
    %42 = vector.extract_strided_slice %41 {offsets = [0, 0], sizes = [8, 128], strides = [1, 1]} : vector<8x512xf32> to vector<8x128xf32>
    %43 = arith.negf %42 : vector<8x128xf32>
    %44 = math.exp %43 : vector<8x128xf32>
    %cst_20 = arith.constant 1.000000e+00 : f32
    %45 = vector.broadcast %cst_20 : f32 to vector<8x128xf32>
    %46 = arith.addf %45, %44 : vector<8x128xf32>
    %47 = arith.divf %45, %46 : vector<8x128xf32>
    %48 = vector.extract_strided_slice %41 {offsets = [0, 128], sizes = [8, 128], strides = [1, 1]} : vector<8x512xf32> to vector<8x128xf32>
    %49 = arith.negf %48 : vector<8x128xf32>
    %50 = math.exp %49 : vector<8x128xf32>
    %cst_21 = arith.constant 1.000000e+00 : f32
    %51 = vector.broadcast %cst_21 : f32 to vector<8x128xf32>
    %52 = arith.addf %51, %50 : vector<8x128xf32>
    %53 = arith.divf %51, %52 : vector<8x128xf32>
    %54 = vector.extract_strided_slice %41 {offsets = [0, 256], sizes = [8, 128], strides = [1, 1]} : vector<8x512xf32> to vector<8x128xf32>
    %55 = math.tanh %54 : vector<8x128xf32>
    %56 = vector.extract_strided_slice %41 {offsets = [0, 384], sizes = [8, 128], strides = [1, 1]} : vector<8x512xf32> to vector<8x128xf32>
    %57 = arith.negf %56 : vector<8x128xf32>
    %58 = math.exp %57 : vector<8x128xf32>
    %cst_22 = arith.constant 1.000000e+00 : f32
    %59 = vector.broadcast %cst_22 : f32 to vector<8x128xf32>
    %60 = arith.addf %59, %58 : vector<8x128xf32>
    %61 = arith.divf %59, %60 : vector<8x128xf32>
    %62 = arith.mulf %53, %32 : vector<8x128xf32>
    %63 = arith.mulf %47, %55 : vector<8x128xf32>
    %64 = arith.addf %62, %63 : vector<8x128xf32>
    %65 = math.tanh %64 : vector<8x128xf32>
    %66 = arith.mulf %61, %65 : vector<8x128xf32>
    %67 = vector.shape_cast %66 : vector<8x128xf32> to vector<8x1x128xf32>
    %c0_23 = arith.constant 0 : index
    %c1_24 = arith.constant 1 : index
    %c0_25 = arith.constant 0 : index
    %68 = vector.load %arg6[%c0_23, %c1_24, %c0_25] : memref<8x8x128xf32, #tpu.memory_space<vmem>>, vector<8x1x128xf32>
    tpu.vector_store %arg6[%c0_23, %c1_24, %c0_25], %67 {strides = array<i32>} : memref<8x8x128xf32, #tpu.memory_space<vmem>>, vector<8x1x128xf32>,
    %c0_26 = arith.constant 0 : index
    %c2 = arith.constant 2 : index
    %c0_27 = arith.constant 0 : index
    %69 = vector.load %arg2[%c0_26, %c2, %c0_27] : memref<8x8x512xf32, #tpu.memory_space<vmem>>, vector<8x1x512xf32>
    %70 = vector.shape_cast %69 : vector<8x1x512xf32> to vector<8x512xf32>
    %c0_28 = arith.constant 0 : index
    %c0_29 = arith.constant 0 : index
    %71 = vector.load %arg3[%c0_28, %c0_29] : memref<128x512xf32, #tpu.memory_space<vmem>>, vector<128x512xf32>
    %cst_30 = arith.constant dense<0.000000e+00> : vector<8x512xf32>
    %72 = tpu.matmul %66, %71, %cst_30 {dimension_numbers = #tpu.dot_dimension_numbers<[1], [0], [0], [1], [0, 0, 1, 1], [], []>} : vector<8x128xf32>, vector<128x512xf32>, vector<8x512xf32> -> vector<8x512xf32>
    %73 = arith.addf %70, %72 : vector<8x512xf32>
    %74 = vector.extract_strided_slice %73 {offsets = [0, 0], sizes = [8, 128], strides = [1, 1]} : vector<8x512xf32> to vector<8x128xf32>
    %75 = arith.negf %74 : vector<8x128xf32>
    %76 = math.exp %75 : vector<8x128xf32>
    %cst_31 = arith.constant 1.000000e+00 : f32
    %77 = vector.broadcast %cst_31 : f32 to vector<8x128xf32>
    %78 = arith.addf %77, %76 : vector<8x128xf32>
    %79 = arith.divf %77, %78 : vector<8x128xf32>
    %80 = vector.extract_strided_slice %73 {offsets = [0, 128], sizes = [8, 128], strides = [1, 1]} : vector<8x512xf32> to vector<8x128xf32>
    %81 = arith.negf %80 : vector<8x128xf32>
    %82 = math.exp %81 : vector<8x128xf32>
    %cst_32 = arith.constant 1.000000e+00 : f32
    %83 = vector.broadcast %cst_32 : f32 to vector<8x128xf32>
    %84 = arith.addf %83, %82 : vector<8x128xf32>
    %85 = arith.divf %83, %84 : vector<8x128xf32>
    %86 = vector.extract_strided_slice %73 {offsets = [0, 256], sizes = [8, 128], strides = [1, 1]} : vector<8x512xf32> to vector<8x128xf32>
    %87 = math.tanh %86 : vector<8x128xf32>
    %88 = vector.extract_strided_slice %73 {offsets = [0, 384], sizes = [8, 128], strides = [1, 1]} : vector<8x512xf32> to vector<8x128xf32>
    %89 = arith.negf %88 : vector<8x128xf32>
    %90 = math.exp %89 : vector<8x128xf32>
    %cst_33 = arith.constant 1.000000e+00 : f32
    %91 = vector.broadcast %cst_33 : f32 to vector<8x128xf32>
    %92 = arith.addf %91, %90 : vector<8x128xf32>
    %93 = arith.divf %91, %92 : vector<8x128xf32>
    %94 = arith.mulf %85, %64 : vector<8x128xf32>
    %95 = arith.mulf %79, %87 : vector<8x128xf32>
    %96 = arith.addf %94, %95 : vector<8x128xf32>
    %97 = math.tanh %96 : vector<8x128xf32>
    %98 = arith.mulf %93, %97 : vector<8x128xf32>
    %99 = vector.shape_cast %98 : vector<8x128xf32> to vector<8x1x128xf32>
    %c0_34 = arith.constant 0 : index
    %c2_35 = arith.constant 2 : index
    %c0_36 = arith.constant 0 : index
    %100 = vector.load %arg6[%c0_34, %c2_35, %c0_36] : memref<8x8x128xf32, #tpu.memory_space<vmem>>, vector<8x1x128xf32>
    tpu.vector_store %arg6[%c0_34, %c2_35, %c0_36], %99 {strides = array<i32>} : memref<8x8x128xf32, #tpu.memory_space<vmem>>, vector<8x1x128xf32>,
    %c0_37 = arith.constant 0 : index
    %c3 = arith.constant 3 : index
    %c0_38 = arith.constant 0 : index
    %101 = vector.load %arg2[%c0_37, %c3, %c0_38] : memref<8x8x512xf32, #tpu.memory_space<vmem>>, vector<8x1x512xf32>
    %102 = vector.shape_cast %101 : vector<8x1x512xf32> to vector<8x512xf32>
    %c0_39 = arith.constant 0 : index
    %c0_40 = arith.constant 0 : index
    %103 = vector.load %arg3[%c0_39, %c0_40] : memref<128x512xf32, #tpu.memory_space<vmem>>, vector<128x512xf32>
    %cst_41 = arith.constant dense<0.000000e+00> : vector<8x512xf32>
    %104 = tpu.matmul %98, %103, %cst_41 {dimension_numbers = #tpu.dot_dimension_numbers<[1], [0], [0], [1], [0, 0, 1, 1], [], []>} : vector<8x128xf32>, vector<128x512xf32>, vector<8x512xf32> -> vector<8x512xf32>
    %105 = arith.addf %102, %104 : vector<8x512xf32>
    %106 = vector.extract_strided_slice %105 {offsets = [0, 0], sizes = [8, 128], strides = [1, 1]} : vector<8x512xf32> to vector<8x128xf32>
    %107 = arith.negf %106 : vector<8x128xf32>
    %108 = math.exp %107 : vector<8x128xf32>
    %cst_42 = arith.constant 1.000000e+00 : f32
    %109 = vector.broadcast %cst_42 : f32 to vector<8x128xf32>
    %110 = arith.addf %109, %108 : vector<8x128xf32>
    %111 = arith.divf %109, %110 : vector<8x128xf32>
    %112 = vector.extract_strided_slice %105 {offsets = [0, 128], sizes = [8, 128], strides = [1, 1]} : vector<8x512xf32> to vector<8x128xf32>
    %113 = arith.negf %112 : vector<8x128xf32>
    %114 = math.exp %113 : vector<8x128xf32>
    %cst_43 = arith.constant 1.000000e+00 : f32
    %115 = vector.broadcast %cst_43 : f32 to vector<8x128xf32>
    %116 = arith.addf %115, %114 : vector<8x128xf32>
    %117 = arith.divf %115, %116 : vector<8x128xf32>
    %118 = vector.extract_strided_slice %105 {offsets = [0, 256], sizes = [8, 128], strides = [1, 1]} : vector<8x512xf32> to vector<8x128xf32>
    %119 = math.tanh %118 : vector<8x128xf32>
    %120 = vector.extract_strided_slice %105 {offsets = [0, 384], sizes = [8, 128], strides = [1, 1]} : vector<8x512xf32> to vector<8x128xf32>
    %121 = arith.negf %120 : vector<8x128xf32>
    %122 = math.exp %121 : vector<8x128xf32>
    %cst_44 = arith.constant 1.000000e+00 : f32
    %123 = vector.broadcast %cst_44 : f32 to vector<8x128xf32>
    %124 = arith.addf %123, %122 : vector<8x128xf32>
    %125 = arith.divf %123, %124 : vector<8x128xf32>
    %126 = arith.mulf %117, %96 : vector<8x128xf32>
    %127 = arith.mulf %111, %119 : vector<8x128xf32>
    %128 = arith.addf %126, %127 : vector<8x128xf32>
    %129 = math.tanh %128 : vector<8x128xf32>
    %130 = arith.mulf %125, %129 : vector<8x128xf32>
    %131 = vector.shape_cast %130 : vector<8x128xf32> to vector<8x1x128xf32>
    %c0_45 = arith.constant 0 : index
    %c3_46 = arith.constant 3 : index
    %c0_47 = arith.constant 0 : index
    %132 = vector.load %arg6[%c0_45, %c3_46, %c0_47] : memref<8x8x128xf32, #tpu.memory_space<vmem>>, vector<8x1x128xf32>
    tpu.vector_store %arg6[%c0_45, %c3_46, %c0_47], %131 {strides = array<i32>} : memref<8x8x128xf32, #tpu.memory_space<vmem>>, vector<8x1x128xf32>,
    %c0_48 = arith.constant 0 : index
    %c4 = arith.constant 4 : index
    %c0_49 = arith.constant 0 : index
    %133 = vector.load %arg2[%c0_48, %c4, %c0_49] : memref<8x8x512xf32, #tpu.memory_space<vmem>>, vector<8x1x512xf32>
    %134 = vector.shape_cast %133 : vector<8x1x512xf32> to vector<8x512xf32>
    %c0_50 = arith.constant 0 : index
    %c0_51 = arith.constant 0 : index
    %135 = vector.load %arg3[%c0_50, %c0_51] : memref<128x512xf32, #tpu.memory_space<vmem>>, vector<128x512xf32>
    %cst_52 = arith.constant dense<0.000000e+00> : vector<8x512xf32>
    %136 = tpu.matmul %130, %135, %cst_52 {dimension_numbers = #tpu.dot_dimension_numbers<[1], [0], [0], [1], [0, 0, 1, 1], [], []>} : vector<8x128xf32>, vector<128x512xf32>, vector<8x512xf32> -> vector<8x512xf32>
    %137 = arith.addf %134, %136 : vector<8x512xf32>
    %138 = vector.extract_strided_slice %137 {offsets = [0, 0], sizes = [8, 128], strides = [1, 1]} : vector<8x512xf32> to vector<8x128xf32>
    %139 = arith.negf %138 : vector<8x128xf32>
    %140 = math.exp %139 : vector<8x128xf32>
    %cst_53 = arith.constant 1.000000e+00 : f32
    %141 = vector.broadcast %cst_53 : f32 to vector<8x128xf32>
    %142 = arith.addf %141, %140 : vector<8x128xf32>
    %143 = arith.divf %141, %142 : vector<8x128xf32>
    %144 = vector.extract_strided_slice %137 {offsets = [0, 128], sizes = [8, 128], strides = [1, 1]} : vector<8x512xf32> to vector<8x128xf32>
    %145 = arith.negf %144 : vector<8x128xf32>
    %146 = math.exp %145 : vector<8x128xf32>
    %cst_54 = arith.constant 1.000000e+00 : f32
    %147 = vector.broadcast %cst_54 : f32 to vector<8x128xf32>
    %148 = arith.addf %147, %146 : vector<8x128xf32>
    %149 = arith.divf %147, %148 : vector<8x128xf32>
    %150 = vector.extract_strided_slice %137 {offsets = [0, 256], sizes = [8, 128], strides = [1, 1]} : vector<8x512xf32> to vector<8x128xf32>
    %151 = math.tanh %150 : vector<8x128xf32>
    %152 = vector.extract_strided_slice %137 {offsets = [0, 384], sizes = [8, 128], strides = [1, 1]} : vector<8x512xf32> to vector<8x128xf32>
    %153 = arith.negf %152 : vector<8x128xf32>
    %154 = math.exp %153 : vector<8x128xf32>
    %cst_55 = arith.constant 1.000000e+00 : f32
    %155 = vector.broadcast %cst_55 : f32 to vector<8x128xf32>
    %156 = arith.addf %155, %154 : vector<8x128xf32>
    %157 = arith.divf %155, %156 : vector<8x128xf32>
    %158 = arith.mulf %149, %128 : vector<8x128xf32>
    %159 = arith.mulf %143, %151 : vector<8x128xf32>
    %160 = arith.addf %158, %159 : vector<8x128xf32>
    %161 = math.tanh %160 : vector<8x128xf32>
    %162 = arith.mulf %157, %161 : vector<8x128xf32>
    %163 = vector.shape_cast %162 : vector<8x128xf32> to vector<8x1x128xf32>
    %c0_56 = arith.constant 0 : index
    %c4_57 = arith.constant 4 : index
    %c0_58 = arith.constant 0 : index
    %164 = vector.load %arg6[%c0_56, %c4_57, %c0_58] : memref<8x8x128xf32, #tpu.memory_space<vmem>>, vector<8x1x128xf32>
    tpu.vector_store %arg6[%c0_56, %c4_57, %c0_58], %163 {strides = array<i32>} : memref<8x8x128xf32, #tpu.memory_space<vmem>>, vector<8x1x128xf32>,
    %c0_59 = arith.constant 0 : index
    %c5 = arith.constant 5 : index
    %c0_60 = arith.constant 0 : index
    %165 = vector.load %arg2[%c0_59, %c5, %c0_60] : memref<8x8x512xf32, #tpu.memory_space<vmem>>, vector<8x1x512xf32>
    %166 = vector.shape_cast %165 : vector<8x1x512xf32> to vector<8x512xf32>
    %c0_61 = arith.constant 0 : index
    %c0_62 = arith.constant 0 : index
    %167 = vector.load %arg3[%c0_61, %c0_62] : memref<128x512xf32, #tpu.memory_space<vmem>>, vector<128x512xf32>
    %cst_63 = arith.constant dense<0.000000e+00> : vector<8x512xf32>
    %168 = tpu.matmul %162, %167, %cst_63 {dimension_numbers = #tpu.dot_dimension_numbers<[1], [0], [0], [1], [0, 0, 1, 1], [], []>} : vector<8x128xf32>, vector<128x512xf32>, vector<8x512xf32> -> vector<8x512xf32>
    %169 = arith.addf %166, %168 : vector<8x512xf32>
    %170 = vector.extract_strided_slice %169 {offsets = [0, 0], sizes = [8, 128], strides = [1, 1]} : vector<8x512xf32> to vector<8x128xf32>
    %171 = arith.negf %170 : vector<8x128xf32>
    %172 = math.exp %171 : vector<8x128xf32>
    %cst_64 = arith.constant 1.000000e+00 : f32
    %173 = vector.broadcast %cst_64 : f32 to vector<8x128xf32>
    %174 = arith.addf %173, %172 : vector<8x128xf32>
    %175 = arith.divf %173, %174 : vector<8x128xf32>
    %176 = vector.extract_strided_slice %169 {offsets = [0, 128], sizes = [8, 128], strides = [1, 1]} : vector<8x512xf32> to vector<8x128xf32>
    %177 = arith.negf %176 : vector<8x128xf32>
    %178 = math.exp %177 : vector<8x128xf32>
    %cst_65 = arith.constant 1.000000e+00 : f32
    %179 = vector.broadcast %cst_65 : f32 to vector<8x128xf32>
    %180 = arith.addf %179, %178 : vector<8x128xf32>
    %181 = arith.divf %179, %180 : vector<8x128xf32>
    %182 = vector.extract_strided_slice %169 {offsets = [0, 256], sizes = [8, 128], strides = [1, 1]} : vector<8x512xf32> to vector<8x128xf32>
    %183 = math.tanh %182 : vector<8x128xf32>
    %184 = vector.extract_strided_slice %169 {offsets = [0, 384], sizes = [8, 128], strides = [1, 1]} : vector<8x512xf32> to vector<8x128xf32>
    %185 = arith.negf %184 : vector<8x128xf32>
    %186 = math.exp %185 : vector<8x128xf32>
    %cst_66 = arith.constant 1.000000e+00 : f32
    %187 = vector.broadcast %cst_66 : f32 to vector<8x128xf32>
    %188 = arith.addf %187, %186 : vector<8x128xf32>
    %189 = arith.divf %187, %188 : vector<8x128xf32>
    %190 = arith.mulf %181, %160 : vector<8x128xf32>
    %191 = arith.mulf %175, %183 : vector<8x128xf32>
    %192 = arith.addf %190, %191 : vector<8x128xf32>
    %193 = math.tanh %192 : vector<8x128xf32>
    %194 = arith.mulf %189, %193 : vector<8x128xf32>
    %195 = vector.shape_cast %194 : vector<8x128xf32> to vector<8x1x128xf32>
    %c0_67 = arith.constant 0 : index
    %c5_68 = arith.constant 5 : index
    %c0_69 = arith.constant 0 : index
    %196 = vector.load %arg6[%c0_67, %c5_68, %c0_69] : memref<8x8x128xf32, #tpu.memory_space<vmem>>, vector<8x1x128xf32>
    tpu.vector_store %arg6[%c0_67, %c5_68, %c0_69], %195 {strides = array<i32>} : memref<8x8x128xf32, #tpu.memory_space<vmem>>, vector<8x1x128xf32>,
    %c0_70 = arith.constant 0 : index
    %c6 = arith.constant 6 : index
    %c0_71 = arith.constant 0 : index
    %197 = vector.load %arg2[%c0_70, %c6, %c0_71] : memref<8x8x512xf32, #tpu.memory_space<vmem>>, vector<8x1x512xf32>
    %198 = vector.shape_cast %197 : vector<8x1x512xf32> to vector<8x512xf32>
    %c0_72 = arith.constant 0 : index
    %c0_73 = arith.constant 0 : index
    %199 = vector.load %arg3[%c0_72, %c0_73] : memref<128x512xf32, #tpu.memory_space<vmem>>, vector<128x512xf32>
    %cst_74 = arith.constant dense<0.000000e+00> : vector<8x512xf32>
    %200 = tpu.matmul %194, %199, %cst_74 {dimension_numbers = #tpu.dot_dimension_numbers<[1], [0], [0], [1], [0, 0, 1, 1], [], []>} : vector<8x128xf32>, vector<128x512xf32>, vector<8x512xf32> -> vector<8x512xf32>
    %201 = arith.addf %198, %200 : vector<8x512xf32>
    %202 = vector.extract_strided_slice %201 {offsets = [0, 0], sizes = [8, 128], strides = [1, 1]} : vector<8x512xf32> to vector<8x128xf32>
    %203 = arith.negf %202 : vector<8x128xf32>
    %204 = math.exp %203 : vector<8x128xf32>
    %cst_75 = arith.constant 1.000000e+00 : f32
    %205 = vector.broadcast %cst_75 : f32 to vector<8x128xf32>
    %206 = arith.addf %205, %204 : vector<8x128xf32>
    %207 = arith.divf %205, %206 : vector<8x128xf32>
    %208 = vector.extract_strided_slice %201 {offsets = [0, 128], sizes = [8, 128], strides = [1, 1]} : vector<8x512xf32> to vector<8x128xf32>
    %209 = arith.negf %208 : vector<8x128xf32>
    %210 = math.exp %209 : vector<8x128xf32>
    %cst_76 = arith.constant 1.000000e+00 : f32
    %211 = vector.broadcast %cst_76 : f32 to vector<8x128xf32>
    %212 = arith.addf %211, %210 : vector<8x128xf32>
    %213 = arith.divf %211, %212 : vector<8x128xf32>
    %214 = vector.extract_strided_slice %201 {offsets = [0, 256], sizes = [8, 128], strides = [1, 1]} : vector<8x512xf32> to vector<8x128xf32>
    %215 = math.tanh %214 : vector<8x128xf32>
    %216 = vector.extract_strided_slice %201 {offsets = [0, 384], sizes = [8, 128], strides = [1, 1]} : vector<8x512xf32> to vector<8x128xf32>
    %217 = arith.negf %216 : vector<8x128xf32>
    %218 = math.exp %217 : vector<8x128xf32>
    %cst_77 = arith.constant 1.000000e+00 : f32
    %219 = vector.broadcast %cst_77 : f32 to vector<8x128xf32>
    %220 = arith.addf %219, %218 : vector<8x128xf32>
    %221 = arith.divf %219, %220 : vector<8x128xf32>
    %222 = arith.mulf %213, %192 : vector<8x128xf32>
    %223 = arith.mulf %207, %215 : vector<8x128xf32>
    %224 = arith.addf %222, %223 : vector<8x128xf32>
    %225 = math.tanh %224 : vector<8x128xf32>
    %226 = arith.mulf %221, %225 : vector<8x128xf32>
    %227 = vector.shape_cast %226 : vector<8x128xf32> to vector<8x1x128xf32>
    %c0_78 = arith.constant 0 : index
    %c6_79 = arith.constant 6 : index
    %c0_80 = arith.constant 0 : index
    %228 = vector.load %arg6[%c0_78, %c6_79, %c0_80] : memref<8x8x128xf32, #tpu.memory_space<vmem>>, vector<8x1x128xf32>
    tpu.vector_store %arg6[%c0_78, %c6_79, %c0_80], %227 {strides = array<i32>} : memref<8x8x128xf32, #tpu.memory_space<vmem>>, vector<8x1x128xf32>,
    %c0_81 = arith.constant 0 : index
    %c7 = arith.constant 7 : index
    %c0_82 = arith.constant 0 : index
    %229 = vector.load %arg2[%c0_81, %c7, %c0_82] : memref<8x8x512xf32, #tpu.memory_space<vmem>>, vector<8x1x512xf32>
    %230 = vector.shape_cast %229 : vector<8x1x512xf32> to vector<8x512xf32>
    %c0_83 = arith.constant 0 : index
    %c0_84 = arith.constant 0 : index
    %231 = vector.load %arg3[%c0_83, %c0_84] : memref<128x512xf32, #tpu.memory_space<vmem>>, vector<128x512xf32>
    %cst_85 = arith.constant dense<0.000000e+00> : vector<8x512xf32>
    %232 = tpu.matmul %226, %231, %cst_85 {dimension_numbers = #tpu.dot_dimension_numbers<[1], [0], [0], [1], [0, 0, 1, 1], [], []>} : vector<8x128xf32>, vector<128x512xf32>, vector<8x512xf32> -> vector<8x512xf32>
    %233 = arith.addf %230, %232 : vector<8x512xf32>
    %234 = vector.extract_strided_slice %233 {offsets = [0, 0], sizes = [8, 128], strides = [1, 1]} : vector<8x512xf32> to vector<8x128xf32>
    %235 = arith.negf %234 : vector<8x128xf32>
    %236 = math.exp %235 : vector<8x128xf32>
    %cst_86 = arith.constant 1.000000e+00 : f32
    %237 = vector.broadcast %cst_86 : f32 to vector<8x128xf32>
    %238 = arith.addf %237, %236 : vector<8x128xf32>
    %239 = arith.divf %237, %238 : vector<8x128xf32>
    %240 = vector.extract_strided_slice %233 {offsets = [0, 128], sizes = [8, 128], strides = [1, 1]} : vector<8x512xf32> to vector<8x128xf32>
    %241 = arith.negf %240 : vector<8x128xf32>
    %242 = math.exp %241 : vector<8x128xf32>
    %cst_87 = arith.constant 1.000000e+00 : f32
    %243 = vector.broadcast %cst_87 : f32 to vector<8x128xf32>
    %244 = arith.addf %243, %242 : vector<8x128xf32>
    %245 = arith.divf %243, %244 : vector<8x128xf32>
    %246 = vector.extract_strided_slice %233 {offsets = [0, 256], sizes = [8, 128], strides = [1, 1]} : vector<8x512xf32> to vector<8x128xf32>
    %247 = math.tanh %246 : vector<8x128xf32>
    %248 = vector.extract_strided_slice %233 {offsets = [0, 384], sizes = [8, 128], strides = [1, 1]} : vector<8x512xf32> to vector<8x128xf32>
    %249 = arith.negf %248 : vector<8x128xf32>
    %250 = math.exp %249 : vector<8x128xf32>
    %cst_88 = arith.constant 1.000000e+00 : f32
    %251 = vector.broadcast %cst_88 : f32 to vector<8x128xf32>
    %252 = arith.addf %251, %250 : vector<8x128xf32>
    %253 = arith.divf %251, %252 : vector<8x128xf32>
    %254 = arith.mulf %245, %224 : vector<8x128xf32>
    %255 = arith.mulf %239, %247 : vector<8x128xf32>
    %256 = arith.addf %254, %255 : vector<8x128xf32>
    %257 = math.tanh %256 : vector<8x128xf32>
    %258 = arith.mulf %253, %257 : vector<8x128xf32>
    %259 = vector.shape_cast %258 : vector<8x128xf32> to vector<8x1x128xf32>
    %c0_89 = arith.constant 0 : index
    %c7_90 = arith.constant 7 : index
    %c0_91 = arith.constant 0 : index
    %260 = vector.load %arg6[%c0_89, %c7_90, %c0_91] : memref<8x8x128xf32, #tpu.memory_space<vmem>>, vector<8x1x128xf32>
    tpu.vector_store %arg6[%c0_89, %c7_90, %c0_91], %259 {strides = array<i32>} : memref<8x8x128xf32, #tpu.memory_space<vmem>>, vector<8x1x128xf32>,
    %c0_92 = arith.constant 0 : index
    %c0_93 = arith.constant 0 : index
    %261 = vector.load %arg7[%c0_92, %c0_93] : memref<8x128xf32, #tpu.memory_space<vmem>>, vector<8x128xf32>
    tpu.vector_store %arg7[%c0_92, %c0_93], %258 {strides = array<i32>} : memref<8x128xf32, #tpu.memory_space<vmem>>, vector<8x128xf32>,
    %c0_94 = arith.constant 0 : index
    %c0_95 = arith.constant 0 : index
    %262 = vector.load %arg8[%c0_94, %c0_95] : memref<8x128xf32, #tpu.memory_space<vmem>>, vector<8x128xf32>
    tpu.vector_store %arg8[%c0_94, %c0_95], %256 {strides = array<i32>} : memref<8x128xf32, #tpu.memory_space<vmem>>, vector<8x128xf32>,
    return
  }
  func.func @transform_0(%arg0: i32, %arg1: i32) -> (i32, i32, i32) {
    %c0_i32 = arith.constant 0 : i32
    %c0_i32_0 = arith.constant 0 : i32
    return %arg0, %arg1, %c0_i32 : i32, i32, i32
  }
  func.func @transform_1(%arg0: i32, %arg1: i32) -> (i32, i32) {
    %c0_i32 = arith.constant 0 : i32
    %c0_i32_0 = arith.constant 0 : i32
    %c0_i32_1 = arith.constant 0 : i32
    return %c0_i32, %c0_i32_0 : i32, i32
  }
  func.func @transform_2(%arg0: i32, %arg1: i32) -> (i32, i32) {
    %c0_i32 = arith.constant 0 : i32
    %c0_i32_0 = arith.constant 0 : i32
    return %arg0, %c0_i32 : i32, i32
  }
  func.func @transform_3(%arg0: i32, %arg1: i32) -> (i32, i32) {
    %c0_i32 = arith.constant 0 : i32
    %c0_i32_0 = arith.constant 0 : i32
    return %arg0, %c0_i32 : i32, i32
  }
  func.func @transform_4(%arg0: i32, %arg1: i32) -> (i32, i32, i32) {
    %c0_i32 = arith.constant 0 : i32
    %c0_i32_0 = arith.constant 0 : i32
    return %arg0, %arg1, %c0_i32 : i32, i32, i32
  }
  func.func @transform_5(%arg0: i32, %arg1: i32) -> (i32, i32) {
    %c0_i32 = arith.constant 0 : i32
    %c0_i32_0 = arith.constant 0 : i32
    return %arg0, %c0_i32 : i32, i32
  }
  func.func @transform_6(%arg0: i32, %arg1: i32) -> (i32, i32) {
    %c0_i32 = arith.constant 0 : i32
    %c0_i32_0 = arith.constant 0 : i32
    return %arg0, %c0_i32 : i32, i32
  }
}

</mosaic_0001>

<bundles_post_ra>
// kernel: target_lstm_forward.1
= control target key start
LH: loop header
LB: loop body
LE: loop exit
PB: predicated region body
PF: predicated region fallthrough
CT: control target
= control target key end

     0   :  { %v9553_v3 = vmov 0.0   ;;  %s9546_s1 = inlined_call_operand.vmem [shape: f32[128,512], index: 1, kind: input, shape index: {}]   ;;  %s9547_s2 = inlined_call_operand.vmem [shape: f32[8,128], index: 2, kind: input, shape index: {}, may-alias: {2,3}]   ;;  %s9548_s0 = inlined_call_operand.vmem [shape: f32[8,8,512], index: 0, kind: input, shape index: {}]   ;;  %s9549_s3 = inlined_call_operand.vmem [shape: f32[8,128], index: 3, kind: input, shape index: {}, may-alias: {2,3}]   ;;  %s9550_s4 = inlined_call_operand.vmem [shape: f32[8,8,128], index: 4, kind: output, shape index: {0}]   ;;  %s9551_s6 = inlined_call_operand.vmem [shape: f32[8,128], index: 6, kind: output, shape index: {2}]   ;;  %s9552_s5 = inlined_call_operand.vmem [shape: f32[8,128], index: 5, kind: output, shape index: {1}]  }
   0x1   :  { %v6473_v0 = vld [vmem:[%s9546_s1 + $0x1e8] sm:$0xff]  ;;  %v6478_v1 = vld [vmem:[%s9546_s1 + $0x1f8] sm:$0xff]  ;;  %v6483_v2 = vld [vmem:[%s9546_s1 + $0x1e0] sm:$0xff]  ;;  %173 = vmatprep.mubr.f32.mxu0 %v9553_v3  ;;  %244 = vmatprep.mubr.f32.mxu1 %v9553_v3 }
   0x2   :  { %109 = vmatprep.subr.mxu0 %v6473_v0  ;;  %180 = vmatprep.subr.mxu1 %v6478_v1  ;;  %v6492_v4 = vld [vmem:[%s9546_s1 + $0x1f0] sm:$0xff]  ;;  %v6497_v5 = vld [vmem:[%s9546_s1 + $0x1c8] sm:$0xff]  ;;  %v6502_v6 = vld [vmem:[%s9546_s1 + $0x1d8] sm:$0xff] }
   0x3   :  { %110 = vmatpush1.msra.mxu0 %v6483_v2  ;;  %181 = vmatpush1.msra.mxu1 %v6492_v4  ;;  %v6509_v7 = vld [vmem:[%s9546_s1 + $0x1c0] sm:$0xff]  ;;  %v6514_v8 = vld [vmem:[%s9546_s1 + $0x1d0] sm:$0xff]  ;;  %v6519_v9 = vld [vmem:[%s9546_s1 + $0x1a8] sm:$0xff] }
   0x4   :  { %111 = vmatprep.subr.mxu0 %v6497_v5  ;;  %182 = vmatprep.subr.mxu1 %v6502_v6  ;;  %v6526_v10 = vld [vmem:[%s9546_s1 + $0x1b8] sm:$0xff]  ;;  %v6531_v11 = vld [vmem:[%s9546_s1 + $0x1a0] sm:$0xff]  ;;  %v6536_v12 = vld [vmem:[%s9546_s1 + $0x1b0] sm:$0xff] }
   0x5   :  { %112 = vmatpush1.msra.mxu0 %v6509_v7  ;;  %183 = vmatpush1.msra.mxu1 %v6514_v8  ;;  %v6543_v13 = vld [vmem:[%s9546_s1 + $0x188] sm:$0xff]  ;;  %v6548_v14 = vld [vmem:[%s9546_s1 + $0x198] sm:$0xff]  ;;  %v6555_v15 = vld [vmem:[%s9546_s1 + $0x180] sm:$0xff] }
   0x6   :  { %113 = vmatprep.subr.mxu0 %v6519_v9  ;;  %184 = vmatprep.subr.mxu1 %v6526_v10  ;;  %v6560_v16 = vld [vmem:[%s9546_s1 + $0x190] sm:$0xff]  ;;  %v6567_v17 = vld [vmem:[%s9546_s1 + $0x168] sm:$0xff]  ;;  %v6572_v18 = vld [vmem:[%s9546_s1 + $0x178] sm:$0xff] }
   0x7   :  { %114 = vmatpush1.msra.mxu0 %v6531_v11  ;;  %185 = vmatpush1.msra.mxu1 %v6536_v12  ;;  %v6579_v19 = vld [vmem:[%s9546_s1 + $0x160] sm:$0xff]  ;;  %v6584_v20 = vld [vmem:[%s9546_s1 + $0x170] sm:$0xff]  ;;  %v6591_v21 = vld [vmem:[%s9546_s1 + $0x148] sm:$0xff] }
   0x8   :  { %115 = vmatprep.subr.mxu0 %v6543_v13  ;;  %186 = vmatprep.subr.mxu1 %v6548_v14  ;;  %v6596_v22 = vld [vmem:[%s9546_s1 + $0x158] sm:$0xff]  ;;  %v6603_v23 = vld [vmem:[%s9546_s1 + $0x140] sm:$0xff]  ;;  %v6608_v24 = vld [vmem:[%s9546_s1 + $0x150] sm:$0xff] }
   0x9   :  { %116 = vmatpush1.msra.mxu0 %v6555_v15  ;;  %187 = vmatpush1.msra.mxu1 %v6560_v16  ;;  %v6615_v25 = vld [vmem:[%s9546_s1 + $0x128] sm:$0xff]  ;;  %v6620_v26 = vld [vmem:[%s9546_s1 + $0x138] sm:$0xff]  ;;  %v6627_v27 = vld [vmem:[%s9546_s1 + $0x120] sm:$0xff] }
   0xa   :  { %117 = vmatprep.subr.mxu0 %v6567_v17  ;;  %188 = vmatprep.subr.mxu1 %v6572_v18  ;;  %v6632_v28 = vld [vmem:[%s9546_s1 + $0x130] sm:$0xff]  ;;  %v6639_v29 = vld [vmem:[%s9546_s1 + $0x108] sm:$0xff]  ;;  %v6644_v30 = vld [vmem:[%s9546_s1 + $0x118] sm:$0xff] }
   0xb   :  { %118 = vmatpush1.msra.mxu0 %v6579_v19  ;;  %189 = vmatpush1.msra.mxu1 %v6584_v20  ;;  %v6651_v31 = vld [vmem:[%s9546_s1 + $0x100] sm:$0xff]  ;;  %v6656_v32 = vld [vmem:[%s9546_s1 + $0x110] sm:$0xff]  ;;  %v6663_v33 = vld [vmem:[%s9546_s1 + $0xe8] sm:$0xff] }
   0xc   :  { %119 = vmatprep.subr.mxu0 %v6591_v21  ;;  %190 = vmatprep.subr.mxu1 %v6596_v22  ;;  %v6668_v34 = vld [vmem:[%s9546_s1 + $0xf8] sm:$0xff]  ;;  %v6675_v35 = vld [vmem:[%s9546_s1 + $0xe0] sm:$0xff]  ;;  %v6680_v36 = vld [vmem:[%s9546_s1 + $0xf0] sm:$0xff] }
   0xd   :  { %120 = vmatpush1.msra.mxu0 %v6603_v23  ;;  %191 = vmatpush1.msra.mxu1 %v6608_v24  ;;  %v6687_v37 = vld [vmem:[%s9546_s1 + $0xc8] sm:$0xff]  ;;  %v6692_v38 = vld [vmem:[%s9546_s1 + $0xd8] sm:$0xff]  ;;  %v6699_v39 = vld [vmem:[%s9546_s1 + $0xc0] sm:$0xff] }
   0xe   :  { %121 = vmatprep.subr.mxu0 %v6615_v25  ;;  %192 = vmatprep.subr.mxu1 %v6620_v26  ;;  %v6704_v40 = vld [vmem:[%s9546_s1 + $0xd0] sm:$0xff]  ;;  %v6711_v41 = vld [vmem:[%s9546_s1 + $0xa8] sm:$0xff]  ;;  %v6716_v42 = vld [vmem:[%s9546_s1 + $0xb8] sm:$0xff] }
   0xf   :  { %122 = vmatpush1.msra.mxu0 %v6627_v27  ;;  %193 = vmatpush1.msra.mxu1 %v6632_v28  ;;  %v6723_v43 = vld [vmem:[%s9546_s1 + $0xa0] sm:$0xff]  ;;  %v6728_v44 = vld [vmem:[%s9546_s1 + $0xb0] sm:$0xff]  ;;  %v6735_v45 = vld [vmem:[%s9546_s1 + $0x88] sm:$0xff] }
  0x10   :  { %123 = vmatprep.subr.mxu0 %v6639_v29  ;;  %194 = vmatprep.subr.mxu1 %v6644_v30  ;;  %v6740_v46 = vld [vmem:[%s9546_s1 + $0x98] sm:$0xff]  ;;  %v6747_v47 = vld [vmem:[%s9546_s1 + $0x80] sm:$0xff]  ;;  %v6752_v48 = vld [vmem:[%s9546_s1 + $0x90] sm:$0xff] }
  0x11   :  { %124 = vmatpush1.msra.mxu0 %v6651_v31  ;;  %195 = vmatpush1.msra.mxu1 %v6656_v32  ;;  %v6759_v49 = vld [vmem:[%s9546_s1 + $0x68] sm:$0xff]  ;;  %v6764_v50 = vld [vmem:[%s9546_s1 + $0x78] sm:$0xff]  ;;  %v6771_v51 = vld [vmem:[%s9546_s1 + $0x60] sm:$0xff] }
  0x12   :  { %125 = vmatprep.subr.mxu0 %v6663_v33  ;;  %196 = vmatprep.subr.mxu1 %v6668_v34  ;;  %v6776_v52 = vld [vmem:[%s9546_s1 + $0x70] sm:$0xff]  ;;  %v6783_v53 = vld [vmem:[%s9546_s1 + $0x48] sm:$0xff]  ;;  %v6788_v54 = vld [vmem:[%s9546_s1 + $0x58] sm:$0xff] }
  0x13   :  { %126 = vmatpush1.msra.mxu0 %v6675_v35  ;;  %197 = vmatpush1.msra.mxu1 %v6680_v36  ;;  %v6795_v55 = vld [vmem:[%s9546_s1 + $0x40] sm:$0xff]  ;;  %v6800_v56 = vld [vmem:[%s9546_s1 + $0x50] sm:$0xff]  ;;  %v6807_v57 = vld [vmem:[%s9546_s1 + $0x28] sm:$0xff] }
  0x14   :  { %127 = vmatprep.subr.mxu0 %v6687_v37  ;;  %198 = vmatprep.subr.mxu1 %v6692_v38  ;;  %9679 = vst [vmem:[#allocation2_spill] sm:$0xff] %v6807_v57  ;;  %v6812_v58 = vld [vmem:[%s9546_s1 + $0x38] sm:$0xff]  ;;  %v6819_v59 = vld [vmem:[%s9546_s1 + $0x20] sm:$0xff]  ;;  %v6824_v60 = vld [vmem:[%s9546_s1 + $0x30] sm:$0xff] }
  0x15   :  { %128 = vmatpush1.msra.mxu0 %v6699_v39  ;;  %199 = vmatpush1.msra.mxu1 %v6704_v40  ;;  %v6831_v61 = vld [vmem:[%s9546_s1 + $0x8] sm:$0xff]  ;;  %v6836_v62 = vld [vmem:[%s9546_s1 + $0x18] sm:$0xff]  ;;  %v6843_v63 = vld [vmem:[%s9546_s1] sm:$0xff] }
  0x16   :  { %129 = vmatprep.subr.mxu0 %v6711_v41  ;;  %200 = vmatprep.subr.mxu1 %v6716_v42  ;;  %v6848_v3 = vld [vmem:[%s9546_s1 + $0x10] sm:$0xff] }
  0x17   :  { %130 = vmatpush1.msra.mxu0 %v6723_v43  ;;  %201 = vmatpush1.msra.mxu1 %v6728_v44 }
  0x18   :  { %131 = vmatprep.subr.mxu0 %v6735_v45  ;;  %202 = vmatprep.subr.mxu1 %v6740_v46 }
  0x19   :  { %132 = vmatpush1.msra.mxu0 %v6747_v47  ;;  %203 = vmatpush1.msra.mxu1 %v6752_v48 }
  0x1a   :  { %133 = vmatprep.subr.mxu0 %v6759_v49  ;;  %204 = vmatprep.subr.mxu1 %v6764_v50 }
  0x1b   :  { %134 = vmatpush1.msra.mxu0 %v6771_v51  ;;  %205 = vmatpush1.msra.mxu1 %v6776_v52 }
  0x1c   :  { %135 = vmatprep.subr.mxu0 %v6783_v53  ;;  %206 = vmatprep.subr.mxu1 %v6788_v54 }
  0x1d   :  { %136 = vmatpush1.msra.mxu0 %v6795_v55  ;;  %207 = vmatpush1.msra.mxu1 %v6800_v56 }
  0x1e   :  { %137 = vmatprep.subr.mxu0 %v6807_v57  ;;  %208 = vmatprep.subr.mxu1 %v6812_v58  ;;  %v24_v57 = vld [vmem:[%s9547_s2] sm:$0xff] }
  0x1f   :  { %138 = vmatpush1.msra.mxu0 %v6819_v59  ;;  %209 = vmatpush1.msra.mxu1 %v6824_v60 }
  0x20   :  { %139 = vmatprep.subr.mxu0 %v6831_v61  ;;  %210 = vmatprep.subr.mxu1 %v6836_v62 }
  0x21   :  { %140 = vmatpush1.msra.mxu0 %v6843_v63  ;;  %211 = vmatpush1.msra.mxu1 %v6848_v3 }
  0x22   :  { %174 = vmatmul.mubr.f32.vlgmr.msra.gmra.mxu0 %v24_v57  ;;  %245 = vmatmul.mubr.f32.vlgmr.msra.gmra.mxu1 %v24_v57 }
  0x23   :  { %791 = vmatprep.subr.mxu0 %v6473_v0  ;;  %862 = vmatprep.subr.mxu1 %v6478_v1  ;;  %v9680_v0 = vld [vmem:[#allocation2_spill] sm:$0xff]  ;;  %v9681_v1 = vmov 0.0  }
  0x24   :  { %792 = vmatpush1.msra.mxu0 %v6483_v2  ;;  %863 = vmatpush1.msra.mxu1 %v6492_v4  ;;  %v6434_v2 = vmov 1966171168  }
  0x25   :  { %793 = vmatprep.subr.mxu0 %v6497_v5  ;;  %864 = vmatprep.subr.mxu1 %v6502_v6  ;;  %v260_v4 = vunpack.c.l.s4 %v6434_v2  ;;  %v262_v5 = vlaneseq }
  0x26   :  { %794 = vmatpush1.msra.mxu0 %v6509_v7  ;;  %865 = vmatpush1.msra.mxu1 %v6514_v8 }
  0x27   :  { %795 = vmatprep.subr.mxu0 %v6519_v9  ;;  %866 = vmatprep.subr.mxu1 %v6526_v10  ;;  %v261_v6 = vunpack.c.0.s8 %v260_v4  ;;  %v263_v7 = vshrl.u32 %v262_v5, 7 }
  0x28   :  { %796 = vmatpush1.msra.mxu0 %v6531_v11  ;;  %867 = vmatpush1.msra.mxu1 %v6536_v12 }
  0x29   :  { %797 = vmatprep.subr.mxu0 %v6543_v13  ;;  %868 = vmatprep.subr.mxu1 %v6548_v14  ;;  %v6925_v10 = vsub.s32 %v261_v6, %v263_v7 }
  0x2a   :  { %798 = vmatpush1.msra.mxu0 %v6555_v15  ;;  %869 = vmatpush1.msra.mxu1 %v6560_v16 }
  0x2b   :  { %799 = vmatprep.subr.mxu0 %v6567_v17  ;;  %870 = vmatprep.subr.mxu1 %v6572_v18 }
  0x2c   :  { %800 = vmatpush1.msra.mxu0 %v6579_v19  ;;  %871 = vmatpush1.msra.mxu1 %v6584_v20 }
  0x2d   :  { %801 = vmatprep.subr.mxu0 %v6591_v21  ;;  %872 = vmatprep.subr.mxu1 %v6596_v22 }
  0x2e   :  { %802 = vmatpush1.msra.mxu0 %v6603_v23  ;;  %873 = vmatpush1.msra.mxu1 %v6608_v24  ;;  %v30_v24 = vld [vmem:[%s9548_s0] ss:$8 sm:$0xf] }
  0x2f   :  { %803 = vmatprep.subr.mxu0 %v6615_v25  ;;  %874 = vmatprep.subr.mxu1 %v6620_v26  ;;  %v5151_v25 = vld [vmem:[%s9548_s0 + $0x20] ss:$8 sm:$0xf] }
  0x30   :  { %804 = vmatpush1.msra.mxu0 %v6627_v27  ;;  %875 = vmatpush1.msra.mxu1 %v6632_v28  ;;  %v5152_v26 = vld [vmem:[%s9548_s0 + $0x40] ss:$8 sm:$0xf] }
  0x31   :  { %805 = vmatprep.subr.mxu0 %v6639_v29  ;;  %876 = vmatprep.subr.mxu1 %v6644_v30  ;;  %v5154_v27 = vld [vmem:[%s9548_s0 + $0x80] ss:$8 sm:$0xf] }
  0x32   :  { %806 = vmatpush1.msra.mxu0 %v6651_v31  ;;  %877 = vmatpush1.msra.mxu1 %v6656_v32  ;;  %v5153_v32 = vld [vmem:[%s9548_s0 + $0x60] ss:$8 sm:$0xf] }
  0x33   :  { %807 = vmatprep.subr.mxu0 %v6663_v33  ;;  %878 = vmatprep.subr.mxu1 %v6668_v34  ;;  %v5155_v33 = vld [vmem:[%s9548_s0 + $0xa0] ss:$8 sm:$0xf] }
  0x34   :  { %808 = vmatpush1.msra.mxu0 %v6675_v35  ;;  %879 = vmatpush1.msra.mxu1 %v6680_v36  ;;  %v5156_v34 = vld [vmem:[%s9548_s0 + $0xc0] ss:$8 sm:$0xf] }
  0x35   :  { %809 = vmatprep.subr.mxu0 %v6687_v37  ;;  %880 = vmatprep.subr.mxu1 %v6692_v38 }
  0x36   :  { %810 = vmatpush1.msra.mxu0 %v6699_v39  ;;  %881 = vmatpush1.msra.mxu1 %v6704_v40  ;;  %v5157_v39 = vld [vmem:[%s9548_s0 + $0xe0] ss:$8 sm:$0xf] }
  0x37   :  { %811 = vmatprep.subr.mxu0 %v6711_v41  ;;  %882 = vmatprep.subr.mxu1 %v6716_v42 }
  0x38   :  { %812 = vmatpush1.msra.mxu0 %v6723_v43  ;;  %883 = vmatpush1.msra.mxu1 %v6728_v44 }
  0x39   :  { %813 = vmatprep.subr.mxu0 %v6735_v45  ;;  %884 = vmatprep.subr.mxu1 %v6740_v46 }
  0x3a   :  { %814 = vmatpush1.msra.mxu0 %v6747_v47  ;;  %885 = vmatpush1.msra.mxu1 %v6752_v48 }
  0x3b   :  { %815 = vmatprep.subr.mxu0 %v6759_v49  ;;  %886 = vmatprep.subr.mxu1 %v6764_v50 }
  0x3c   :  { %816 = vmatpush1.msra.mxu0 %v6771_v51  ;;  %887 = vmatpush1.msra.mxu1 %v6776_v52 }
  0x3d   :  { %817 = vmatprep.subr.mxu0 %v6783_v53  ;;  %888 = vmatprep.subr.mxu1 %v6788_v54 }
  0x3e   :  { %818 = vmatpush1.msra.mxu0 %v6795_v55  ;;  %889 = vmatpush1.msra.mxu1 %v6800_v56 }
  0x3f   :  { %819 = vmatprep.subr.mxu0 %v9680_v0  ;;  %890 = vmatprep.subr.mxu1 %v6812_v58 }
  0x40   :  { %820 = vmatpush1.msra.mxu0 %v6819_v59  ;;  %891 = vmatpush1.msra.mxu1 %v6824_v60 }
  0x41   :  { %821 = vmatprep.subr.mxu0 %v6831_v61  ;;  %892 = vmatprep.subr.mxu1 %v6836_v62 }
  0x42   :  { %822 = vmatpush1.msra.mxu0 %v6843_v63  ;;  %855 = vmatprep.mubr.f32.mxu0 %v9681_v1 }
  0x43   :  { %893 = vmatpush1.msra.mxu1 %v6848_v3  ;;  %926 = vmatprep.mubr.f32.mxu1 %v9681_v1 }
  0xe2   :  { %v175_v8 = vpop.f32.mrf.mxu0  ;;  %v246_v9 = vpop.f32.mrf.mxu1 }
  0xe4   :  { %v177_v11 = vpop.f32.mrf.mxu0  ;;  %v248_v12 = vpop.f32.mrf.mxu1 }
  0xe5   :  { %v255_v13 = vcombine.low %v175_v8, %v177_v11  ;;  %v256_v14 = vcombine.high %v175_v8, %v177_v11  ;;  %v257_v15 = vcombine.low %v246_v9, %v248_v12  ;;  %v258_v16 = vcombine.high %v246_v9, %v248_v12 }
  0xe7   :  { %v265_v17 = vrot.slane %v255_v13, %v6925_v10  ;;  %v272_v3 = vrot.slane %v256_v14, %v6925_v10  ;;  %v279_v18 = vrot.slane %v257_v15, %v6925_v10  ;;  %v286_v19 = vrot.slane %v258_v16, %v6925_v10 }
  0xe9   :  { %v287_v20 = vcombine.low %v265_v17, %v279_v18  ;;  %v288_v21 = vcombine.high %v265_v17, %v279_v18  ;;  %v289_v22 = vcombine.low %v272_v3, %v286_v19  ;;  %v290_v23 = vcombine.high %v272_v3, %v286_v19 }
  0xeb   :  { %v297_v28 = vrot.slane %v287_v20, %v6925_v10  ;;  %v304_v29 = vrot.slane %v289_v22, %v6925_v10  ;;  %v311_v30 = vrot.slane %v288_v21, %v6925_v10  ;;  %v318_v31 = vrot.slane %v290_v23, %v6925_v10 }
  0xed   :  { %v319_v35 = vcombine.high %v297_v28, %v297_v28  ;;  %v320_v36 = vcombine.high %v304_v29, %v304_v29  ;;  %v321_v37 = vcombine.high %v311_v30, %v311_v30  ;;  %v322_v38 = vcombine.high %v318_v31, %v318_v31 }
  0xee   :  { %v6959_v40 = vadd.f32 %v297_v28, %v30_v24  ;;  %v6961_v41 = vadd.f32 %v5151_v25, %v311_v30  ;;  %v6963_v42 = vadd.f32 %v5154_v27, %v304_v29  ;;  %v6969_v45 = vadd.f32 %v5155_v33, %v318_v31 }
  0xef   :  { %v6965_v43 = vadd.f32 %v5152_v26, %v319_v35  ;;  %v6967_v44 = vadd.f32 %v5153_v32, %v321_v37  ;;  %v6971_v46 = vadd.f32 %v5156_v34, %v320_v36  ;;  %v6975_v49 = vadd.f32 %v5157_v39, %v322_v38 }
  0xf0   :  { %v5158_v47 = vmul.f32 -1.442695, %v6959_v40  ;;  %v5159_v48 = vmul.f32 -1.442695, %v6961_v41  ;;  %v5162_v52 = vmul.f32 -1.442695, %v6963_v42 }
  0xf1   :  { %v5160_v50 = vmul.f32 -1.442695, %v6965_v43  ;;  %v5161_v51 = vmul.f32 -1.442695, %v6967_v44  ;;  %v395_v53 = vrot.slane %v6959_v40, 1  ;;  %v396_v55 = vrot.slane %v6961_v41, 1 }
  0xf2   :  { %5409 = vpow2.f32 %v5158_v47  ;;  %v5163_v54 = vmul.f32 -1.442695, %v6969_v45  ;;  %v5164_v56 = vmul.f32 -1.442695, %v6971_v46  ;;  %v397_v57 = vrot.slane %v6965_v43, 1 }
  0xf3   :  { %5411 = vpow2.f32 %v5159_v48  ;;  %v5165_v58 = vmul.f32 -1.442695, %v6975_v49  ;;  %v398_v59 = vrot.slane %v6967_v44, 1  ;;  %v399_v60 = vrot.slane %v6963_v42, 1 }
  0xf4   :  { %5413 = vpow2.f32 %v5160_v50  ;;  %v5166_v61 = vmul.f32 -1.442695, %v395_v53  ;;  %v400_v62 = vrot.slane %v6969_v45, 1  ;;  %v5167_v63 = vmul.f32 -1.442695, %v396_v55  ;;  %v26_v55 = vld [vmem:[%s9549_s3] sm:$0xff] }
  0xf5   :  { %5415 = vpow2.f32 %v5161_v51  ;;  %v401_v0 = vrot.slane %v6971_v46, 1  ;;  %v5168_v2 = vmul.f32 -1.442695, %v397_v57  ;;  %v402_v4 = vrot.slane %v6975_v49, 1 }
  0xf6   :  { %5417 = vpow2.f32 %v5162_v52  ;;  %v5169_v5 = vmul.f32 -1.442695, %v398_v59  ;;  %v5170_v6 = vmul.f32 -1.442695, %v399_v60  ;;  %v5171_v7 = vmul.f32 -1.442695, %v400_v62 }
  0xf7   :  { %5419 = vpow2.f32 %v5163_v54  ;;  %v5172_v8 = vmul.f32 -1.442695, %v401_v0  ;;  %v5173_v9 = vmul.f32 -1.442695, %v402_v4  ;;  %v459_v48 = vrot.slane %v6959_v40, 2 }
  0xf8   :  { %5421 = vpow2.f32 %v5164_v56  ;;  %v460_v52 = vrot.slane %v6961_v41, 2  ;;  %v461_v54 = vrot.slane %v6965_v43, 2  ;;  %v462_v57 = vrot.slane %v6967_v44, 2 }
  0xf9   :  { %5423 = vpow2.f32 %v5165_v58  ;;  %v555_v58 = vrot.slane %v26_v55, %v6925_v10  ;;  %v463_v60 = vrot.slane %v6963_v42, 2  ;;  %v484_v0 = vrot.slane %v6961_v41, 3 }
  0xfa   :  { %5425 = vpow2.f32 %v5166_v61  ;;  %v483_v61 = vrot.slane %v6959_v40, 3  ;;  %v486_v40 = vrot.slane %v6967_v44, 3  ;;  %v487_v41 = vrot.slane %v6963_v42, 3 }
  0xfb   :  { %5427 = vpow2.f32 %v5167_v63  ;;  %v464_v63 = vrot.slane %v6969_v45, 2  ;;  %v571_v44 = vrot.slane %v555_v58, %v6925_v10 }
  0xfc   :  { %5429 = vpow2.f32 %v5168_v2  ;;  %v548_v2 = vcombine.high %v26_v55, %v26_v55  ;;  %v5177_v42 = vmul.f32 -1.442695, %v486_v40 }
  0xfd   :  { %5431 = vpow2.f32 %v5169_v5  ;;  %v465_v5 = vrot.slane %v6971_v46, 2 }
  0xfe   :  { %5433 = vpow2.f32 %v5170_v6  ;;  %v485_v6 = vrot.slane %v6965_v43, 3  ;;  %v562_v43 = vrot.slane %v548_v2, %v6925_v10 }
  0xff   :  { %v5410_v11 = vpop.eup %5409  ;;  %5435 = vpow2.f32 %v5171_v7 }
 0x100   :  { %v5412_v12 = vpop.eup %5411  ;;  %v363_v13 = vadd.f32 1.0, %v5410_v11  ;;  %5437 = vpow2.f32 %v5172_v8  ;;  %v466_v8 = vrot.slane %v6975_v49, 2 }
 0x101   :  { %v5414_v14 = vpop.eup %5413  ;;  %v364_v15 = vadd.f32 1.0, %v5412_v12  ;;  %5439 = vpow2.f32 %v5173_v9  ;;  %v563_v9 = vcombine.high %v555_v58, %v555_v58  ;;  %v5174_v12 = vmul.f32 -1.442695, %v483_v61 }
 0x102   :  { %v5416_v16 = vpop.eup %5415  ;;  %v365_v17 = vadd.f32 1.0, %v5414_v14  ;;  %5441 = vrcp.f32 %v363_v13  ;;  %v488_v14 = vrot.slane %v6969_v45, 3  ;;  %v5178_v45 = vmul.f32 -1.442695, %v487_v41 }
 0x103   :  { %v5418_v3 = vpop.eup %5417  ;;  %v366_v18 = vadd.f32 1.0, %v5416_v16  ;;  %5443 = vrcp.f32 %v364_v15  ;;  %v5175_v15 = vmul.f32 -1.442695, %v484_v0 }
 0x104   :  { %v5420_v19 = vpop.eup %5419  ;;  %v367_v20 = vadd.f32 1.0, %v5418_v3  ;;  %5445 = vrcp.f32 %v365_v17  ;;  %v489_v17 = vrot.slane %v6971_v46, 3  ;;  %v5176_v3 = vmul.f32 -1.442695, %v485_v6 }
 0x105   :  { %v5422_v21 = vpop.eup %5421  ;;  %v368_v22 = vadd.f32 1.0, %v5420_v19  ;;  %5447 = vrcp.f32 %v366_v18  ;;  %v490_v19 = vrot.slane %v6975_v49, 3  ;;  %v578_v49 = vrot.slane %v562_v43, %v6925_v10 }
 0x106   :  { %v5424_v23 = vpop.eup %5423  ;;  %v369_v24 = vadd.f32 1.0, %v5422_v21  ;;  %5449 = vrcp.f32 %v367_v20  ;;  %v585_v20 = vrot.slane %v563_v9, %v6925_v10  ;;  %v5180_v46 = vmul.f32 -1.442695, %v489_v17 }
 0x107   :  { %v5426_v25 = vpop.eup %5425  ;;  %v370_v26 = vadd.f32 1.0, %v5424_v23  ;;  %5451 = vrcp.f32 %v368_v22  ;;  %v5179_v23 = vmul.f32 -1.442695, %v488_v14 }
 0x108   :  { %v5428_v27 = vpop.eup %5427  ;;  %5453 = vrcp.f32 %v369_v24  ;;  %v435_v28 = vadd.f32 1.0, %v5426_v25  ;;  %v564_v24 = vcombine.high %v562_v43, %v562_v43 }
 0x109   :  { %v5430_v29 = vpop.eup %5429  ;;  %5455 = vrcp.f32 %v370_v26  ;;  %v436_v30 = vadd.f32 1.0, %v5428_v27  ;;  %v593_v26 = vcombine.high %v571_v44, %v571_v44 }
 0x10a   :  { %v5432_v31 = vpop.eup %5431  ;;  %v437_v32 = vadd.f32 1.0, %v5430_v29  ;;  %5457 = vrcp.f32 %v435_v28  ;;  %v5181_v28 = vmul.f32 -1.442695, %v490_v19  ;;  %v595_v29 = vcombine.high %v585_v20, %v585_v20 }
 0x10b   :  { %v5434_v33 = vpop.eup %5433  ;;  %v438_v34 = vadd.f32 1.0, %v5432_v31  ;;  %5459 = vrcp.f32 %v436_v30 }
 0x10c   :  { %v5436_v35 = vpop.eup %5435  ;;  %v439_v36 = vadd.f32 1.0, %v5434_v33  ;;  %5461 = vrcp.f32 %v437_v32  ;;  %v592_v33 = vrot.slane %v564_v24, %v6925_v10 }
 0x10d   :  { %v5438_v37 = vpop.eup %5437  ;;  %v440_v38 = vadd.f32 1.0, %v5436_v35  ;;  %5463 = vrcp.f32 %v438_v34 }
 0x10e   :  { %v5440_v39 = vpop.eup %5439  ;;  %v441_v47 = vadd.f32 1.0, %v5438_v37  ;;  %5465 = vrcp.f32 %v439_v36 }
 0x10f   :  { %v6992_v50 = vpop.eup %5441  ;;  %v442_v51 = vadd.f32 1.0, %v5440_v39  ;;  %5467 = vrcp.f32 %v440_v38 }
 0x110   :  { %v6995_v53 = vpop.eup %5443  ;;  %5469 = vrcp.f32 %v441_v47 }
 0x111   :  { %v7001_v56 = vpop.eup %5445  ;;  %5471 = vrcp.f32 %v442_v51 }
 0x112   :  { %v7005_v59 = vpop.eup %5447  ;;  %5473 = vtanh.f32 %v459_v48 }
 0x113   :  { %v7009_v62 = vpop.eup %5449  ;;  %5475 = vtanh.f32 %v460_v52 }
 0x114   :  { %v7013_v4 = vpop.eup %5451  ;;  %5477 = vtanh.f32 %v461_v54 }
 0x115   :  { %v7017_v7 = vpop.eup %5453  ;;  %5479 = vtanh.f32 %v462_v57 }
 0x116   :  { %v7021_v11 = vpop.eup %5455  ;;  %5481 = vtanh.f32 %v463_v60 }
 0x117   :  { %v5458_v13 = vpop.eup %5457  ;;  %5483 = vtanh.f32 %v464_v63 }
 0x118   :  { %v5460_v16 = vpop.eup %5459  ;;  %5485 = vtanh.f32 %v465_v5  ;;  %v605_v31 = vmul.f32 %v5458_v13, %v571_v44  ;;  %v594_v5 = vcombine.high %v578_v49, %v578_v49 }
 0x119   :  { %v5462_v18 = vpop.eup %5461  ;;  %5487 = vtanh.f32 %v466_v8  ;;  %v606_v34 = vmul.f32 %v5460_v16, %v585_v20  ;;  %v596_v8 = vcombine.high %v592_v33, %v592_v33 }
 0x11a   :  { %v5464_v21 = vpop.eup %5463  ;;  %5489 = vpow2.f32 %v5174_v12  ;;  %v607_v37 = vmul.f32 %v5462_v18, %v593_v26 }
 0x11b   :  { %v5466_v22 = vpop.eup %5465  ;;  %5491 = vpow2.f32 %v5175_v15  ;;  %v608_v47 = vmul.f32 %v5464_v21, %v595_v29 }
 0x11c   :  { %v5468_v25 = vpop.eup %5467  ;;  %5493 = vpow2.f32 %v5176_v3  ;;  %v609_v52 = vmul.f32 %v5466_v22, %v578_v49 }
 0x11d   :  { %v5470_v27 = vpop.eup %5469  ;;  %5495 = vpow2.f32 %v5177_v42  ;;  %v610_v58 = vmul.f32 %v5468_v25, %v592_v33 }
 0x11e   :  { %v5472_v30 = vpop.eup %5471  ;;  %5497 = vpow2.f32 %v5178_v45  ;;  %v611_v14 = vmul.f32 %v5470_v27, %v594_v5 }
 0x11f   :  { %v5474_v32 = vpop.eup %5473  ;;  %5499 = vpow2.f32 %v5179_v23  ;;  %v612_v16 = vmul.f32 %v5472_v30, %v596_v8 }
 0x120   :  { %v5476_v35 = vpop.eup %5475  ;;  %5501 = vpow2.f32 %v5180_v46  ;;  %v613_v36 = vmul.f32 %v5474_v32, %v6992_v50 }
 0x121   :  { %v5478_v38 = vpop.eup %5477  ;;  %5503 = vpow2.f32 %v5181_v28  ;;  %v614_v39 = vmul.f32 %v5476_v35, %v6995_v53 }
 0x122   :  { %v5480_v48 = vpop.eup %5479  ;;  %v615_v51 = vmul.f32 %v5478_v38, %v7001_v56  ;;  %v7035_v54 = vadd.f32 %v613_v36, %v605_v31 }
 0x123   :  { %v5482_v55 = vpop.eup %5481  ;;  %v616_v57 = vmul.f32 %v5480_v48, %v7005_v59  ;;  %v7038_v60 = vadd.f32 %v614_v39, %v606_v34 }
 0x124   :  { %v5484_v61 = vpop.eup %5483  ;;  %v617_v50 = vmul.f32 %v5482_v55, %v7009_v62  ;;  %v7041_v63 = vadd.f32 %v615_v51, %v607_v37  ;;  %5505 = vtanh.f32 %v7035_v54 }
 0x125   :  { %v5486_v53 = vpop.eup %5485  ;;  %v618_v0 = vmul.f32 %v5484_v61, %v7013_v4  ;;  %v7045_v56 = vadd.f32 %v616_v57, %v608_v47  ;;  %5507 = vtanh.f32 %v7038_v60 }
 0x126   :  { %v5488_v2 = vpop.eup %5487  ;;  %v7048_v59 = vadd.f32 %v617_v50, %v609_v52  ;;  %5509 = vtanh.f32 %v7041_v63  ;;  %v619_v44 = vmul.f32 %v5486_v53, %v7017_v7 }
 0x127   :  { %v5490_v6 = vpop.eup %5489  ;;  %v7051_v62 = vadd.f32 %v618_v0, %v610_v58  ;;  %5511 = vtanh.f32 %v7045_v56  ;;  %v620_v42 = vmul.f32 %v5488_v2, %v7021_v11 }
 0x128   :  { %v5492_v40 = vpop.eup %5491  ;;  %v523_v9 = vadd.f32 1.0, %v5490_v6  ;;  %5513 = vtanh.f32 %v7048_v59  ;;  %v7058_v45 = vadd.f32 %v619_v44, %v611_v14  ;;  %v7121_v14 = vld [vmem:[%s9546_s1 + $0x1c8] sm:$0xff]  ;;  %v7155_v44 = vld [vmem:[%s9546_s1 + $0x1a0] sm:$0xff] }
 0x129   :  { %v5494_v4 = vpop.eup %5493  ;;  %v524_v41 = vadd.f32 1.0, %v5492_v40  ;;  %5515 = vtanh.f32 %v7051_v62  ;;  %v7060_v23 = vadd.f32 %v620_v42, %v612_v16  ;;  %v7138_v16 = vld [vmem:[%s9546_s1 + $0x1d0] sm:$0xff]  ;;  %v7172_v42 = vld [vmem:[%s9546_s1 + $0x198] sm:$0xff] }
 0x12a   :  { %v5496_v12 = vpop.eup %5495  ;;  %v525_v13 = vadd.f32 1.0, %v5494_v4  ;;  %5517 = vrcp.f32 %v523_v9  ;;  %v7099_v4 = vld [vmem:[%s9546_s1 + $0x1e8] sm:$0xff] }
 0x12b   :  { %v5498_v15 = vpop.eup %5497  ;;  %v526_v43 = vadd.f32 1.0, %v5496_v12  ;;  %5519 = vrcp.f32 %v524_v41  ;;  %v7104_v41 = vld [vmem:[%s9546_s1 + $0x1f8] sm:$0xff]  ;;  %v7109_v12 = vld [vmem:[%s9546_s1 + $0x1e0] sm:$0xff]  ;;  %1415 = vmatprep.subr.mxu0 %v7099_v4 }
 0x12c   :  { %v5500_v17 = vpop.eup %5499  ;;  %v527_v3 = vadd.f32 1.0, %v5498_v15  ;;  %5521 = vrcp.f32 %v525_v13  ;;  %1486 = vmatprep.subr.mxu1 %v7104_v41  ;;  %v7116_v13 = vld [vmem:[%s9546_s1 + $0x1f0] sm:$0xff]  ;;  %v7126_v15 = vld [vmem:[%s9546_s1 + $0x1d8] sm:$0xff] }
 0x12d   :  { %v5502_v18 = vpop.eup %5501  ;;  %v528_v19 = vadd.f32 1.0, %v5500_v17  ;;  %5523 = vrcp.f32 %v526_v43  ;;  %v7133_v43 = vld [vmem:[%s9546_s1 + $0x1c0] sm:$0xff]  ;;  %v7143_v17 = vld [vmem:[%s9546_s1 + $0x1a8] sm:$0xff] }
 0x12e   :  { %v5504_v20 = vpop.eup %5503  ;;  %v529_v21 = vadd.f32 1.0, %v5502_v18  ;;  %5525 = vrcp.f32 %v527_v3  ;;  %v7150_v3 = vld [vmem:[%s9546_s1 + $0x1b8] sm:$0xff]  ;;  %v7160_v18 = vld [vmem:[%s9546_s1 + $0x1b0] sm:$0xff] }
 0x12f   :  { %v530_v22 = vadd.f32 1.0, %v5504_v20  ;;  %5527 = vrcp.f32 %v528_v19  ;;  %v7167_v19 = vld [vmem:[%s9546_s1 + $0x188] sm:$0xff]  ;;  %v7179_v20 = vld [vmem:[%s9546_s1 + $0x180] sm:$0xff] }
 0x130   :  { %5529 = vrcp.f32 %v529_v21  ;;  %v7184_v21 = vld [vmem:[%s9546_s1 + $0x190] sm:$0xff] }
 0x131   :  { %v5506_v24 = vpop.eup %5505  ;;  %5531 = vrcp.f32 %v530_v22  ;;  %v7191_v22 = vld [vmem:[%s9546_s1 + $0x168] sm:$0xff] }
 0x132   :  { %v5508_v25 = vpop.eup %5507  ;;  %5533 = vtanh.f32 %v7058_v45 }
 0x133   :  { %v5510_v7 = vpop.eup %5509  ;;  %5535 = vtanh.f32 %v7060_v23 }
 0x134   :  { %v5512_v46 = vpop.eup %5511 }
 0x135   :  { %v5514_v11 = vpop.eup %5513 }
 0x136   :  { %v5516_v26 = vpop.eup %5515 }
 0x137   :  { %v5518_v27 = vpop.eup %5517 }
 0x138   :  { %v5520_v28 = vpop.eup %5519  ;;  %v637_v29 = vmul.f32 %v5518_v27, %v5506_v24  ;;  %v7196_v24 = vld [vmem:[%s9546_s1 + $0x178] sm:$0xff]  ;;  %v7232_v27 = vld [vmem:[%s9546_s1 + $0x150] sm:$0xff] }
 0x139   :  { %v5522_v30 = vpop.eup %5521  ;;  %v638_v49 = vmul.f32 %v5520_v28, %v5508_v25  ;;  %v7203_v25 = vld [vmem:[%s9546_s1 + $0x160] sm:$0xff]  ;;  %v7239_v28 = vld [vmem:[%s9546_s1 + $0x128] sm:$0xff] }
 0x13a   :  { %v5524_v31 = vpop.eup %5523  ;;  %v639_v32 = vmul.f32 %v5522_v30, %v5510_v7  ;;  %645 = vst [vmem:[%s9550_s4] sm:$0x1] %v637_v29  ;;  %v7208_v7 = vld [vmem:[%s9546_s1 + $0x170] sm:$0xff]  ;;  %9682 = vst [vmem:[#allocation2_spill] sm:$0xff] %v7239_v28  ;;  %v7251_v30 = vld [vmem:[%s9546_s1 + $0x120] sm:$0xff] }
 0x13b   :  { %v5526_v33 = vpop.eup %5525  ;;  %v640_v34 = vmul.f32 %v5524_v31, %v5512_v46  ;;  %646 = vst [vmem:[%s9550_s4 + $0x8] sm:$0x1] %v638_v49  ;;  %v741_v39 = vcombine.low %v637_v29, %v638_v49  ;;  %v7215_v46 = vld [vmem:[%s9546_s1 + $0x148] sm:$0xff]  ;;  %v7244_v29 = vld [vmem:[%s9546_s1 + $0x138] sm:$0xff]  ;;  %9684 = vst [vmem:[#allocation4_spill] sm:$0xff] %v7251_v30 }
 0x13c   :  { %v5528_v35 = vpop.eup %5527  ;;  %v641_v36 = vmul.f32 %v5526_v33, %v5514_v11  ;;  %647 = vst [vmem:[%s9550_s4 + $0x10] sm:$0x1] %v639_v32  ;;  %v7220_v11 = vld [vmem:[%s9546_s1 + $0x158] sm:$0xff]  ;;  %9683 = vst [vmem:[#allocation3_spill] sm:$0xff] %v7244_v29  ;;  %v7256_v49 = vld [vmem:[%s9546_s1 + $0x130] sm:$0xff] }
 0x13d   :  { %v5530_v37 = vpop.eup %5529  ;;  %v642_v38 = vmul.f32 %v5528_v35, %v5516_v26  ;;  %648 = vst [vmem:[%s9550_s4 + $0x18] sm:$0x1] %v640_v34  ;;  %v742_v47 = vcombine.low %v639_v32, %v640_v34  ;;  %v751_v50 = vrot.slane %v741_v39, %v6925_v10  ;;  %v7227_v26 = vld [vmem:[%s9546_s1 + $0x140] sm:$0xff]  ;;  %9685 = vst [vmem:[#allocation5_spill] sm:$0xff] %v7256_v49  ;;  %v7263_v31 = vld [vmem:[%s9546_s1 + $0x108] sm:$0xff] }
 0x13e   :  { %v5532_v48 = vpop.eup %5531  ;;  %649 = vst [vmem:[%s9550_s4 + $0x20] sm:$0x1] %v641_v36  ;;  %9686 = vst [vmem:[#allocation6_spill] sm:$0xff] %v7263_v31  ;;  %v7268_v32 = vld [vmem:[%s9546_s1 + $0x118] sm:$0xff]  ;;  %v7275_v33 = vld [vmem:[%s9546_s1 + $0x100] sm:$0xff] }
 0x13f   :  { %v5534_v51 = vpop.eup %5533  ;;  %650 = vst [vmem:[%s9550_s4 + $0x28] sm:$0x1] %v642_v38  ;;  %v758_v52 = vrot.slane %v742_v47, %v6925_v10  ;;  %v743_v61 = vcombine.low %v641_v36, %v642_v38  ;;  %9687 = vst [vmem:[#allocation7_spill] sm:$0xff] %v7268_v32  ;;  %v7280_v34 = vld [vmem:[%s9546_s1 + $0x110] sm:$0xff]  ;;  %v7287_v35 = vld [vmem:[%s9546_s1 + $0xe8] sm:$0xff] }
 0x140   :  { %v5536_v55 = vpop.eup %5535  ;;  %v643_v57 = vmul.f32 %v5534_v51, %v5530_v37  ;;  %9688 = vst [vmem:[#allocation8_spill] sm:$0xff] %v7275_v33  ;;  %9689 = vst [vmem:[#allocation9_spill] sm:$0xff] %v7280_v34  ;;  %v7292_v36 = vld [vmem:[%s9546_s1 + $0xf8] sm:$0xff]  ;;  %v7299_v37 = vld [vmem:[%s9546_s1 + $0xe0] sm:$0xff] }
 0x141   :  { %v644_v58 = vmul.f32 %v5536_v55, %v5532_v48  ;;  %v773_v0 = vcombine.low %v751_v50, %v758_v52  ;;  %v765_v2 = vrot.slane %v743_v61, %v6925_v10  ;;  %9690 = vst [vmem:[#allocation10_spill] sm:$0xff] %v7287_v35  ;;  %9691 = vst [vmem:[#allocation11_spill] sm:$0xff] %v7292_v36  ;;  %v7304_v38 = vld [vmem:[%s9546_s1 + $0xf0] sm:$0xff]  ;;  %v7311_v39 = vld [vmem:[%s9546_s1 + $0xc8] sm:$0xff] }
 0x142   :  { %651 = vst [vmem:[%s9550_s4 + $0x30] sm:$0x1] %v643_v57  ;;  %9692 = vst [vmem:[#allocation12_spill] sm:$0xff] %v7299_v37  ;;  %v7316_v47 = vld [vmem:[%s9546_s1 + $0xd8] sm:$0xff]  ;;  %v7323_v48 = vld [vmem:[%s9546_s1 + $0xc0] sm:$0xff] }
 0x143   :  { %652 = vst [vmem:[%s9550_s4 + $0x38] sm:$0x1] %v644_v58  ;;  %v744_v53 = vcombine.low %v643_v57, %v644_v58  ;;  %v781_v8 = vrot.slane %v773_v0, %v6925_v10  ;;  %9693 = vst [vmem:[#allocation13_spill] sm:$0xff] %v7304_v38  ;;  %v7328_v51 = vld [vmem:[%s9546_s1 + $0xd0] sm:$0xff]  ;;  %v7335_v52 = vld [vmem:[%s9546_s1 + $0xa8] sm:$0xff] }
 0x144   :  { %9694 = vst [vmem:[#allocation14_spill] sm:$0xff] %v7311_v39  ;;  %9695 = vst [vmem:[#allocation15_spill] sm:$0xff] %v7316_v47  ;;  %v7340_v55 = vld [vmem:[%s9546_s1 + $0xb8] sm:$0xff]  ;;  %v7347_v57 = vld [vmem:[%s9546_s1 + $0xa0] sm:$0xff] }
 0x145   :  { %v772_v5 = vrot.slane %v744_v53, %v6925_v10  ;;  %9696 = vst [vmem:[#allocation16_spill] sm:$0xff] %v7323_v48  ;;  %9697 = vst [vmem:[#allocation17_spill] sm:$0xff] %v7328_v51  ;;  %v7352_v58 = vld [vmem:[%s9546_s1 + $0xb0] sm:$0xff]  ;;  %v7359_v61 = vld [vmem:[%s9546_s1 + $0x88] sm:$0xff] }
 0x146   :  { %9698 = vst [vmem:[#allocation18_spill] sm:$0xff] %v7335_v52  ;;  %9699 = vst [vmem:[#allocation19_spill] sm:$0xff] %v7340_v55  ;;  %v7364_v50 = vld [vmem:[%s9546_s1 + $0x98] sm:$0xff]  ;;  %v7371_v53 = vld [vmem:[%s9546_s1 + $0x80] sm:$0xff] }
 0x147   :  { %v774_v6 = vcombine.low %v765_v2, %v772_v5  ;;  %9700 = vst [vmem:[#allocation20_spill] sm:$0xff] %v7347_v57  ;;  %9701 = vst [vmem:[#allocation21_spill] sm:$0xff] %v7352_v58  ;;  %v7376_v0 = vld [vmem:[%s9546_s1 + $0x90] sm:$0xff]  ;;  %v7383_v2 = vld [vmem:[%s9546_s1 + $0x68] sm:$0xff] }
 0x148   :  { %9702 = vst [vmem:[#allocation22_spill] sm:$0xff] %v7359_v61  ;;  %9703 = vst [vmem:[#allocation23_spill] sm:$0xff] %v7364_v50  ;;  %v7388_v5 = vld [vmem:[%s9546_s1 + $0x78] sm:$0xff] }
 0x149   :  { %v788_v40 = vrot.slane %v774_v6, %v6925_v10  ;;  %9704 = vst [vmem:[#allocation24_spill] sm:$0xff] %v7371_v53  ;;  %9705 = vst [vmem:[#allocation25_spill] sm:$0xff] %v7376_v0  ;;  %v7395_v6 = vld [vmem:[%s9546_s1 + $0x60] sm:$0xff] }
 0x14a   :  { %9706 = vst [vmem:[#allocation26_spill] sm:$0xff] %v7383_v2  ;;  %9707 = vst [vmem:[#allocation27_spill] sm:$0xff] %v7388_v5 }
 0x14b   :  { %v789_v9 = vcombine.low %v781_v8, %v788_v40  ;;  %9708 = vst [vmem:[#allocation28_spill] sm:$0xff] %v7395_v6  ;;  %v7400_v8 = vld [vmem:[%s9546_s1 + $0x70] sm:$0xff]  ;;  %v7407_v40 = vld [vmem:[%s9546_s1 + $0x48] sm:$0xff] }
 0x14c   :  { %9709 = vst [vmem:[#allocation29_spill] sm:$0xff] %v7400_v8  ;;  %9710 = vst [vmem:[#allocation30_spill] sm:$0xff] %v7407_v40 }
 0x14d   :  { %856 = vmatmul.mubr.f32.vlgmr.msra.gmra.mxu0 %v789_v9  ;;  %927 = vmatmul.mubr.f32.vlgmr.msra.gmra.mxu1 %v789_v9  ;;  %v7412_v9 = vld [vmem:[%s9546_s1 + $0x58] sm:$0xff] }
 0x14e   :  { %1479 = vmatprep.mubr.f32.mxu0 %v9681_v1  ;;  %1550 = vmatprep.mubr.f32.mxu1 %v9681_v1  ;;  %9711 = vst [vmem:[#allocation31_spill] sm:$0xff] %v7412_v9  ;;  %v7419_v1 = vld [vmem:[%s9546_s1 + $0x40] sm:$0xff] }
 0x14f   :  { %1416 = vmatpush1.msra.mxu0 %v7109_v12  ;;  %1487 = vmatpush1.msra.mxu1 %v7116_v13  ;;  %9712 = vst [vmem:[#allocation32_spill] sm:$0xff] %v7419_v1 }
 0x150   :  { %1417 = vmatprep.subr.mxu0 %v7121_v14  ;;  %1488 = vmatprep.subr.mxu1 %v7126_v15 }
 0x151   :  { %1418 = vmatpush1.msra.mxu0 %v7133_v43  ;;  %1489 = vmatpush1.msra.mxu1 %v7138_v16 }
 0x152   :  { %1419 = vmatprep.subr.mxu0 %v7143_v17  ;;  %1490 = vmatprep.subr.mxu1 %v7150_v3 }
 0x153   :  { %1420 = vmatpush1.msra.mxu0 %v7155_v44  ;;  %1491 = vmatpush1.msra.mxu1 %v7160_v18 }
 0x154   :  { %1421 = vmatprep.subr.mxu0 %v7167_v19  ;;  %1492 = vmatprep.subr.mxu1 %v7172_v42 }
 0x155   :  { %1422 = vmatpush1.msra.mxu0 %v7179_v20  ;;  %1493 = vmatpush1.msra.mxu1 %v7184_v21 }
 0x156   :  { %1423 = vmatprep.subr.mxu0 %v7191_v22  ;;  %1494 = vmatprep.subr.mxu1 %v7196_v24 }
 0x157   :  { %1424 = vmatpush1.msra.mxu0 %v7203_v25  ;;  %1495 = vmatpush1.msra.mxu1 %v7208_v7 }
 0x158   :  { %1425 = vmatprep.subr.mxu0 %v7215_v46  ;;  %1496 = vmatprep.subr.mxu1 %v7220_v11 }
 0x159   :  { %1426 = vmatpush1.msra.mxu0 %v7227_v26  ;;  %1497 = vmatpush1.msra.mxu1 %v7232_v27 }
 0x15a   :  { %1427 = vmatprep.subr.mxu0 %v7239_v28  ;;  %1498 = vmatprep.subr.mxu1 %v7244_v29 }
 0x15b   :  { %1428 = vmatpush1.msra.mxu0 %v7251_v30  ;;  %1499 = vmatpush1.msra.mxu1 %v7256_v49 }
 0x15c   :  { %1429 = vmatprep.subr.mxu0 %v7263_v31  ;;  %1500 = vmatprep.subr.mxu1 %v7268_v32 }
 0x15d   :  { %1430 = vmatpush1.msra.mxu0 %v7275_v33  ;;  %1501 = vmatpush1.msra.mxu1 %v7280_v34 }
 0x15e   :  { %1431 = vmatprep.subr.mxu0 %v7287_v35  ;;  %1502 = vmatprep.subr.mxu1 %v7292_v36 }
 0x15f   :  { %1432 = vmatpush1.msra.mxu0 %v7299_v37  ;;  %1503 = vmatpush1.msra.mxu1 %v7304_v38 }
 0x160   :  { %1433 = vmatprep.subr.mxu0 %v7311_v39  ;;  %1504 = vmatprep.subr.mxu1 %v7316_v47 }
 0x161   :  { %1434 = vmatpush1.msra.mxu0 %v7323_v48  ;;  %1505 = vmatpush1.msra.mxu1 %v7328_v51 }
 0x162   :  { %1435 = vmatprep.subr.mxu0 %v7335_v52  ;;  %1506 = vmatprep.subr.mxu1 %v7340_v55  ;;  %v5182_v52 = vld [vmem:[%s9548_s0 + $0x1] ss:$8 sm:$0xf] }
 0x163   :  { %1436 = vmatpush1.msra.mxu0 %v7347_v57  ;;  %1507 = vmatpush1.msra.mxu1 %v7352_v58 }
 0x164   :  { %1437 = vmatprep.subr.mxu0 %v7359_v61  ;;  %1508 = vmatprep.subr.mxu1 %v7364_v50 }
 0x165   :  { %1438 = vmatpush1.msra.mxu0 %v7371_v53  ;;  %1509 = vmatpush1.msra.mxu1 %v7376_v0  ;;  %v7424_v0 = vld [vmem:[%s9546_s1 + $0x50] sm:$0xff] }
 0x166   :  { %1439 = vmatprep.subr.mxu0 %v7383_v2  ;;  %1510 = vmatprep.subr.mxu1 %v7388_v5  ;;  %9713 = vst [vmem:[#allocation33_spill] sm:$0xff] %v7424_v0  ;;  %v7431_v2 = vld [vmem:[%s9546_s1 + $0x28] sm:$0xff]  ;;  %v7436_v5 = vld [vmem:[%s9546_s1 + $0x38] sm:$0xff] }
 0x167   :  { %1440 = vmatpush1.msra.mxu0 %v7395_v6  ;;  %1511 = vmatpush1.msra.mxu1 %v7400_v8  ;;  %9714 = vst [vmem:[#allocation34_spill] sm:$0xff] %v7431_v2  ;;  %9715 = vst [vmem:[#allocation35_spill] sm:$0xff] %v7436_v5  ;;  %v7443_v6 = vld [vmem:[%s9546_s1 + $0x20] sm:$0xff]  ;;  %v7448_v8 = vld [vmem:[%s9546_s1 + $0x30] sm:$0xff] }
 0x168   :  { %1441 = vmatprep.subr.mxu0 %v7407_v40  ;;  %1512 = vmatprep.subr.mxu1 %v7412_v9  ;;  %9716 = vst [vmem:[#allocation36_spill] sm:$0xff] %v7443_v6  ;;  %9717 = vst [vmem:[#allocation37_spill] sm:$0xff] %v7448_v8  ;;  %v7455_v40 = vld [vmem:[%s9546_s1 + $0x8] sm:$0xff]  ;;  %v7460_v9 = vld [vmem:[%s9546_s1 + $0x18] sm:$0xff] }
 0x169   :  { %1442 = vmatpush1.msra.mxu0 %v7419_v1  ;;  %1513 = vmatpush1.msra.mxu1 %v7424_v0  ;;  %9718 = vst [vmem:[#allocation38_spill] sm:$0xff] %v7455_v40  ;;  %9719 = vst [vmem:[#allocation39_spill] sm:$0xff] %v7460_v9  ;;  %v7467_v1 = vld [vmem:[%s9546_s1] sm:$0xff]  ;;  %v7472_v0 = vld [vmem:[%s9546_s1 + $0x10] sm:$0xff] }
 0x16a   :  { %1443 = vmatprep.subr.mxu0 %v7431_v2  ;;  %1514 = vmatprep.subr.mxu1 %v7436_v5  ;;  %9720 = vst [vmem:[#allocation40_spill] sm:$0xff] %v7467_v1  ;;  %9721 = vst [vmem:[#allocation41_spill] sm:$0xff] %v7472_v0 }
 0x16b   :  { %1444 = vmatpush1.msra.mxu0 %v7443_v6  ;;  %1515 = vmatpush1.msra.mxu1 %v7448_v8 }
 0x16c   :  { %1445 = vmatprep.subr.mxu0 %v7455_v40  ;;  %1516 = vmatprep.subr.mxu1 %v7460_v9 }
 0x16d   :  { %1446 = vmatpush1.msra.mxu0 %v7467_v1  ;;  %1517 = vmatpush1.msra.mxu1 %v7472_v0 }
 0x16e   :  { %2039 = vmatprep.subr.mxu0 %v7099_v4  ;;  %2110 = vmatprep.subr.mxu1 %v7104_v41 }
 0x20d   :  { %v857_v5 = vpop.f32.mrf.mxu0  ;;  %v928_v2 = vpop.f32.mrf.mxu1 }
 0x20f   :  { %v859_v53 = vpop.f32.mrf.mxu0  ;;  %v930_v50 = vpop.f32.mrf.mxu1 }
 0x210   :  { %v937_v61 = vcombine.low %v857_v5, %v859_v53  ;;  %v938_v6 = vcombine.high %v857_v5, %v859_v53  ;;  %v939_v58 = vcombine.low %v928_v2, %v930_v50  ;;  %v940_v8 = vcombine.high %v928_v2, %v930_v50  ;;  %v5183_v50 = vld [vmem:[%s9548_s0 + $0x21] ss:$8 sm:$0xf] }
 0x211   :  { %v5185_v5 = vld [vmem:[%s9548_s0 + $0x61] ss:$8 sm:$0xf] }
 0x212   :  { %v947_v40 = vrot.slane %v937_v61, %v6925_v10  ;;  %v954_v9 = vrot.slane %v938_v6, %v6925_v10  ;;  %v961_v1 = vrot.slane %v939_v58, %v6925_v10  ;;  %v968_v0 = vrot.slane %v940_v8, %v6925_v10  ;;  %v5184_v61 = vld [vmem:[%s9548_s0 + $0x41] ss:$8 sm:$0xf] }
 0x213   :  { %v5186_v58 = vld [vmem:[%s9548_s0 + $0x81] ss:$8 sm:$0xf] }
 0x214   :  { %v969_v57 = vcombine.low %v947_v40, %v961_v1  ;;  %v970_v4 = vcombine.high %v947_v40, %v961_v1  ;;  %v971_v55 = vcombine.low %v954_v9, %v968_v0  ;;  %v972_v41 = vcombine.high %v954_v9, %v968_v0  ;;  %v5187_v6 = vld [vmem:[%s9548_s0 + $0xa1] ss:$8 sm:$0xf] }
 0x215   :  { %v5188_v8 = vld [vmem:[%s9548_s0 + $0xc1] ss:$8 sm:$0xf] }
 0x216   :  { %v979_v1 = vrot.slane %v969_v57, %v6925_v10  ;;  %v986_v53 = vrot.slane %v971_v55, %v6925_v10  ;;  %v993_v0 = vrot.slane %v970_v4, %v6925_v10  ;;  %v1000_v2 = vrot.slane %v972_v41, %v6925_v10  ;;  %v5189_v4 = vld [vmem:[%s9548_s0 + $0xe1] ss:$8 sm:$0xf] }
 0x218   :  { %v1001_v40 = vcombine.high %v979_v1, %v979_v1  ;;  %v1002_v57 = vcombine.high %v986_v53, %v986_v53  ;;  %v1003_v9 = vcombine.high %v993_v0, %v993_v0  ;;  %v1004_v55 = vcombine.high %v1000_v2, %v1000_v2 }
 0x219   :  { %v7514_v41 = vadd.f32 %v5182_v52, %v979_v1  ;;  %v7516_v51 = vadd.f32 %v5183_v50, %v993_v0  ;;  %v7518_v48 = vadd.f32 %v5186_v58, %v986_v53  ;;  %v7524_v38 = vadd.f32 %v5187_v6, %v1000_v2 }
 0x21a   :  { %v7520_v47 = vadd.f32 %v5184_v61, %v1001_v40  ;;  %v7522_v39 = vadd.f32 %v5185_v5, %v1003_v9  ;;  %v7526_v37 = vadd.f32 %v5188_v8, %v1002_v57  ;;  %v7530_v34 = vadd.f32 %v5189_v4, %v1004_v55 }
 0x21b   :  { %v5190_v36 = vmul.f32 -1.442695, %v7514_v41  ;;  %v5191_v35 = vmul.f32 -1.442695, %v7516_v51  ;;  %v5194_v61 = vmul.f32 -1.442695, %v7518_v48 }
 0x21c   :  { %v5192_v52 = vmul.f32 -1.442695, %v7520_v47  ;;  %v5193_v50 = vmul.f32 -1.442695, %v7522_v39  ;;  %v1077_v58 = vrot.slane %v7514_v41, 1  ;;  %v1078_v53 = vrot.slane %v7516_v51, 1 }
 0x21d   :  { %5537 = vpow2.f32 %v5190_v36  ;;  %v5195_v1 = vmul.f32 -1.442695, %v7524_v38  ;;  %v5196_v0 = vmul.f32 -1.442695, %v7526_v37  ;;  %v1079_v2 = vrot.slane %v7520_v47, 1 }
 0x21e   :  { %5539 = vpow2.f32 %v5191_v35  ;;  %v5197_v5 = vmul.f32 -1.442695, %v7530_v34  ;;  %v1080_v6 = vrot.slane %v7522_v39, 1  ;;  %v1081_v36 = vrot.slane %v7518_v48, 1 }
 0x21f   :  { %5541 = vpow2.f32 %v5192_v52  ;;  %v5198_v8 = vmul.f32 -1.442695, %v1077_v58  ;;  %v1082_v35 = vrot.slane %v7524_v38, 1  ;;  %v5199_v40 = vmul.f32 -1.442695, %v1078_v53 }
 0x220   :  { %5543 = vpow2.f32 %v5193_v50  ;;  %v1083_v57 = vrot.slane %v7526_v37, 1  ;;  %v5200_v9 = vmul.f32 -1.442695, %v1079_v2  ;;  %v1084_v55 = vrot.slane %v7530_v34, 1 }
 0x221   :  { %5545 = vpow2.f32 %v5194_v61  ;;  %v5201_v4 = vmul.f32 -1.442695, %v1080_v6  ;;  %v5202_v52 = vmul.f32 -1.442695, %v1081_v36  ;;  %v5203_v50 = vmul.f32 -1.442695, %v1082_v35 }
 0x222   :  { %5547 = vpow2.f32 %v5195_v1  ;;  %v5204_v61 = vmul.f32 -1.442695, %v1083_v57  ;;  %v5205_v58 = vmul.f32 -1.442695, %v1084_v55 }
 0x223   :  { %5549 = vpow2.f32 %v5196_v0 }
 0x224   :  { %5551 = vpow2.f32 %v5197_v5 }
 0x225   :  { %5553 = vpow2.f32 %v5198_v8 }
 0x226   :  { %5555 = vpow2.f32 %v5199_v40 }
 0x227   :  { %5557 = vpow2.f32 %v5200_v9 }
 0x228   :  { %5559 = vpow2.f32 %v5201_v4 }
 0x229   :  { %5561 = vpow2.f32 %v5202_v52 }
 0x22a   :  { %v5538_v1 = vpop.eup %5537  ;;  %5563 = vpow2.f32 %v5203_v50 }
 0x22b   :  { %v5540_v53 = vpop.eup %5539  ;;  %v1045_v0 = vadd.f32 1.0, %v5538_v1  ;;  %5565 = vpow2.f32 %v5204_v61 }
 0x22c   :  { %v5542_v33 = vpop.eup %5541  ;;  %v1046_v2 = vadd.f32 1.0, %v5540_v53  ;;  %5567 = vpow2.f32 %v5205_v58 }
 0x22d   :  { %v5544_v5 = vpop.eup %5543  ;;  %v1047_v32 = vadd.f32 1.0, %v5542_v33  ;;  %5569 = vrcp.f32 %v1045_v0 }
 0x22e   :  { %v5546_v6 = vpop.eup %5545  ;;  %v1048_v36 = vadd.f32 1.0, %v5544_v5  ;;  %5571 = vrcp.f32 %v1046_v2 }
 0x22f   :  { %v5548_v8 = vpop.eup %5547  ;;  %v1049_v35 = vadd.f32 1.0, %v5546_v6  ;;  %5573 = vrcp.f32 %v1047_v32 }
 0x230   :  { %v5550_v40 = vpop.eup %5549  ;;  %v1050_v57 = vadd.f32 1.0, %v5548_v8  ;;  %5575 = vrcp.f32 %v1048_v36 }
 0x231   :  { %v5552_v9 = vpop.eup %5551  ;;  %v1051_v55 = vadd.f32 1.0, %v5550_v40  ;;  %5577 = vrcp.f32 %v1049_v35  ;;  %v1141_v40 = vrot.slane %v7514_v41, 2 }
 0x232   :  { %v5554_v4 = vpop.eup %5553  ;;  %v1052_v52 = vadd.f32 1.0, %v5552_v9  ;;  %5579 = vrcp.f32 %v1050_v57 }
 0x233   :  { %v5556_v50 = vpop.eup %5555  ;;  %5581 = vrcp.f32 %v1051_v55  ;;  %v1117_v61 = vadd.f32 1.0, %v5554_v4  ;;  %v1142_v55 = vrot.slane %v7516_v51, 2 }
 0x234   :  { %v5558_v33 = vpop.eup %5557  ;;  %5583 = vrcp.f32 %v1052_v52  ;;  %v1118_v58 = vadd.f32 1.0, %v5556_v50  ;;  %v1143_v52 = vrot.slane %v7520_v47, 2 }
 0x235   :  { %v5560_v1 = vpop.eup %5559  ;;  %v1119_v53 = vadd.f32 1.0, %v5558_v33  ;;  %5585 = vrcp.f32 %v1117_v61  ;;  %v1144_v61 = vrot.slane %v7522_v39, 2 }
 0x236   :  { %v5562_v0 = vpop.eup %5561  ;;  %v1120_v32 = vadd.f32 1.0, %v5560_v1  ;;  %5587 = vrcp.f32 %v1118_v58  ;;  %v1145_v58 = vrot.slane %v7518_v48, 2  ;;  %v1165_v1 = vrot.slane %v7514_v41, 3 }
 0x237   :  { %v5564_v2 = vpop.eup %5563  ;;  %v1121_v5 = vadd.f32 1.0, %v5562_v0  ;;  %5589 = vrcp.f32 %v1119_v53  ;;  %v1146_v0 = vrot.slane %v7524_v38, 2  ;;  %v1168_v41 = vrot.slane %v7522_v39, 3 }
 0x238   :  { %v5566_v6 = vpop.eup %5565  ;;  %v1122_v36 = vadd.f32 1.0, %v5564_v2  ;;  %5591 = vrcp.f32 %v1120_v32  ;;  %v1166_v32 = vrot.slane %v7516_v51, 3  ;;  %v5206_v51 = vmul.f32 -1.442695, %v1165_v1 }
 0x239   :  { %v5568_v8 = vpop.eup %5567  ;;  %v1123_v35 = vadd.f32 1.0, %v5566_v6  ;;  %5593 = vrcp.f32 %v1121_v5  ;;  %v1147_v5 = vrot.slane %v7526_v37, 2  ;;  %v1167_v6 = vrot.slane %v7520_v47, 3 }
 0x23a   :  { %v5570_v57 = vpop.eup %5569  ;;  %v1124_v9 = vadd.f32 1.0, %v5568_v8  ;;  %5595 = vrcp.f32 %v1122_v36  ;;  %v1148_v8 = vrot.slane %v7530_v34, 2  ;;  %v1171_v47 = vrot.slane %v7526_v37, 3 }
 0x23b   :  { %v5572_v4 = vpop.eup %5571  ;;  %5597 = vrcp.f32 %v1123_v35  ;;  %v5208_v49 = vmul.f32 -1.442695, %v1167_v6  ;;  %v1172_v39 = vrot.slane %v7530_v34, 3 }
 0x23c   :  { %v5574_v50 = vpop.eup %5573  ;;  %5599 = vrcp.f32 %v1124_v9 }
 0x23d   :  { %v7550_v33 = vpop.eup %5575  ;;  %5601 = vtanh.f32 %v1141_v40  ;;  %v1169_v40 = vrot.slane %v7518_v48, 3 }
 0x23e   :  { %v7554_v53 = vpop.eup %5577  ;;  %5603 = vtanh.f32 %v1142_v55  ;;  %v1170_v55 = vrot.slane %v7524_v38, 3  ;;  %v5212_v38 = vmul.f32 -1.442695, %v1171_v47 }
 0x23f   :  { %v7558_v2 = vpop.eup %5579  ;;  %5605 = vtanh.f32 %v1143_v52  ;;  %v5207_v52 = vmul.f32 -1.442695, %v1166_v32 }
 0x240   :  { %v7562_v36 = vpop.eup %5581  ;;  %5607 = vtanh.f32 %v1144_v61  ;;  %v5209_v61 = vmul.f32 -1.442695, %v1168_v41  ;;  %v5211_v1 = vmul.f32 -1.442695, %v1170_v55 }
 0x241   :  { %v7566_v35 = vpop.eup %5583  ;;  %5609 = vtanh.f32 %v1145_v58  ;;  %v5210_v58 = vmul.f32 -1.442695, %v1169_v40 }
 0x242   :  { %v5586_v9 = vpop.eup %5585  ;;  %5611 = vtanh.f32 %v1146_v0 }
 0x243   :  { %v5588_v31 = vpop.eup %5587  ;;  %5613 = vtanh.f32 %v1147_v5  ;;  %v5213_v5 = vmul.f32 -1.442695, %v1172_v39  ;;  %v1229_v37 = vmul.f32 %v5586_v9, %v7035_v54 }
 0x244   :  { %v5590_v30 = vpop.eup %5589  ;;  %5615 = vtanh.f32 %v1148_v8  ;;  %v1230_v34 = vmul.f32 %v5588_v31, %v7038_v60 }
 0x245   :  { %v5592_v29 = vpop.eup %5591  ;;  %5617 = vpow2.f32 %v5206_v51  ;;  %v1231_v40 = vmul.f32 %v5590_v30, %v7041_v63 }
 0x246   :  { %v5594_v48 = vpop.eup %5593  ;;  %5619 = vpow2.f32 %v5207_v52  ;;  %v1232_v55 = vmul.f32 %v5592_v29, %v7045_v56 }
 0x247   :  { %v5596_v0 = vpop.eup %5595  ;;  %5621 = vpow2.f32 %v5208_v49  ;;  %v1233_v39 = vmul.f32 %v5594_v48, %v7048_v59 }
 0x248   :  { %v5598_v32 = vpop.eup %5597  ;;  %5623 = vpow2.f32 %v5209_v61  ;;  %v1234_v60 = vmul.f32 %v5596_v0, %v7051_v62 }
 0x249   :  { %v5600_v28 = vpop.eup %5599  ;;  %5625 = vpow2.f32 %v5210_v58 }
 0x24a   :  { %v5602_v6 = vpop.eup %5601  ;;  %5627 = vpow2.f32 %v5211_v1 }
 0x24b   :  { %v5604_v8 = vpop.eup %5603  ;;  %5629 = vpow2.f32 %v5212_v38  ;;  %v1237_v41 = vmul.f32 %v5602_v6, %v5570_v57  ;;  %v1235_v38 = vmul.f32 %v5598_v32, %v7058_v45  ;;  %v1236_v6 = vmul.f32 %v5600_v28, %v7060_v23 }
 0x24c   :  { %v5606_v51 = vpop.eup %5605  ;;  %5631 = vpow2.f32 %v5213_v5  ;;  %v1238_v49 = vmul.f32 %v5604_v8, %v5572_v4 }
 0x24d   :  { %v5608_v52 = vpop.eup %5607  ;;  %v1239_v47 = vmul.f32 %v5606_v51, %v5574_v50  ;;  %v7577_v61 = vadd.f32 %v1237_v41, %v1229_v37 }
 0x24e   :  { %v5610_v54 = vpop.eup %5609  ;;  %v1240_v9 = vmul.f32 %v5608_v52, %v7550_v33  ;;  %v7581_v31 = vadd.f32 %v1238_v49, %v1230_v34 }
 0x24f   :  { %v5612_v57 = vpop.eup %5611  ;;  %v1241_v63 = vmul.f32 %v5610_v54, %v7554_v53  ;;  %v7584_v30 = vadd.f32 %v1239_v47, %v1231_v40  ;;  %5633 = vtanh.f32 %v7577_v61 }
 0x250   :  { %v5614_v56 = vpop.eup %5613  ;;  %v1242_v29 = vmul.f32 %v5612_v57, %v7558_v2  ;;  %v7588_v59 = vadd.f32 %v1240_v9, %v1232_v55  ;;  %5635 = vtanh.f32 %v7581_v31 }
 0x251   :  { %v5616_v4 = vpop.eup %5615  ;;  %v7591_v50 = vadd.f32 %v1241_v63, %v1233_v39  ;;  %5637 = vtanh.f32 %v7584_v30  ;;  %v1243_v41 = vmul.f32 %v5614_v56, %v7562_v36 }
 0x252   :  { %v5618_v62 = vpop.eup %5617  ;;  %v7594_v33 = vadd.f32 %v1242_v29, %v1234_v60  ;;  %5639 = vtanh.f32 %v7588_v59  ;;  %v1244_v49 = vmul.f32 %v5616_v4, %v7566_v35 }
 0x253   :  { %v5620_v53 = vpop.eup %5619  ;;  %v1205_v58 = vadd.f32 1.0, %v5618_v62  ;;  %5641 = vtanh.f32 %v7591_v50  ;;  %v7603_v47 = vadd.f32 %v1243_v41, %v1235_v38 }
 0x254   :  { %v5622_v48 = vpop.eup %5621  ;;  %v1206_v2 = vadd.f32 1.0, %v5620_v53  ;;  %5643 = vtanh.f32 %v7594_v33  ;;  %v7605_v32 = vadd.f32 %v1244_v49, %v1236_v6 }
 0x255   :  { %v5624_v1 = vpop.eup %5623  ;;  %v1207_v0 = vadd.f32 1.0, %v5622_v48  ;;  %5645 = vrcp.f32 %v1205_v58 }
 0x256   :  { %v5626_v5 = vpop.eup %5625  ;;  %v1208_v37 = vadd.f32 1.0, %v5624_v1  ;;  %5647 = vrcp.f32 %v1206_v2 }
 0x257   :  { %v5628_v34 = vpop.eup %5627  ;;  %v1209_v8 = vadd.f32 1.0, %v5626_v5  ;;  %5649 = vrcp.f32 %v1207_v0 }
 0x258   :  { %v5630_v40 = vpop.eup %5629  ;;  %v1210_v51 = vadd.f32 1.0, %v5628_v34  ;;  %5651 = vrcp.f32 %v1208_v37 }
 0x259   :  { %v5632_v55 = vpop.eup %5631  ;;  %v1211_v52 = vadd.f32 1.0, %v5630_v40  ;;  %5653 = vrcp.f32 %v1209_v8 }
 0x25a   :  { %v1212_v45 = vadd.f32 1.0, %v5632_v55  ;;  %5655 = vrcp.f32 %v1210_v51 }
 0x25b   :  { %5657 = vrcp.f32 %v1211_v52 }
 0x25c   :  { %v5634_v23 = vpop.eup %5633  ;;  %5659 = vrcp.f32 %v1212_v45 }
 0x25d   :  { %v5636_v28 = vpop.eup %5635  ;;  %5661 = vtanh.f32 %v7603_v47 }
 0x25e   :  { %v5638_v36 = vpop.eup %5637  ;;  %5663 = vtanh.f32 %v7605_v32 }
 0x25f   :  { %v5640_v39 = vpop.eup %5639 }
 0x260   :  { %v5642_v35 = vpop.eup %5641 }
 0x261   :  { %v5644_v54 = vpop.eup %5643 }
 0x262   :  { %v5646_v9 = vpop.eup %5645 }
 0x263   :  { %v5648_v60 = vpop.eup %5647  ;;  %v1261_v57 = vmul.f32 %v5646_v9, %v5634_v23  ;;  %v9746_v9 = vld [vmem:[#allocation26_spill] sm:$0xff] }
 0x264   :  { %v5650_v63 = vpop.eup %5649  ;;  %v1262_v56 = vmul.f32 %v5648_v60, %v5636_v28  ;;  %v9747_v60 = vld [vmem:[#allocation27_spill] sm:$0xff] }
 0x265   :  { %v5652_v29 = vpop.eup %5651  ;;  %v1263_v4 = vmul.f32 %v5650_v63, %v5638_v36  ;;  %1269 = vst [vmem:[%s9550_s4 + $0x1] sm:$0x1] %v1261_v57  ;;  %v9749_v63 = vld [vmem:[#allocation29_spill] sm:$0xff] }
 0x266   :  { %v5654_v62 = vpop.eup %5653  ;;  %v1264_v53 = vmul.f32 %v5652_v29, %v5640_v39  ;;  %1270 = vst [vmem:[%s9550_s4 + $0x9] sm:$0x1] %v1262_v56  ;;  %v1365_v0 = vcombine.low %v1261_v57, %v1262_v56  ;;  %v9748_v57 = vld [vmem:[#allocation28_spill] sm:$0xff]  ;;  %v9750_v56 = vld [vmem:[#allocation30_spill] sm:$0xff]  ;;  %v9751_v29 = vld [vmem:[#allocation31_spill] sm:$0xff] }
 0x267   :  { %v5656_v58 = vpop.eup %5655  ;;  %v1265_v48 = vmul.f32 %v5654_v62, %v5642_v35  ;;  %1271 = vst [vmem:[%s9550_s4 + $0x11] sm:$0x1] %v1263_v4  ;;  %v9744_v35 = vld [vmem:[#allocation24_spill] sm:$0xff]  ;;  %v9753_v62 = vld [vmem:[#allocation33_spill] sm:$0xff] }
 0x268   :  { %v5658_v2 = vpop.eup %5657  ;;  %v1266_v1 = vmul.f32 %v5656_v58, %v5644_v54  ;;  %1272 = vst [vmem:[%s9550_s4 + $0x19] sm:$0x1] %v1264_v53  ;;  %v1366_v38 = vcombine.low %v1263_v4, %v1264_v53  ;;  %v1375_v51 = vrot.slane %v1365_v0, %v6925_v10  ;;  %v9745_v54 = vld [vmem:[#allocation25_spill] sm:$0xff]  ;;  %v9752_v4 = vld [vmem:[#allocation32_spill] sm:$0xff]  ;;  %v9754_v53 = vld [vmem:[#allocation34_spill] sm:$0xff] }
 0x269   :  { %v5660_v5 = vpop.eup %5659  ;;  %1273 = vst [vmem:[%s9550_s4 + $0x21] sm:$0x1] %v1265_v48  ;;  %v9755_v58 = vld [vmem:[#allocation35_spill] sm:$0xff] }
 0x26a   :  { %v5662_v37 = vpop.eup %5661  ;;  %1274 = vst [vmem:[%s9550_s4 + $0x29] sm:$0x1] %v1266_v1  ;;  %v1382_v6 = vrot.slane %v1366_v38, %v6925_v10  ;;  %v1367_v40 = vcombine.low %v1265_v48, %v1266_v1  ;;  %v9756_v48 = vld [vmem:[#allocation36_spill] sm:$0xff]  ;;  %v9758_v1 = vld [vmem:[#allocation38_spill] sm:$0xff]  ;;  %v9759_v0 = vld [vmem:[#allocation39_spill] sm:$0xff] }
 0x26b   :  { %v5664_v34 = vpop.eup %5663  ;;  %v1267_v8 = vmul.f32 %v5662_v37, %v5658_v2  ;;  %v9757_v2 = vld [vmem:[#allocation37_spill] sm:$0xff]  ;;  %v9760_v38 = vld [vmem:[#allocation40_spill] sm:$0xff] }
 0x26c   :  { %v1268_v41 = vmul.f32 %v5664_v34, %v5660_v5  ;;  %v1397_v55 = vcombine.low %v1375_v51, %v1382_v6  ;;  %v1389_v52 = vrot.slane %v1367_v40, %v6925_v10  ;;  %v9761_v5 = vmov 0.0   ;;  %v9762_v37 = vld [vmem:[#allocation41_spill] sm:$0xff] }
 0x26d   :  { %1275 = vst [vmem:[%s9550_s4 + $0x31] sm:$0x1] %v1267_v8 }
 0x26e   :  { %1276 = vst [vmem:[%s9550_s4 + $0x39] sm:$0x1] %v1268_v41  ;;  %v1368_v49 = vcombine.low %v1267_v8, %v1268_v41  ;;  %v1405_v28 = vrot.slane %v1397_v55, %v6925_v10 }
 0x270   :  { %v1396_v45 = vrot.slane %v1368_v49, %v6925_v10 }
 0x272   :  { %v1398_v23 = vcombine.low %v1389_v52, %v1396_v45 }
 0x274   :  { %v1412_v36 = vrot.slane %v1398_v23, %v6925_v10 }
 0x276   :  { %v1413_v39 = vcombine.low %v1405_v28, %v1412_v36 }
 0x278   :  { %1480 = vmatmul.mubr.f32.vlgmr.msra.gmra.mxu0 %v1413_v39  ;;  %1551 = vmatmul.mubr.f32.vlgmr.msra.gmra.mxu1 %v1413_v39 }
 0x279   :  { %2040 = vmatpush1.msra.mxu0 %v7109_v12  ;;  %2111 = vmatpush1.msra.mxu1 %v7116_v13  ;;  %v9722_v12 = vld [vmem:[#allocation2_spill] sm:$0xff]  ;;  %v9723_v13 = vld [vmem:[#allocation3_spill] sm:$0xff] }
 0x27a   :  { %2041 = vmatprep.subr.mxu0 %v7121_v14  ;;  %2112 = vmatprep.subr.mxu1 %v7126_v15  ;;  %v9724_v14 = vld [vmem:[#allocation4_spill] sm:$0xff]  ;;  %v9725_v15 = vld [vmem:[#allocation5_spill] sm:$0xff] }
 0x27b   :  { %2042 = vmatpush1.msra.mxu0 %v7133_v43  ;;  %2113 = vmatpush1.msra.mxu1 %v7138_v16  ;;  %v9726_v43 = vld [vmem:[#allocation6_spill] sm:$0xff]  ;;  %v9727_v16 = vld [vmem:[#allocation7_spill] sm:$0xff] }
 0x27c   :  { %2043 = vmatprep.subr.mxu0 %v7143_v17  ;;  %2114 = vmatprep.subr.mxu1 %v7150_v3  ;;  %v9728_v17 = vld [vmem:[#allocation8_spill] sm:$0xff]  ;;  %v9729_v3 = vld [vmem:[#allocation9_spill] sm:$0xff] }
 0x27d   :  { %2044 = vmatpush1.msra.mxu0 %v7155_v44  ;;  %2115 = vmatpush1.msra.mxu1 %v7160_v18  ;;  %v9730_v44 = vld [vmem:[#allocation10_spill] sm:$0xff]  ;;  %v9731_v18 = vld [vmem:[#allocation11_spill] sm:$0xff] }
 0x27e   :  { %2045 = vmatprep.subr.mxu0 %v7167_v19  ;;  %2116 = vmatprep.subr.mxu1 %v7172_v42  ;;  %v9732_v19 = vld [vmem:[#allocation12_spill] sm:$0xff]  ;;  %v9733_v42 = vld [vmem:[#allocation13_spill] sm:$0xff] }
 0x27f   :  { %2046 = vmatpush1.msra.mxu0 %v7179_v20  ;;  %2117 = vmatpush1.msra.mxu1 %v7184_v21  ;;  %v9734_v20 = vld [vmem:[#allocation14_spill] sm:$0xff]  ;;  %v9735_v21 = vld [vmem:[#allocation15_spill] sm:$0xff] }
 0x280   :  { %2047 = vmatprep.subr.mxu0 %v7191_v22  ;;  %2118 = vmatprep.subr.mxu1 %v7196_v24  ;;  %v9736_v22 = vld [vmem:[#allocation16_spill] sm:$0xff]  ;;  %v9737_v24 = vld [vmem:[#allocation17_spill] sm:$0xff] }
 0x281   :  { %2048 = vmatpush1.msra.mxu0 %v7203_v25  ;;  %2119 = vmatpush1.msra.mxu1 %v7208_v7  ;;  %v9738_v25 = vld [vmem:[#allocation18_spill] sm:$0xff]  ;;  %v9739_v7 = vld [vmem:[#allocation19_spill] sm:$0xff] }
 0x282   :  { %2049 = vmatprep.subr.mxu0 %v7215_v46  ;;  %2120 = vmatprep.subr.mxu1 %v7220_v11  ;;  %v9740_v46 = vld [vmem:[#allocation20_spill] sm:$0xff]  ;;  %v9741_v11 = vld [vmem:[#allocation21_spill] sm:$0xff] }
 0x283   :  { %2050 = vmatpush1.msra.mxu0 %v7227_v26  ;;  %2121 = vmatpush1.msra.mxu1 %v7232_v27  ;;  %v9742_v26 = vld [vmem:[#allocation22_spill] sm:$0xff]  ;;  %v9743_v27 = vld [vmem:[#allocation23_spill] sm:$0xff] }
 0x284   :  { %2051 = vmatprep.subr.mxu0 %v9722_v12  ;;  %2122 = vmatprep.subr.mxu1 %v9723_v13 }
 0x285   :  { %2052 = vmatpush1.msra.mxu0 %v9724_v14  ;;  %2123 = vmatpush1.msra.mxu1 %v9725_v15  ;;  %v5214_v14 = vld [vmem:[%s9548_s0 + $0x2] ss:$8 sm:$0xf] }
 0x286   :  { %2053 = vmatprep.subr.mxu0 %v9726_v43  ;;  %2124 = vmatprep.subr.mxu1 %v9727_v16  ;;  %v5215_v15 = vld [vmem:[%s9548_s0 + $0x22] ss:$8 sm:$0xf] }
 0x287   :  { %2054 = vmatpush1.msra.mxu0 %v9728_v17  ;;  %2125 = vmatpush1.msra.mxu1 %v9729_v3  ;;  %v5216_v43 = vld [vmem:[%s9548_s0 + $0x42] ss:$8 sm:$0xf] }
 0x288   :  { %2055 = vmatprep.subr.mxu0 %v9730_v44  ;;  %2126 = vmatprep.subr.mxu1 %v9731_v18  ;;  %v5218_v16 = vld [vmem:[%s9548_s0 + $0x82] ss:$8 sm:$0xf] }
 0x289   :  { %2056 = vmatpush1.msra.mxu0 %v9732_v19  ;;  %2127 = vmatpush1.msra.mxu1 %v9733_v42  ;;  %v5217_v19 = vld [vmem:[%s9548_s0 + $0x62] ss:$8 sm:$0xf] }
 0x28a   :  { %2057 = vmatprep.subr.mxu0 %v9734_v20  ;;  %2128 = vmatprep.subr.mxu1 %v9735_v21  ;;  %v5219_v42 = vld [vmem:[%s9548_s0 + $0xa2] ss:$8 sm:$0xf] }
 0x28b   :  { %2058 = vmatpush1.msra.mxu0 %v9736_v22  ;;  %2129 = vmatpush1.msra.mxu1 %v9737_v24  ;;  %v5220_v20 = vld [vmem:[%s9548_s0 + $0xc2] ss:$8 sm:$0xf] }
 0x28c   :  { %2059 = vmatprep.subr.mxu0 %v9738_v25  ;;  %2130 = vmatprep.subr.mxu1 %v9739_v7  ;;  %v5221_v7 = vld [vmem:[%s9548_s0 + $0xe2] ss:$8 sm:$0xf] }
 0x28d   :  { %2060 = vmatpush1.msra.mxu0 %v9740_v46  ;;  %2131 = vmatpush1.msra.mxu1 %v9741_v11 }
 0x28e   :  { %2061 = vmatprep.subr.mxu0 %v9742_v26  ;;  %2132 = vmatprep.subr.mxu1 %v9743_v27 }
 0x28f   :  { %2062 = vmatpush1.msra.mxu0 %v9744_v35  ;;  %2133 = vmatpush1.msra.mxu1 %v9745_v54 }
 0x290   :  { %2063 = vmatprep.subr.mxu0 %v9746_v9  ;;  %2134 = vmatprep.subr.mxu1 %v9747_v60 }
 0x291   :  { %2064 = vmatpush1.msra.mxu0 %v9748_v57  ;;  %2135 = vmatpush1.msra.mxu1 %v9749_v63 }
 0x292   :  { %2065 = vmatprep.subr.mxu0 %v9750_v56  ;;  %2136 = vmatprep.subr.mxu1 %v9751_v29 }
 0x293   :  { %2066 = vmatpush1.msra.mxu0 %v9752_v4  ;;  %2137 = vmatpush1.msra.mxu1 %v9753_v62 }
 0x294   :  { %2067 = vmatprep.subr.mxu0 %v9754_v53  ;;  %2138 = vmatprep.subr.mxu1 %v9755_v58 }
 0x295   :  { %2068 = vmatpush1.msra.mxu0 %v9756_v48  ;;  %2139 = vmatpush1.msra.mxu1 %v9757_v2 }
 0x296   :  { %2069 = vmatprep.subr.mxu0 %v9758_v1  ;;  %2140 = vmatprep.subr.mxu1 %v9759_v0 }
 0x297   :  { %2070 = vmatpush1.msra.mxu0 %v9760_v38  ;;  %2103 = vmatprep.mubr.f32.mxu0 %v9761_v5 }
 0x298   :  { %2141 = vmatpush1.msra.mxu1 %v9762_v37  ;;  %2174 = vmatprep.mubr.f32.mxu1 %v9761_v5 }
 0x338   :  { %v1481_v6 = vpop.f32.mrf.mxu0  ;;  %v1552_v34 = vpop.f32.mrf.mxu1 }
 0x33a   :  { %v1483_v8 = vpop.f32.mrf.mxu0  ;;  %v1554_v41 = vpop.f32.mrf.mxu1 }
 0x33b   :  { %v1561_v40 = vcombine.low %v1481_v6, %v1483_v8  ;;  %v1562_v51 = vcombine.high %v1481_v6, %v1483_v8  ;;  %v1563_v49 = vcombine.low %v1552_v34, %v1554_v41  ;;  %v1564_v55 = vcombine.high %v1552_v34, %v1554_v41 }
 0x33d   :  { %v1571_v52 = vrot.slane %v1561_v40, %v6925_v10  ;;  %v1578_v45 = vrot.slane %v1562_v51, %v6925_v10  ;;  %v1585_v23 = vrot.slane %v1563_v49, %v6925_v10  ;;  %v1592_v28 = vrot.slane %v1564_v55, %v6925_v10 }
 0x33f   :  { %v1593_v36 = vcombine.low %v1571_v52, %v1585_v23  ;;  %v1594_v39 = vcombine.high %v1571_v52, %v1585_v23  ;;  %v1595_v12 = vcombine.low %v1578_v45, %v1592_v28  ;;  %v1596_v13 = vcombine.high %v1578_v45, %v1592_v28 }
 0x341   :  { %v1603_v17 = vrot.slane %v1593_v36, %v6925_v10  ;;  %v1610_v3 = vrot.slane %v1595_v12, %v6925_v10  ;;  %v1617_v44 = vrot.slane %v1594_v39, %v6925_v10  ;;  %v1624_v18 = vrot.slane %v1596_v13, %v6925_v10 }
 0x343   :  { %v1625_v21 = vcombine.high %v1603_v17, %v1603_v17  ;;  %v1626_v22 = vcombine.high %v1610_v3, %v1610_v3  ;;  %v1627_v24 = vcombine.high %v1617_v44, %v1617_v44  ;;  %v1628_v25 = vcombine.high %v1624_v18, %v1624_v18 }
 0x344   :  { %v7735_v46 = vadd.f32 %v5214_v14, %v1603_v17  ;;  %v7737_v11 = vadd.f32 %v5215_v15, %v1617_v44  ;;  %v7739_v26 = vadd.f32 %v5218_v16, %v1610_v3  ;;  %v7745_v54 = vadd.f32 %v5219_v42, %v1624_v18 }
 0x345   :  { %v7741_v27 = vadd.f32 %v5216_v43, %v1625_v21  ;;  %v7743_v35 = vadd.f32 %v5217_v19, %v1627_v24  ;;  %v7747_v9 = vadd.f32 %v5220_v20, %v1626_v22  ;;  %v7751_v63 = vadd.f32 %v5221_v7, %v1628_v25 }
 0x346   :  { %v5222_v60 = vmul.f32 -1.442695, %v7735_v46  ;;  %v5223_v57 = vmul.f32 -1.442695, %v7737_v11  ;;  %v5226_v4 = vmul.f32 -1.442695, %v7739_v26 }
 0x347   :  { %v5224_v56 = vmul.f32 -1.442695, %v7741_v27  ;;  %v5225_v29 = vmul.f32 -1.442695, %v7743_v35  ;;  %v1701_v62 = vrot.slane %v7735_v46, 1  ;;  %v1702_v58 = vrot.slane %v7737_v11, 1 }
 0x348   :  { %5665 = vpow2.f32 %v5222_v60  ;;  %v5227_v53 = vmul.f32 -1.442695, %v7745_v54  ;;  %v5228_v48 = vmul.f32 -1.442695, %v7747_v9  ;;  %v1703_v2 = vrot.slane %v7741_v27, 1 }
 0x349   :  { %5667 = vpow2.f32 %v5223_v57  ;;  %v5229_v1 = vmul.f32 -1.442695, %v7751_v63  ;;  %v1704_v0 = vrot.slane %v7743_v35, 1  ;;  %v1705_v38 = vrot.slane %v7739_v26, 1 }
 0x34a   :  { %5669 = vpow2.f32 %v5224_v56  ;;  %v5230_v37 = vmul.f32 -1.442695, %v1701_v62  ;;  %v1706_v6 = vrot.slane %v7745_v54, 1  ;;  %v5231_v34 = vmul.f32 -1.442695, %v1702_v58 }
 0x34b   :  { %5671 = vpow2.f32 %v5225_v29  ;;  %v1707_v8 = vrot.slane %v7747_v9, 1  ;;  %v5232_v41 = vmul.f32 -1.442695, %v1703_v2  ;;  %v1708_v40 = vrot.slane %v7751_v63, 1 }
 0x34c   :  { %5673 = vpow2.f32 %v5226_v4  ;;  %v5233_v51 = vmul.f32 -1.442695, %v1704_v0  ;;  %v5234_v49 = vmul.f32 -1.442695, %v1705_v38  ;;  %v5235_v55 = vmul.f32 -1.442695, %v1706_v6 }
 0x34d   :  { %5675 = vpow2.f32 %v5227_v53  ;;  %v5236_v52 = vmul.f32 -1.442695, %v1707_v8  ;;  %v5237_v45 = vmul.f32 -1.442695, %v1708_v40  ;;  %v1765_v2 = vrot.slane %v7735_v46, 2 }
 0x34e   :  { %5677 = vpow2.f32 %v5228_v48  ;;  %v1766_v38 = vrot.slane %v7737_v11, 2  ;;  %v1767_v6 = vrot.slane %v7741_v27, 2  ;;  %v1768_v8 = vrot.slane %v7743_v35, 2 }
 0x34f   :  { %5679 = vpow2.f32 %v5229_v1  ;;  %v1769_v40 = vrot.slane %v7739_v26, 2 }
 0x350   :  { %5681 = vpow2.f32 %v5230_v37 }
 0x351   :  { %5683 = vpow2.f32 %v5231_v34 }
 0x352   :  { %5685 = vpow2.f32 %v5232_v41 }
 0x353   :  { %5687 = vpow2.f32 %v5233_v51  ;;  %v1789_v51 = vrot.slane %v7735_v46, 3  ;;  %v1792_v46 = vrot.slane %v7743_v35, 3  ;;  %v1796_v35 = vrot.slane %v7751_v63, 3 }
 0x354   :  { %5689 = vpow2.f32 %v5234_v49 }
 0x355   :  { %v5666_v23 = vpop.eup %5665  ;;  %5691 = vpow2.f32 %v5235_v55  ;;  %v1770_v55 = vrot.slane %v7745_v54, 2 }
 0x356   :  { %v5668_v28 = vpop.eup %5667  ;;  %v1669_v36 = vadd.f32 1.0, %v5666_v23  ;;  %5693 = vpow2.f32 %v5236_v52  ;;  %v1790_v52 = vrot.slane %v7737_v11, 3  ;;  %v1771_v23 = vrot.slane %v7747_v9, 2 }
 0x357   :  { %v5670_v39 = vpop.eup %5669  ;;  %v1670_v12 = vadd.f32 1.0, %v5668_v28  ;;  %5695 = vpow2.f32 %v5237_v45  ;;  %v1791_v28 = vrot.slane %v7741_v27, 3  ;;  %v5238_v11 = vmul.f32 -1.442695, %v1789_v51 }
 0x358   :  { %v5672_v13 = vpop.eup %5671  ;;  %v1671_v14 = vadd.f32 1.0, %v5670_v39  ;;  %5697 = vrcp.f32 %v1669_v36  ;;  %v1772_v39 = vrot.slane %v7751_v63, 2  ;;  %v1795_v27 = vrot.slane %v7747_v9, 3 }
 0x359   :  { %v5674_v15 = vpop.eup %5673  ;;  %v1672_v43 = vadd.f32 1.0, %v5672_v13  ;;  %5699 = vrcp.f32 %v1670_v12  ;;  %v1793_v13 = vrot.slane %v7739_v26, 3 }
 0x35a   :  { %v5676_v16 = vpop.eup %5675  ;;  %v1673_v17 = vadd.f32 1.0, %v5674_v15  ;;  %5701 = vrcp.f32 %v1671_v14  ;;  %v1794_v15 = vrot.slane %v7745_v54, 3  ;;  %v5244_v54 = vmul.f32 -1.442695, %v1795_v27 }
 0x35b   :  { %v5678_v3 = vpop.eup %5677  ;;  %v1674_v44 = vadd.f32 1.0, %v5676_v16  ;;  %5703 = vrcp.f32 %v1672_v43  ;;  %v5239_v43 = vmul.f32 -1.442695, %v1790_v52 }
 0x35c   :  { %v5680_v18 = vpop.eup %5679  ;;  %v1675_v19 = vadd.f32 1.0, %v5678_v3  ;;  %5705 = vrcp.f32 %v1673_v17  ;;  %v5240_v17 = vmul.f32 -1.442695, %v1791_v28 }
 0x35d   :  { %v5682_v42 = vpop.eup %5681  ;;  %v1676_v20 = vadd.f32 1.0, %v5680_v18  ;;  %5707 = vrcp.f32 %v1674_v44  ;;  %v5241_v44 = vmul.f32 -1.442695, %v1792_v46 }
 0x35e   :  { %v5684_v21 = vpop.eup %5683  ;;  %5709 = vrcp.f32 %v1675_v19  ;;  %v1741_v22 = vadd.f32 1.0, %v5682_v42  ;;  %v5242_v19 = vmul.f32 -1.442695, %v1793_v13  ;;  %v5243_v42 = vmul.f32 -1.442695, %v1794_v15 }
 0x35f   :  { %v5686_v24 = vpop.eup %5685  ;;  %5711 = vrcp.f32 %v1676_v20  ;;  %v1742_v25 = vadd.f32 1.0, %v5684_v21 }
 0x360   :  { %v5688_v7 = vpop.eup %5687  ;;  %v1743_v60 = vadd.f32 1.0, %v5686_v24  ;;  %5713 = vrcp.f32 %v1741_v22  ;;  %v5245_v22 = vmul.f32 -1.442695, %v1796_v35 }
 0x361   :  { %v5690_v57 = vpop.eup %5689  ;;  %v1744_v56 = vadd.f32 1.0, %v5688_v7  ;;  %5715 = vrcp.f32 %v1742_v25 }
 0x362   :  { %v5692_v29 = vpop.eup %5691  ;;  %v1745_v4 = vadd.f32 1.0, %v5690_v57  ;;  %5717 = vrcp.f32 %v1743_v60 }
 0x363   :  { %v5694_v62 = vpop.eup %5693  ;;  %v1746_v53 = vadd.f32 1.0, %v5692_v29  ;;  %5719 = vrcp.f32 %v1744_v56 }
 0x364   :  { %v5696_v58 = vpop.eup %5695  ;;  %v1747_v48 = vadd.f32 1.0, %v5694_v62  ;;  %5721 = vrcp.f32 %v1745_v4 }
 0x365   :  { %v5698_v1 = vpop.eup %5697  ;;  %v1748_v0 = vadd.f32 1.0, %v5696_v58  ;;  %5723 = vrcp.f32 %v1746_v53 }
 0x366   :  { %v5700_v37 = vpop.eup %5699  ;;  %5725 = vrcp.f32 %v1747_v48 }
 0x367   :  { %v5702_v34 = vpop.eup %5701  ;;  %5727 = vrcp.f32 %v1748_v0 }
 0x368   :  { %v7771_v41 = vpop.eup %5703  ;;  %5729 = vtanh.f32 %v1765_v2 }
 0x369   :  { %v7775_v49 = vpop.eup %5705  ;;  %5731 = vtanh.f32 %v1766_v38 }
 0x36a   :  { %v7779_v45 = vpop.eup %5707  ;;  %5733 = vtanh.f32 %v1767_v6 }
 0x36b   :  { %v7783_v36 = vpop.eup %5709  ;;  %5735 = vtanh.f32 %v1768_v8 }
 0x36c   :  { %v7787_v12 = vpop.eup %5711  ;;  %5737 = vtanh.f32 %v1769_v40 }
 0x36d   :  { %v5714_v14 = vpop.eup %5713  ;;  %5739 = vtanh.f32 %v1770_v55 }
 0x36e   :  { %v5716_v16 = vpop.eup %5715  ;;  %5741 = vtanh.f32 %v1771_v23  ;;  %v1853_v9 = vmul.f32 %v5714_v14, %v7577_v61 }
 0x36f   :  { %v5718_v3 = vpop.eup %5717  ;;  %5743 = vtanh.f32 %v1772_v39  ;;  %v1854_v63 = vmul.f32 %v5716_v16, %v7581_v31 }
 0x370   :  { %v5720_v18 = vpop.eup %5719  ;;  %5745 = vpow2.f32 %v5238_v11  ;;  %v1855_v57 = vmul.f32 %v5718_v3, %v7584_v30 }
 0x371   :  { %v5722_v26 = vpop.eup %5721  ;;  %5747 = vpow2.f32 %v5239_v43  ;;  %v1856_v4 = vmul.f32 %v5720_v18, %v7588_v59 }
 0x372   :  { %v5724_v20 = vpop.eup %5723  ;;  %5749 = vpow2.f32 %v5240_v17  ;;  %v1857_v58 = vmul.f32 %v5722_v26, %v7591_v50 }
 0x373   :  { %v5726_v21 = vpop.eup %5725  ;;  %5751 = vpow2.f32 %v5241_v44  ;;  %v1858_v31 = vmul.f32 %v5724_v20, %v7594_v33 }
 0x374   :  { %v5728_v24 = vpop.eup %5727  ;;  %5753 = vpow2.f32 %v5242_v19 }
 0x375   :  { %v5730_v25 = vpop.eup %5729  ;;  %5755 = vpow2.f32 %v5243_v42  ;;  %v1860_v39 = vmul.f32 %v5728_v24, %v7605_v32 }
 0x376   :  { %v5732_v7 = vpop.eup %5731  ;;  %5757 = vpow2.f32 %v5244_v54  ;;  %v1861_v60 = vmul.f32 %v5730_v25, %v5698_v1 }
 0x377   :  { %v5734_v56 = vpop.eup %5733  ;;  %5759 = vpow2.f32 %v5245_v22  ;;  %v1862_v29 = vmul.f32 %v5732_v7, %v5700_v37 }
 0x378   :  { %v5736_v62 = vpop.eup %5735  ;;  %v1863_v53 = vmul.f32 %v5734_v56, %v5702_v34  ;;  %v7798_v48 = vadd.f32 %v1861_v60, %v1853_v9 }
 0x379   :  { %v5738_v61 = vpop.eup %5737  ;;  %v1864_v2 = vmul.f32 %v5736_v62, %v7771_v41  ;;  %v7802_v0 = vadd.f32 %v1862_v29, %v1854_v63 }
 0x37a   :  { %v5740_v1 = vpop.eup %5739  ;;  %v1865_v30 = vmul.f32 %v5738_v61, %v7775_v49  ;;  %v7805_v38 = vadd.f32 %v1863_v53, %v1855_v57  ;;  %5761 = vtanh.f32 %v7798_v48 }
 0x37b   :  { %v5742_v59 = vpop.eup %5741  ;;  %v1866_v37 = vmul.f32 %v5740_v1, %v7779_v45  ;;  %v7809_v50 = vadd.f32 %v1864_v2, %v1856_v4  ;;  %5763 = vtanh.f32 %v7802_v0  ;;  %v1859_v45 = vmul.f32 %v5726_v21, %v7603_v47 }
 0x37c   :  { %v5744_v6 = vpop.eup %5743  ;;  %v7812_v34 = vadd.f32 %v1865_v30, %v1857_v58  ;;  %5765 = vtanh.f32 %v7805_v38  ;;  %v1867_v11 = vmul.f32 %v5742_v59, %v7783_v36 }
 0x37d   :  { %v5746_v33 = vpop.eup %5745  ;;  %v7815_v8 = vadd.f32 %v1866_v37, %v1858_v31  ;;  %5767 = vtanh.f32 %v7809_v50  ;;  %v1868_v43 = vmul.f32 %v5744_v6, %v7787_v12 }
 0x37e   :  { %v5748_v41 = vpop.eup %5747  ;;  %v1829_v40 = vadd.f32 1.0, %v5746_v33  ;;  %5769 = vtanh.f32 %v7812_v34  ;;  %v7824_v17 = vadd.f32 %v1867_v11, %v1859_v45  ;;  %v7887_v45 = vld [vmem:[%s9546_s1 + $0x1c8] sm:$0xff]  ;;  %v7921_v11 = vld [vmem:[%s9546_s1 + $0x1a0] sm:$0xff] }
 0x37f   :  { %v5750_v51 = vpop.eup %5749  ;;  %v1830_v49 = vadd.f32 1.0, %v5748_v41  ;;  %5771 = vtanh.f32 %v7815_v8  ;;  %v7826_v3 = vadd.f32 %v1868_v43, %v1860_v39  ;;  %v7904_v39 = vld [vmem:[%s9546_s1 + $0x1d0] sm:$0xff]  ;;  %v7938_v43 = vld [vmem:[%s9546_s1 + $0x198] sm:$0xff] }
 0x380   :  { %v5752_v55 = vpop.eup %5751  ;;  %v1831_v52 = vadd.f32 1.0, %v5750_v51  ;;  %5773 = vrcp.f32 %v1829_v40  ;;  %v7865_v51 = vld [vmem:[%s9546_s1 + $0x1e8] sm:$0xff] }
 0x381   :  { %v5754_v23 = vpop.eup %5753  ;;  %v1832_v28 = vadd.f32 1.0, %v5752_v55  ;;  %5775 = vrcp.f32 %v1830_v49  ;;  %v7870_v49 = vld [vmem:[%s9546_s1 + $0x1f8] sm:$0xff]  ;;  %v7875_v55 = vld [vmem:[%s9546_s1 + $0x1e0] sm:$0xff]  ;;  %2663 = vmatprep.subr.mxu0 %v7865_v51 }
 0x382   :  { %v5756_v46 = vpop.eup %5755  ;;  %v1833_v13 = vadd.f32 1.0, %v5754_v23  ;;  %5777 = vrcp.f32 %v1831_v52  ;;  %2734 = vmatprep.subr.mxu1 %v7870_v49  ;;  %v7882_v52 = vld [vmem:[%s9546_s1 + $0x1f0] sm:$0xff]  ;;  %v7892_v23 = vld [vmem:[%s9546_s1 + $0x1d8] sm:$0xff] }
 0x383   :  { %v5758_v14 = vpop.eup %5757  ;;  %v1834_v15 = vadd.f32 1.0, %v5756_v46  ;;  %5779 = vrcp.f32 %v1832_v28  ;;  %v7899_v28 = vld [vmem:[%s9546_s1 + $0x1c0] sm:$0xff]  ;;  %v7909_v46 = vld [vmem:[%s9546_s1 + $0x1a8] sm:$0xff] }
 0x384   :  { %v5760_v16 = vpop.eup %5759  ;;  %v1835_v27 = vadd.f32 1.0, %v5758_v14  ;;  %5781 = vrcp.f32 %v1833_v13  ;;  %v7916_v13 = vld [vmem:[%s9546_s1 + $0x1b8] sm:$0xff]  ;;  %v7926_v14 = vld [vmem:[%s9546_s1 + $0x1b0] sm:$0xff] }
 0x385   :  { %v1836_v47 = vadd.f32 1.0, %v5760_v16  ;;  %5783 = vrcp.f32 %v1834_v15  ;;  %v7933_v15 = vld [vmem:[%s9546_s1 + $0x188] sm:$0xff]  ;;  %v7945_v16 = vld [vmem:[%s9546_s1 + $0x180] sm:$0xff] }
 0x386   :  { %5785 = vrcp.f32 %v1835_v27  ;;  %v7950_v27 = vld [vmem:[%s9546_s1 + $0x190] sm:$0xff] }
 0x387   :  { %v5762_v32 = vpop.eup %5761  ;;  %5787 = vrcp.f32 %v1836_v47  ;;  %v7957_v47 = vld [vmem:[%s9546_s1 + $0x168] sm:$0xff] }
 0x388   :  { %v5764_v35 = vpop.eup %5763  ;;  %5789 = vtanh.f32 %v7824_v17 }
 0x389   :  { %v5766_v36 = vpop.eup %5765  ;;  %5791 = vtanh.f32 %v7826_v3 }
 0x38a   :  { %v5768_v44 = vpop.eup %5767 }
 0x38b   :  { %v5770_v12 = vpop.eup %5769 }
 0x38c   :  { %v5772_v18 = vpop.eup %5771 }
 0x38d   :  { %v5774_v19 = vpop.eup %5773 }
 0x38e   :  { %v5776_v26 = vpop.eup %5775  ;;  %v1885_v42 = vmul.f32 %v5774_v19, %v5762_v32  ;;  %v7962_v32 = vld [vmem:[%s9546_s1 + $0x178] sm:$0xff]  ;;  %v7998_v19 = vld [vmem:[%s9546_s1 + $0x150] sm:$0xff] }
 0x38f   :  { %v5778_v20 = vpop.eup %5777  ;;  %v1886_v54 = vmul.f32 %v5776_v26, %v5764_v35  ;;  %v7969_v35 = vld [vmem:[%s9546_s1 + $0x160] sm:$0xff]  ;;  %v8005_v26 = vld [vmem:[%s9546_s1 + $0x128] sm:$0xff] }
 0x390   :  { %v5780_v21 = vpop.eup %5779  ;;  %v1887_v22 = vmul.f32 %v5778_v20, %v5766_v36  ;;  %1893 = vst [vmem:[%s9550_s4 + $0x2] sm:$0x1] %v1885_v42  ;;  %v7974_v36 = vld [vmem:[%s9546_s1 + $0x170] sm:$0xff]  ;;  %9763 = vst [vmem:[#allocation2_spill] sm:$0xff] %v8005_v26  ;;  %v8017_v20 = vld [vmem:[%s9546_s1 + $0x120] sm:$0xff] }
 0x391   :  { %v5782_v24 = vpop.eup %5781  ;;  %v1888_v9 = vmul.f32 %v5780_v21, %v5768_v44  ;;  %1894 = vst [vmem:[%s9550_s4 + $0xa] sm:$0x1] %v1886_v54  ;;  %v1989_v57 = vcombine.low %v1885_v42, %v1886_v54  ;;  %v7981_v44 = vld [vmem:[%s9546_s1 + $0x148] sm:$0xff]  ;;  %v8010_v42 = vld [vmem:[%s9546_s1 + $0x138] sm:$0xff]  ;;  %9765 = vst [vmem:[#allocation4_spill] sm:$0xff] %v8017_v20 }
 0x392   :  { %v5784_v25 = vpop.eup %5783  ;;  %v1889_v63 = vmul.f32 %v5782_v24, %v5770_v12  ;;  %1895 = vst [vmem:[%s9550_s4 + $0x12] sm:$0x1] %v1887_v22  ;;  %v7986_v12 = vld [vmem:[%s9546_s1 + $0x158] sm:$0xff]  ;;  %9764 = vst [vmem:[#allocation3_spill] sm:$0xff] %v8010_v42  ;;  %v8022_v54 = vld [vmem:[%s9546_s1 + $0x130] sm:$0xff] }
 0x393   :  { %v5786_v7 = vpop.eup %5785  ;;  %v1890_v60 = vmul.f32 %v5784_v25, %v5772_v18  ;;  %1896 = vst [vmem:[%s9550_s4 + $0x1a] sm:$0x1] %v1888_v9  ;;  %v1990_v56 = vcombine.low %v1887_v22, %v1888_v9  ;;  %v1999_v31 = vrot.slane %v1989_v57, %v6925_v10  ;;  %v7993_v18 = vld [vmem:[%s9546_s1 + $0x140] sm:$0xff]  ;;  %9766 = vst [vmem:[#allocation5_spill] sm:$0xff] %v8022_v54  ;;  %v8029_v21 = vld [vmem:[%s9546_s1 + $0x108] sm:$0xff] }
 0x394   :  { %v5788_v29 = vpop.eup %5787  ;;  %1897 = vst [vmem:[%s9550_s4 + $0x22] sm:$0x1] %v1889_v63  ;;  %9767 = vst [vmem:[#allocation6_spill] sm:$0xff] %v8029_v21  ;;  %v8034_v22 = vld [vmem:[%s9546_s1 + $0x118] sm:$0xff]  ;;  %v8041_v24 = vld [vmem:[%s9546_s1 + $0x100] sm:$0xff] }
 0x395   :  { %v5790_v4 = vpop.eup %5789  ;;  %1898 = vst [vmem:[%s9550_s4 + $0x2a] sm:$0x1] %v1890_v60  ;;  %v2006_v62 = vrot.slane %v1990_v56, %v6925_v10  ;;  %v1991_v2 = vcombine.low %v1889_v63, %v1890_v60  ;;  %9768 = vst [vmem:[#allocation7_spill] sm:$0xff] %v8034_v22  ;;  %v8046_v9 = vld [vmem:[%s9546_s1 + $0x110] sm:$0xff]  ;;  %v8053_v25 = vld [vmem:[%s9546_s1 + $0xe8] sm:$0xff] }
 0x396   :  { %v5792_v53 = vpop.eup %5791  ;;  %v1891_v58 = vmul.f32 %v5790_v4, %v5786_v7  ;;  %9769 = vst [vmem:[#allocation8_spill] sm:$0xff] %v8041_v24  ;;  %9770 = vst [vmem:[#allocation9_spill] sm:$0xff] %v8046_v9  ;;  %v8058_v63 = vld [vmem:[%s9546_s1 + $0xf8] sm:$0xff]  ;;  %v8065_v7 = vld [vmem:[%s9546_s1 + $0xe0] sm:$0xff] }
 0x397   :  { %v1892_v61 = vmul.f32 %v5792_v53, %v5788_v29  ;;  %v2021_v30 = vcombine.low %v1999_v31, %v2006_v62  ;;  %v2013_v59 = vrot.slane %v1991_v2, %v6925_v10  ;;  %9771 = vst [vmem:[#allocation10_spill] sm:$0xff] %v8053_v25  ;;  %9772 = vst [vmem:[#allocation11_spill] sm:$0xff] %v8058_v63  ;;  %v8070_v60 = vld [vmem:[%s9546_s1 + $0xf0] sm:$0xff]  ;;  %v8077_v57 = vld [vmem:[%s9546_s1 + $0xc8] sm:$0xff] }
 0x398   :  { %1899 = vst [vmem:[%s9550_s4 + $0x32] sm:$0x1] %v1891_v58  ;;  %9773 = vst [vmem:[#allocation12_spill] sm:$0xff] %v8065_v7  ;;  %v8082_v56 = vld [vmem:[%s9546_s1 + $0xd8] sm:$0xff]  ;;  %v8089_v29 = vld [vmem:[%s9546_s1 + $0xc0] sm:$0xff] }
 0x399   :  { %1900 = vst [vmem:[%s9550_s4 + $0x3a] sm:$0x1] %v1892_v61  ;;  %v1992_v1 = vcombine.low %v1891_v58, %v1892_v61  ;;  %v2029_v33 = vrot.slane %v2021_v30, %v6925_v10  ;;  %9774 = vst [vmem:[#allocation13_spill] sm:$0xff] %v8070_v60  ;;  %v8094_v4 = vld [vmem:[%s9546_s1 + $0xd0] sm:$0xff]  ;;  %v8101_v62 = vld [vmem:[%s9546_s1 + $0xa8] sm:$0xff] }
 0x39a   :  { %9775 = vst [vmem:[#allocation14_spill] sm:$0xff] %v8077_v57  ;;  %9776 = vst [vmem:[#allocation15_spill] sm:$0xff] %v8082_v56  ;;  %v8106_v53 = vld [vmem:[%s9546_s1 + $0xb8] sm:$0xff]  ;;  %v8113_v58 = vld [vmem:[%s9546_s1 + $0xa0] sm:$0xff] }
 0x39b   :  { %v2020_v37 = vrot.slane %v1992_v1, %v6925_v10  ;;  %9777 = vst [vmem:[#allocation16_spill] sm:$0xff] %v8089_v29  ;;  %9778 = vst [vmem:[#allocation17_spill] sm:$0xff] %v8094_v4  ;;  %v8118_v61 = vld [vmem:[%s9546_s1 + $0xb0] sm:$0xff]  ;;  %v8125_v2 = vld [vmem:[%s9546_s1 + $0x88] sm:$0xff] }
 0x39c   :  { %9779 = vst [vmem:[#allocation18_spill] sm:$0xff] %v8101_v62  ;;  %9780 = vst [vmem:[#allocation19_spill] sm:$0xff] %v8106_v53  ;;  %v8130_v31 = vld [vmem:[%s9546_s1 + $0x98] sm:$0xff]  ;;  %v8137_v1 = vld [vmem:[%s9546_s1 + $0x80] sm:$0xff] }
 0x39d   :  { %v2022_v6 = vcombine.low %v2013_v59, %v2020_v37  ;;  %9781 = vst [vmem:[#allocation20_spill] sm:$0xff] %v8113_v58  ;;  %9782 = vst [vmem:[#allocation21_spill] sm:$0xff] %v8118_v61  ;;  %v8142_v30 = vld [vmem:[%s9546_s1 + $0x90] sm:$0xff]  ;;  %v8149_v59 = vld [vmem:[%s9546_s1 + $0x68] sm:$0xff] }
 0x39e   :  { %9783 = vst [vmem:[#allocation22_spill] sm:$0xff] %v8125_v2  ;;  %9784 = vst [vmem:[#allocation23_spill] sm:$0xff] %v8130_v31  ;;  %v8154_v37 = vld [vmem:[%s9546_s1 + $0x78] sm:$0xff] }
 0x39f   :  { %v2036_v41 = vrot.slane %v2022_v6, %v6925_v10  ;;  %9785 = vst [vmem:[#allocation24_spill] sm:$0xff] %v8137_v1  ;;  %9786 = vst [vmem:[#allocation25_spill] sm:$0xff] %v8142_v30  ;;  %v8161_v6 = vld [vmem:[%s9546_s1 + $0x60] sm:$0xff] }
 0x3a0   :  { %9787 = vst [vmem:[#allocation26_spill] sm:$0xff] %v8149_v59  ;;  %9788 = vst [vmem:[#allocation27_spill] sm:$0xff] %v8154_v37 }
 0x3a1   :  { %v2037_v40 = vcombine.low %v2029_v33, %v2036_v41  ;;  %9789 = vst [vmem:[#allocation28_spill] sm:$0xff] %v8161_v6  ;;  %v8166_v33 = vld [vmem:[%s9546_s1 + $0x70] sm:$0xff]  ;;  %v8173_v41 = vld [vmem:[%s9546_s1 + $0x48] sm:$0xff] }
 0x3a2   :  { %9790 = vst [vmem:[#allocation29_spill] sm:$0xff] %v8166_v33  ;;  %9791 = vst [vmem:[#allocation30_spill] sm:$0xff] %v8173_v41 }
 0x3a3   :  { %2104 = vmatmul.mubr.f32.vlgmr.msra.gmra.mxu0 %v2037_v40  ;;  %2175 = vmatmul.mubr.f32.vlgmr.msra.gmra.mxu1 %v2037_v40  ;;  %v8178_v40 = vld [vmem:[%s9546_s1 + $0x58] sm:$0xff] }
 0x3a4   :  { %2727 = vmatprep.mubr.f32.mxu0 %v9761_v5  ;;  %2798 = vmatprep.mubr.f32.mxu1 %v9761_v5  ;;  %9792 = vst [vmem:[#allocation31_spill] sm:$0xff] %v8178_v40  ;;  %v8185_v5 = vld [vmem:[%s9546_s1 + $0x40] sm:$0xff] }
 0x3a5   :  { %2664 = vmatpush1.msra.mxu0 %v7875_v55  ;;  %2735 = vmatpush1.msra.mxu1 %v7882_v52  ;;  %9793 = vst [vmem:[#allocation32_spill] sm:$0xff] %v8185_v5 }
 0x3a6   :  { %2665 = vmatprep.subr.mxu0 %v7887_v45  ;;  %2736 = vmatprep.subr.mxu1 %v7892_v23 }
 0x3a7   :  { %2666 = vmatpush1.msra.mxu0 %v7899_v28  ;;  %2737 = vmatpush1.msra.mxu1 %v7904_v39 }
 0x3a8   :  { %2667 = vmatprep.subr.mxu0 %v7909_v46  ;;  %2738 = vmatprep.subr.mxu1 %v7916_v13 }
 0x3a9   :  { %2668 = vmatpush1.msra.mxu0 %v7921_v11  ;;  %2739 = vmatpush1.msra.mxu1 %v7926_v14 }
 0x3aa   :  { %2669 = vmatprep.subr.mxu0 %v7933_v15  ;;  %2740 = vmatprep.subr.mxu1 %v7938_v43 }
 0x3ab   :  { %2670 = vmatpush1.msra.mxu0 %v7945_v16  ;;  %2741 = vmatpush1.msra.mxu1 %v7950_v27 }
 0x3ac   :  { %2671 = vmatprep.subr.mxu0 %v7957_v47  ;;  %2742 = vmatprep.subr.mxu1 %v7962_v32 }
 0x3ad   :  { %2672 = vmatpush1.msra.mxu0 %v7969_v35  ;;  %2743 = vmatpush1.msra.mxu1 %v7974_v36 }
 0x3ae   :  { %2673 = vmatprep.subr.mxu0 %v7981_v44  ;;  %2744 = vmatprep.subr.mxu1 %v7986_v12 }
 0x3af   :  { %2674 = vmatpush1.msra.mxu0 %v7993_v18  ;;  %2745 = vmatpush1.msra.mxu1 %v7998_v19 }
 0x3b0   :  { %2675 = vmatprep.subr.mxu0 %v8005_v26  ;;  %2746 = vmatprep.subr.mxu1 %v8010_v42 }
 0x3b1   :  { %2676 = vmatpush1.msra.mxu0 %v8017_v20  ;;  %2747 = vmatpush1.msra.mxu1 %v8022_v54 }
 0x3b2   :  { %2677 = vmatprep.subr.mxu0 %v8029_v21  ;;  %2748 = vmatprep.subr.mxu1 %v8034_v22 }
 0x3b3   :  { %2678 = vmatpush1.msra.mxu0 %v8041_v24  ;;  %2749 = vmatpush1.msra.mxu1 %v8046_v9 }
 0x3b4   :  { %2679 = vmatprep.subr.mxu0 %v8053_v25  ;;  %2750 = vmatprep.subr.mxu1 %v8058_v63 }
 0x3b5   :  { %2680 = vmatpush1.msra.mxu0 %v8065_v7  ;;  %2751 = vmatpush1.msra.mxu1 %v8070_v60 }
 0x3b6   :  { %2681 = vmatprep.subr.mxu0 %v8077_v57  ;;  %2752 = vmatprep.subr.mxu1 %v8082_v56 }
 0x3b7   :  { %2682 = vmatpush1.msra.mxu0 %v8089_v29  ;;  %2753 = vmatpush1.msra.mxu1 %v8094_v4 }
 0x3b8   :  { %2683 = vmatprep.subr.mxu0 %v8101_v62  ;;  %2754 = vmatprep.subr.mxu1 %v8106_v53  ;;  %v5246_v62 = vld [vmem:[%s9548_s0 + $0x3] ss:$8 sm:$0xf] }
 0x3b9   :  { %2684 = vmatpush1.msra.mxu0 %v8113_v58  ;;  %2755 = vmatpush1.msra.mxu1 %v8118_v61 }
 0x3ba   :  { %2685 = vmatprep.subr.mxu0 %v8125_v2  ;;  %2756 = vmatprep.subr.mxu1 %v8130_v31 }
 0x3bb   :  { %2686 = vmatpush1.msra.mxu0 %v8137_v1  ;;  %2757 = vmatpush1.msra.mxu1 %v8142_v30  ;;  %v8190_v30 = vld [vmem:[%s9546_s1 + $0x50] sm:$0xff] }
 0x3bc   :  { %2687 = vmatprep.subr.mxu0 %v8149_v59  ;;  %2758 = vmatprep.subr.mxu1 %v8154_v37  ;;  %9794 = vst [vmem:[#allocation33_spill] sm:$0xff] %v8190_v30  ;;  %v8197_v59 = vld [vmem:[%s9546_s1 + $0x28] sm:$0xff]  ;;  %v8202_v37 = vld [vmem:[%s9546_s1 + $0x38] sm:$0xff] }
 0x3bd   :  { %2688 = vmatpush1.msra.mxu0 %v8161_v6  ;;  %2759 = vmatpush1.msra.mxu1 %v8166_v33  ;;  %9795 = vst [vmem:[#allocation34_spill] sm:$0xff] %v8197_v59  ;;  %9796 = vst [vmem:[#allocation35_spill] sm:$0xff] %v8202_v37  ;;  %v8209_v6 = vld [vmem:[%s9546_s1 + $0x20] sm:$0xff]  ;;  %v8214_v33 = vld [vmem:[%s9546_s1 + $0x30] sm:$0xff] }
 0x3be   :  { %2689 = vmatprep.subr.mxu0 %v8173_v41  ;;  %2760 = vmatprep.subr.mxu1 %v8178_v40  ;;  %9797 = vst [vmem:[#allocation36_spill] sm:$0xff] %v8209_v6  ;;  %9798 = vst [vmem:[#allocation37_spill] sm:$0xff] %v8214_v33  ;;  %v8221_v41 = vld [vmem:[%s9546_s1 + $0x8] sm:$0xff]  ;;  %v8226_v40 = vld [vmem:[%s9546_s1 + $0x18] sm:$0xff] }
 0x3bf   :  { %2690 = vmatpush1.msra.mxu0 %v8185_v5  ;;  %2761 = vmatpush1.msra.mxu1 %v8190_v30  ;;  %9799 = vst [vmem:[#allocation38_spill] sm:$0xff] %v8221_v41  ;;  %9800 = vst [vmem:[#allocation39_spill] sm:$0xff] %v8226_v40  ;;  %v8233_v5 = vld [vmem:[%s9546_s1] sm:$0xff]  ;;  %v8238_v30 = vld [vmem:[%s9546_s1 + $0x10] sm:$0xff] }
 0x3c0   :  { %2691 = vmatprep.subr.mxu0 %v8197_v59  ;;  %2762 = vmatprep.subr.mxu1 %v8202_v37  ;;  %9801 = vst [vmem:[#allocation40_spill] sm:$0xff] %v8233_v5  ;;  %9802 = vst [vmem:[#allocation41_spill] sm:$0xff] %v8238_v30 }
 0x3c1   :  { %2692 = vmatpush1.msra.mxu0 %v8209_v6  ;;  %2763 = vmatpush1.msra.mxu1 %v8214_v33 }
 0x3c2   :  { %2693 = vmatprep.subr.mxu0 %v8221_v41  ;;  %2764 = vmatprep.subr.mxu1 %v8226_v40 }
 0x3c3   :  { %2694 = vmatpush1.msra.mxu0 %v8233_v5  ;;  %2765 = vmatpush1.msra.mxu1 %v8238_v30 }
 0x3c4   :  { %3287 = vmatprep.subr.mxu0 %v7865_v51  ;;  %3358 = vmatprep.subr.mxu1 %v7870_v49 }
 0x463   :  { %v2105_v37 = vpop.f32.mrf.mxu0  ;;  %v2176_v59 = vpop.f32.mrf.mxu1 }
 0x465   :  { %v2107_v1 = vpop.f32.mrf.mxu0  ;;  %v2178_v31 = vpop.f32.mrf.mxu1 }
 0x466   :  { %v2185_v2 = vcombine.low %v2105_v37, %v2107_v1  ;;  %v2186_v6 = vcombine.high %v2105_v37, %v2107_v1  ;;  %v2187_v61 = vcombine.low %v2176_v59, %v2178_v31  ;;  %v2188_v33 = vcombine.high %v2176_v59, %v2178_v31  ;;  %v5247_v31 = vld [vmem:[%s9548_s0 + $0x23] ss:$8 sm:$0xf] }
 0x467   :  { %v5249_v37 = vld [vmem:[%s9548_s0 + $0x63] ss:$8 sm:$0xf] }
 0x468   :  { %v2195_v41 = vrot.slane %v2185_v2, %v6925_v10  ;;  %v2202_v40 = vrot.slane %v2186_v6, %v6925_v10  ;;  %v2209_v5 = vrot.slane %v2187_v61, %v6925_v10  ;;  %v2216_v30 = vrot.slane %v2188_v33, %v6925_v10  ;;  %v5248_v2 = vld [vmem:[%s9548_s0 + $0x43] ss:$8 sm:$0xf] }
 0x469   :  { %v5250_v61 = vld [vmem:[%s9548_s0 + $0x83] ss:$8 sm:$0xf] }
 0x46a   :  { %v2217_v58 = vcombine.low %v2195_v41, %v2209_v5  ;;  %v2218_v51 = vcombine.high %v2195_v41, %v2209_v5  ;;  %v2219_v53 = vcombine.low %v2202_v40, %v2216_v30  ;;  %v2220_v49 = vcombine.high %v2202_v40, %v2216_v30  ;;  %v5251_v6 = vld [vmem:[%s9548_s0 + $0xa3] ss:$8 sm:$0xf] }
 0x46b   :  { %v5252_v33 = vld [vmem:[%s9548_s0 + $0xc3] ss:$8 sm:$0xf] }
 0x46c   :  { %v2227_v5 = vrot.slane %v2217_v58, %v6925_v10  ;;  %v2234_v1 = vrot.slane %v2219_v53, %v6925_v10  ;;  %v2241_v30 = vrot.slane %v2218_v51, %v6925_v10  ;;  %v2248_v59 = vrot.slane %v2220_v49, %v6925_v10  ;;  %v5253_v51 = vld [vmem:[%s9548_s0 + $0xe3] ss:$8 sm:$0xf] }
 0x46e   :  { %v2249_v41 = vcombine.high %v2227_v5, %v2227_v5  ;;  %v2250_v58 = vcombine.high %v2234_v1, %v2234_v1  ;;  %v2251_v40 = vcombine.high %v2241_v30, %v2241_v30  ;;  %v2252_v53 = vcombine.high %v2248_v59, %v2248_v59 }
 0x46f   :  { %v8280_v49 = vadd.f32 %v5246_v62, %v2227_v5  ;;  %v8282_v4 = vadd.f32 %v5247_v31, %v2241_v30  ;;  %v8284_v29 = vadd.f32 %v5250_v61, %v2234_v1  ;;  %v8290_v60 = vadd.f32 %v5251_v6, %v2248_v59 }
 0x470   :  { %v8286_v56 = vadd.f32 %v5248_v2, %v2249_v41  ;;  %v8288_v57 = vadd.f32 %v5249_v37, %v2251_v40  ;;  %v8292_v7 = vadd.f32 %v5252_v33, %v2250_v58  ;;  %v8296_v9 = vadd.f32 %v5253_v51, %v2252_v53 }
 0x471   :  { %v5254_v63 = vmul.f32 -1.442695, %v8280_v49  ;;  %v5255_v25 = vmul.f32 -1.442695, %v8282_v4  ;;  %v5258_v2 = vmul.f32 -1.442695, %v8284_v29 }
 0x472   :  { %v5256_v62 = vmul.f32 -1.442695, %v8286_v56  ;;  %v5257_v31 = vmul.f32 -1.442695, %v8288_v57  ;;  %v2325_v61 = vrot.slane %v8280_v49, 1  ;;  %v2326_v1 = vrot.slane %v8282_v4, 1 }
 0x473   :  { %5793 = vpow2.f32 %v5254_v63  ;;  %v5259_v5 = vmul.f32 -1.442695, %v8290_v60  ;;  %v5260_v30 = vmul.f32 -1.442695, %v8292_v7  ;;  %v2327_v59 = vrot.slane %v8286_v56, 1 }
 0x474   :  { %5795 = vpow2.f32 %v5255_v25  ;;  %v5261_v37 = vmul.f32 -1.442695, %v8296_v9  ;;  %v2328_v6 = vrot.slane %v8288_v57, 1  ;;  %v2329_v63 = vrot.slane %v8284_v29, 1 }
 0x475   :  { %5797 = vpow2.f32 %v5256_v62  ;;  %v5262_v33 = vmul.f32 -1.442695, %v2325_v61  ;;  %v2330_v25 = vrot.slane %v8290_v60, 1  ;;  %v5263_v41 = vmul.f32 -1.442695, %v2326_v1 }
 0x476   :  { %5799 = vpow2.f32 %v5257_v31  ;;  %v2331_v58 = vrot.slane %v8292_v7, 1  ;;  %v5264_v40 = vmul.f32 -1.442695, %v2327_v59  ;;  %v2332_v53 = vrot.slane %v8296_v9, 1 }
 0x477   :  { %5801 = vpow2.f32 %v5258_v2  ;;  %v5265_v51 = vmul.f32 -1.442695, %v2328_v6  ;;  %v5266_v62 = vmul.f32 -1.442695, %v2329_v63  ;;  %v5267_v31 = vmul.f32 -1.442695, %v2330_v25 }
 0x478   :  { %5803 = vpow2.f32 %v5259_v5  ;;  %v5268_v2 = vmul.f32 -1.442695, %v2331_v58  ;;  %v5269_v61 = vmul.f32 -1.442695, %v2332_v53 }
 0x479   :  { %5805 = vpow2.f32 %v5260_v30 }
 0x47a   :  { %5807 = vpow2.f32 %v5261_v37 }
 0x47b   :  { %5809 = vpow2.f32 %v5262_v33 }
 0x47c   :  { %5811 = vpow2.f32 %v5263_v41 }
 0x47d   :  { %5813 = vpow2.f32 %v5264_v40 }
 0x47e   :  { %5815 = vpow2.f32 %v5265_v51 }
 0x47f   :  { %5817 = vpow2.f32 %v5266_v62 }
 0x480   :  { %v5794_v5 = vpop.eup %5793  ;;  %5819 = vpow2.f32 %v5267_v31 }
 0x481   :  { %v5796_v1 = vpop.eup %5795  ;;  %v2293_v30 = vadd.f32 1.0, %v5794_v5  ;;  %5821 = vpow2.f32 %v5268_v2 }
 0x482   :  { %v5798_v24 = vpop.eup %5797  ;;  %v2294_v59 = vadd.f32 1.0, %v5796_v1  ;;  %5823 = vpow2.f32 %v5269_v61 }
 0x483   :  { %v5800_v37 = vpop.eup %5799  ;;  %v2295_v22 = vadd.f32 1.0, %v5798_v24  ;;  %5825 = vrcp.f32 %v2293_v30 }
 0x484   :  { %v5802_v6 = vpop.eup %5801  ;;  %v2296_v63 = vadd.f32 1.0, %v5800_v37  ;;  %5827 = vrcp.f32 %v2294_v59 }
 0x485   :  { %v5804_v33 = vpop.eup %5803  ;;  %v2297_v25 = vadd.f32 1.0, %v5802_v6  ;;  %5829 = vrcp.f32 %v2295_v22 }
 0x486   :  { %v5806_v41 = vpop.eup %5805  ;;  %v2298_v58 = vadd.f32 1.0, %v5804_v33  ;;  %5831 = vrcp.f32 %v2296_v63 }
 0x487   :  { %v5808_v40 = vpop.eup %5807  ;;  %v2299_v53 = vadd.f32 1.0, %v5806_v41  ;;  %5833 = vrcp.f32 %v2297_v25  ;;  %v2389_v41 = vrot.slane %v8280_v49, 2 }
 0x488   :  { %v5810_v51 = vpop.eup %5809  ;;  %v2300_v62 = vadd.f32 1.0, %v5808_v40  ;;  %5835 = vrcp.f32 %v2298_v58 }
 0x489   :  { %v5812_v31 = vpop.eup %5811  ;;  %5837 = vrcp.f32 %v2299_v53  ;;  %v2365_v2 = vadd.f32 1.0, %v5810_v51  ;;  %v2390_v53 = vrot.slane %v8282_v4, 2 }
 0x48a   :  { %v5814_v24 = vpop.eup %5813  ;;  %5839 = vrcp.f32 %v2300_v62  ;;  %v2366_v61 = vadd.f32 1.0, %v5812_v31  ;;  %v2391_v62 = vrot.slane %v8286_v56, 2 }
 0x48b   :  { %v5816_v5 = vpop.eup %5815  ;;  %v2367_v1 = vadd.f32 1.0, %v5814_v24  ;;  %5841 = vrcp.f32 %v2365_v2  ;;  %v2392_v2 = vrot.slane %v8288_v57, 2 }
 0x48c   :  { %v5818_v30 = vpop.eup %5817  ;;  %v2368_v22 = vadd.f32 1.0, %v5816_v5  ;;  %5843 = vrcp.f32 %v2366_v61  ;;  %v2393_v61 = vrot.slane %v8284_v29, 2  ;;  %v2413_v5 = vrot.slane %v8280_v49, 3 }
 0x48d   :  { %v5820_v59 = vpop.eup %5819  ;;  %v2369_v37 = vadd.f32 1.0, %v5818_v30  ;;  %5845 = vrcp.f32 %v2367_v1  ;;  %v2394_v30 = vrot.slane %v8290_v60, 2  ;;  %v2416_v49 = vrot.slane %v8288_v57, 3 }
 0x48e   :  { %v5822_v6 = vpop.eup %5821  ;;  %v2370_v63 = vadd.f32 1.0, %v5820_v59  ;;  %5847 = vrcp.f32 %v2368_v22  ;;  %v2414_v22 = vrot.slane %v8282_v4, 3  ;;  %v5270_v4 = vmul.f32 -1.442695, %v2413_v5 }
 0x48f   :  { %v5824_v33 = vpop.eup %5823  ;;  %v2371_v25 = vadd.f32 1.0, %v5822_v6  ;;  %5849 = vrcp.f32 %v2369_v37  ;;  %v2395_v37 = vrot.slane %v8292_v7, 2  ;;  %v2415_v6 = vrot.slane %v8286_v56, 3 }
 0x490   :  { %v5826_v58 = vpop.eup %5825  ;;  %v2372_v40 = vadd.f32 1.0, %v5824_v33  ;;  %5851 = vrcp.f32 %v2370_v63  ;;  %v2396_v33 = vrot.slane %v8296_v9, 2  ;;  %v2419_v56 = vrot.slane %v8292_v7, 3 }
 0x491   :  { %v5828_v51 = vpop.eup %5827  ;;  %5853 = vrcp.f32 %v2371_v25  ;;  %v5272_v54 = vmul.f32 -1.442695, %v2415_v6  ;;  %v2420_v57 = vrot.slane %v8296_v9, 3 }
 0x492   :  { %v5830_v31 = vpop.eup %5829  ;;  %5855 = vrcp.f32 %v2372_v40 }
 0x493   :  { %v8316_v24 = vpop.eup %5831  ;;  %5857 = vtanh.f32 %v2389_v41  ;;  %v2417_v41 = vrot.slane %v8284_v29, 3 }
 0x494   :  { %v8320_v1 = vpop.eup %5833  ;;  %5859 = vtanh.f32 %v2390_v53  ;;  %v2418_v53 = vrot.slane %v8290_v60, 3  ;;  %v5276_v60 = vmul.f32 -1.442695, %v2419_v56 }
 0x495   :  { %v8324_v59 = vpop.eup %5835  ;;  %5861 = vtanh.f32 %v2391_v62  ;;  %v5271_v62 = vmul.f32 -1.442695, %v2414_v22 }
 0x496   :  { %v8328_v63 = vpop.eup %5837  ;;  %5863 = vtanh.f32 %v2392_v2  ;;  %v5273_v2 = vmul.f32 -1.442695, %v2416_v49  ;;  %v5275_v5 = vmul.f32 -1.442695, %v2418_v53 }
 0x497   :  { %v8332_v25 = vpop.eup %5839  ;;  %5865 = vtanh.f32 %v2393_v61  ;;  %v5274_v61 = vmul.f32 -1.442695, %v2417_v41 }
 0x498   :  { %v5842_v40 = vpop.eup %5841  ;;  %5867 = vtanh.f32 %v2394_v30 }
 0x499   :  { %v5844_v21 = vpop.eup %5843  ;;  %5869 = vtanh.f32 %v2395_v37  ;;  %v5277_v37 = vmul.f32 -1.442695, %v2420_v57  ;;  %v2477_v7 = vmul.f32 %v5842_v40, %v7798_v48 }
 0x49a   :  { %v5846_v20 = vpop.eup %5845  ;;  %5871 = vtanh.f32 %v2396_v33  ;;  %v2478_v9 = vmul.f32 %v5844_v21, %v7802_v0 }
 0x49b   :  { %v5848_v42 = vpop.eup %5847  ;;  %5873 = vpow2.f32 %v5270_v4  ;;  %v2479_v41 = vmul.f32 %v5846_v20, %v7805_v38 }
 0x49c   :  { %v5850_v29 = vpop.eup %5849  ;;  %5875 = vpow2.f32 %v5271_v62  ;;  %v2480_v53 = vmul.f32 %v5848_v42, %v7809_v50 }
 0x49d   :  { %v5852_v30 = vpop.eup %5851  ;;  %5877 = vpow2.f32 %v5272_v54  ;;  %v2481_v57 = vmul.f32 %v5850_v29, %v7812_v34 }
 0x49e   :  { %v5854_v22 = vpop.eup %5853  ;;  %5879 = vpow2.f32 %v5273_v2  ;;  %v2482_v0 = vmul.f32 %v5852_v30, %v7815_v8 }
 0x49f   :  { %v5856_v26 = vpop.eup %5855  ;;  %5881 = vpow2.f32 %v5274_v61 }
 0x4a0   :  { %v5858_v6 = vpop.eup %5857  ;;  %5883 = vpow2.f32 %v5275_v5 }
 0x4a1   :  { %v5860_v33 = vpop.eup %5859  ;;  %5885 = vpow2.f32 %v5276_v60  ;;  %v2485_v49 = vmul.f32 %v5858_v6, %v5826_v58  ;;  %v2483_v60 = vmul.f32 %v5854_v22, %v7824_v17  ;;  %v2484_v6 = vmul.f32 %v5856_v26, %v7826_v3 }
 0x4a2   :  { %v5862_v4 = vpop.eup %5861  ;;  %5887 = vpow2.f32 %v5277_v37  ;;  %v2486_v54 = vmul.f32 %v5860_v33, %v5828_v51 }
 0x4a3   :  { %v5864_v62 = vpop.eup %5863  ;;  %v2487_v56 = vmul.f32 %v5862_v4, %v5830_v31  ;;  %v8343_v2 = vadd.f32 %v2485_v49, %v2477_v7 }
 0x4a4   :  { %v5866_v48 = vpop.eup %5865  ;;  %v2488_v40 = vmul.f32 %v5864_v62, %v8316_v24  ;;  %v8347_v21 = vadd.f32 %v2486_v54, %v2478_v9 }
 0x4a5   :  { %v5868_v58 = vpop.eup %5867  ;;  %v2489_v38 = vmul.f32 %v5866_v48, %v8320_v1  ;;  %v8350_v20 = vadd.f32 %v2487_v56, %v2479_v41  ;;  %5889 = vtanh.f32 %v8343_v2 }
 0x4a6   :  { %v5870_v50 = vpop.eup %5869  ;;  %v2490_v42 = vmul.f32 %v5868_v58, %v8324_v59  ;;  %v8354_v34 = vadd.f32 %v2488_v40, %v2480_v53  ;;  %5891 = vtanh.f32 %v8347_v21 }
 0x4a7   :  { %v5872_v51 = vpop.eup %5871  ;;  %v8357_v31 = vadd.f32 %v2489_v38, %v2481_v57  ;;  %5893 = vtanh.f32 %v8350_v20  ;;  %v2491_v49 = vmul.f32 %v5870_v50, %v8328_v63 }
 0x4a8   :  { %v5874_v8 = vpop.eup %5873  ;;  %v8360_v24 = vadd.f32 %v2490_v42, %v2482_v0  ;;  %5895 = vtanh.f32 %v8354_v34  ;;  %v2492_v54 = vmul.f32 %v5872_v51, %v8332_v25 }
 0x4a9   :  { %v5876_v1 = vpop.eup %5875  ;;  %v2453_v61 = vadd.f32 1.0, %v5874_v8  ;;  %5897 = vtanh.f32 %v8357_v31  ;;  %v8369_v56 = vadd.f32 %v2491_v49, %v2483_v60 }
 0x4aa   :  { %v5878_v29 = vpop.eup %5877  ;;  %v2454_v59 = vadd.f32 1.0, %v5876_v1  ;;  %5899 = vtanh.f32 %v8360_v24  ;;  %v8371_v22 = vadd.f32 %v2492_v54, %v2484_v6 }
 0x4ab   :  { %v5880_v5 = vpop.eup %5879  ;;  %v2455_v30 = vadd.f32 1.0, %v5878_v29  ;;  %5901 = vrcp.f32 %v2453_v61 }
 0x4ac   :  { %v5882_v37 = vpop.eup %5881  ;;  %v2456_v7 = vadd.f32 1.0, %v5880_v5  ;;  %5903 = vrcp.f32 %v2454_v59 }
 0x4ad   :  { %v5884_v9 = vpop.eup %5883  ;;  %v2457_v33 = vadd.f32 1.0, %v5882_v37  ;;  %5905 = vrcp.f32 %v2455_v30 }
 0x4ae   :  { %v5886_v41 = vpop.eup %5885  ;;  %v2458_v4 = vadd.f32 1.0, %v5884_v9  ;;  %5907 = vrcp.f32 %v2456_v7 }
 0x4af   :  { %v5888_v53 = vpop.eup %5887  ;;  %v2459_v62 = vadd.f32 1.0, %v5886_v41  ;;  %5909 = vrcp.f32 %v2457_v33 }
 0x4b0   :  { %v2460_v17 = vadd.f32 1.0, %v5888_v53  ;;  %5911 = vrcp.f32 %v2458_v4 }
 0x4b1   :  { %5913 = vrcp.f32 %v2459_v62 }
 0x4b2   :  { %v5890_v3 = vpop.eup %5889  ;;  %5915 = vrcp.f32 %v2460_v17 }
 0x4b3   :  { %v5892_v26 = vpop.eup %5891  ;;  %5917 = vtanh.f32 %v8369_v56 }
 0x4b4   :  { %v5894_v63 = vpop.eup %5893  ;;  %5919 = vtanh.f32 %v8371_v22 }
 0x4b5   :  { %v5896_v57 = vpop.eup %5895 }
 0x4b6   :  { %v5898_v25 = vpop.eup %5897 }
 0x4b7   :  { %v5900_v48 = vpop.eup %5899 }
 0x4b8   :  { %v5902_v40 = vpop.eup %5901 }
 0x4b9   :  { %v5904_v0 = vpop.eup %5903  ;;  %v2509_v58 = vmul.f32 %v5902_v40, %v5890_v3  ;;  %v9827_v40 = vld [vmem:[#allocation26_spill] sm:$0xff] }
 0x4ba   :  { %v5906_v38 = vpop.eup %5905  ;;  %v2510_v50 = vmul.f32 %v5904_v0, %v5892_v26  ;;  %v9828_v0 = vld [vmem:[#allocation27_spill] sm:$0xff] }
 0x4bb   :  { %v5908_v42 = vpop.eup %5907  ;;  %v2511_v51 = vmul.f32 %v5906_v38, %v5894_v63  ;;  %2517 = vst [vmem:[%s9550_s4 + $0x3] sm:$0x1] %v2509_v58  ;;  %v9830_v38 = vld [vmem:[#allocation29_spill] sm:$0xff] }
 0x4bc   :  { %v5910_v8 = vpop.eup %5909  ;;  %v2512_v1 = vmul.f32 %v5908_v42, %v5896_v57  ;;  %2518 = vst [vmem:[%s9550_s4 + $0xb] sm:$0x1] %v2510_v50  ;;  %v2613_v30 = vcombine.low %v2509_v58, %v2510_v50  ;;  %v9829_v58 = vld [vmem:[#allocation28_spill] sm:$0xff]  ;;  %v9831_v50 = vld [vmem:[#allocation30_spill] sm:$0xff]  ;;  %v9832_v42 = vld [vmem:[#allocation31_spill] sm:$0xff] }
 0x4bd   :  { %v5912_v61 = vpop.eup %5911  ;;  %v2513_v29 = vmul.f32 %v5910_v8, %v5898_v25  ;;  %2519 = vst [vmem:[%s9550_s4 + $0x13] sm:$0x1] %v2511_v51  ;;  %v9825_v25 = vld [vmem:[#allocation24_spill] sm:$0xff]  ;;  %v9834_v8 = vld [vmem:[#allocation33_spill] sm:$0xff] }
 0x4be   :  { %v5914_v59 = vpop.eup %5913  ;;  %v2514_v5 = vmul.f32 %v5912_v61, %v5900_v48  ;;  %2520 = vst [vmem:[%s9550_s4 + $0x1b] sm:$0x1] %v2512_v1  ;;  %v2614_v60 = vcombine.low %v2511_v51, %v2512_v1  ;;  %v2623_v4 = vrot.slane %v2613_v30, %v6925_v10  ;;  %v9826_v48 = vld [vmem:[#allocation25_spill] sm:$0xff]  ;;  %v9833_v51 = vld [vmem:[#allocation32_spill] sm:$0xff]  ;;  %v9835_v1 = vld [vmem:[#allocation34_spill] sm:$0xff] }
 0x4bf   :  { %v5916_v37 = vpop.eup %5915  ;;  %2521 = vst [vmem:[%s9550_s4 + $0x23] sm:$0x1] %v2513_v29  ;;  %v9836_v61 = vld [vmem:[#allocation35_spill] sm:$0xff] }
 0x4c0   :  { %v5918_v7 = vpop.eup %5917  ;;  %2522 = vst [vmem:[%s9550_s4 + $0x2b] sm:$0x1] %v2514_v5  ;;  %v2630_v6 = vrot.slane %v2614_v60, %v6925_v10  ;;  %v2615_v41 = vcombine.low %v2513_v29, %v2514_v5  ;;  %v9837_v29 = vld [vmem:[#allocation36_spill] sm:$0xff]  ;;  %v9839_v5 = vld [vmem:[#allocation38_spill] sm:$0xff]  ;;  %v9840_v30 = vld [vmem:[#allocation39_spill] sm:$0xff] }
 0x4c1   :  { %v5920_v9 = vpop.eup %5919  ;;  %v2515_v33 = vmul.f32 %v5918_v7, %v5914_v59  ;;  %v9838_v59 = vld [vmem:[#allocation37_spill] sm:$0xff]  ;;  %v9841_v60 = vld [vmem:[#allocation40_spill] sm:$0xff] }
 0x4c2   :  { %v2516_v49 = vmul.f32 %v5920_v9, %v5916_v37  ;;  %v2645_v53 = vcombine.low %v2623_v4, %v2630_v6  ;;  %v2637_v62 = vrot.slane %v2615_v41, %v6925_v10  ;;  %v9842_v37 = vmov 0.0   ;;  %v9843_v7 = vld [vmem:[#allocation41_spill] sm:$0xff] }
 0x4c3   :  { %2523 = vst [vmem:[%s9550_s4 + $0x33] sm:$0x1] %v2515_v33 }
 0x4c4   :  { %2524 = vst [vmem:[%s9550_s4 + $0x3b] sm:$0x1] %v2516_v49  ;;  %v2616_v54 = vcombine.low %v2515_v33, %v2516_v49  ;;  %v2653_v26 = vrot.slane %v2645_v53, %v6925_v10 }
 0x4c6   :  { %v2644_v17 = vrot.slane %v2616_v54, %v6925_v10 }
 0x4c8   :  { %v2646_v3 = vcombine.low %v2637_v62, %v2644_v17 }
 0x4ca   :  { %v2660_v63 = vrot.slane %v2646_v3, %v6925_v10 }
 0x4cc   :  { %v2661_v57 = vcombine.low %v2653_v26, %v2660_v63 }
 0x4ce   :  { %2728 = vmatmul.mubr.f32.vlgmr.msra.gmra.mxu0 %v2661_v57  ;;  %2799 = vmatmul.mubr.f32.vlgmr.msra.gmra.mxu1 %v2661_v57 }
 0x4cf   :  { %3288 = vmatpush1.msra.mxu0 %v7875_v55  ;;  %3359 = vmatpush1.msra.mxu1 %v7882_v52  ;;  %v9803_v55 = vld [vmem:[#allocation2_spill] sm:$0xff]  ;;  %v9804_v52 = vld [vmem:[#allocation3_spill] sm:$0xff] }
 0x4d0   :  { %3289 = vmatprep.subr.mxu0 %v7887_v45  ;;  %3360 = vmatprep.subr.mxu1 %v7892_v23  ;;  %v9805_v45 = vld [vmem:[#allocation4_spill] sm:$0xff]  ;;  %v9806_v23 = vld [vmem:[#allocation5_spill] sm:$0xff] }
 0x4d1   :  { %3290 = vmatpush1.msra.mxu0 %v7899_v28  ;;  %3361 = vmatpush1.msra.mxu1 %v7904_v39  ;;  %v9807_v28 = vld [vmem:[#allocation6_spill] sm:$0xff]  ;;  %v9808_v39 = vld [vmem:[#allocation7_spill] sm:$0xff] }
 0x4d2   :  { %3291 = vmatprep.subr.mxu0 %v7909_v46  ;;  %3362 = vmatprep.subr.mxu1 %v7916_v13  ;;  %v9809_v46 = vld [vmem:[#allocation8_spill] sm:$0xff]  ;;  %v9810_v13 = vld [vmem:[#allocation9_spill] sm:$0xff] }
 0x4d3   :  { %3292 = vmatpush1.msra.mxu0 %v7921_v11  ;;  %3363 = vmatpush1.msra.mxu1 %v7926_v14  ;;  %v9811_v11 = vld [vmem:[#allocation10_spill] sm:$0xff]  ;;  %v9812_v14 = vld [vmem:[#allocation11_spill] sm:$0xff] }
 0x4d4   :  { %3293 = vmatprep.subr.mxu0 %v7933_v15  ;;  %3364 = vmatprep.subr.mxu1 %v7938_v43  ;;  %v9813_v15 = vld [vmem:[#allocation12_spill] sm:$0xff]  ;;  %v9814_v43 = vld [vmem:[#allocation13_spill] sm:$0xff] }
 0x4d5   :  { %3294 = vmatpush1.msra.mxu0 %v7945_v16  ;;  %3365 = vmatpush1.msra.mxu1 %v7950_v27  ;;  %v9815_v16 = vld [vmem:[#allocation14_spill] sm:$0xff]  ;;  %v9816_v27 = vld [vmem:[#allocation15_spill] sm:$0xff] }
 0x4d6   :  { %3295 = vmatprep.subr.mxu0 %v7957_v47  ;;  %3366 = vmatprep.subr.mxu1 %v7962_v32  ;;  %v9817_v47 = vld [vmem:[#allocation16_spill] sm:$0xff]  ;;  %v9818_v32 = vld [vmem:[#allocation17_spill] sm:$0xff] }
 0x4d7   :  { %3296 = vmatpush1.msra.mxu0 %v7969_v35  ;;  %3367 = vmatpush1.msra.mxu1 %v7974_v36  ;;  %v9819_v35 = vld [vmem:[#allocation18_spill] sm:$0xff]  ;;  %v9820_v36 = vld [vmem:[#allocation19_spill] sm:$0xff] }
 0x4d8   :  { %3297 = vmatprep.subr.mxu0 %v7981_v44  ;;  %3368 = vmatprep.subr.mxu1 %v7986_v12  ;;  %v9821_v44 = vld [vmem:[#allocation20_spill] sm:$0xff]  ;;  %v9822_v12 = vld [vmem:[#allocation21_spill] sm:$0xff] }
 0x4d9   :  { %3298 = vmatpush1.msra.mxu0 %v7993_v18  ;;  %3369 = vmatpush1.msra.mxu1 %v7998_v19  ;;  %v9823_v18 = vld [vmem:[#allocation22_spill] sm:$0xff]  ;;  %v9824_v19 = vld [vmem:[#allocation23_spill] sm:$0xff] }
 0x4da   :  { %3299 = vmatprep.subr.mxu0 %v9803_v55  ;;  %3370 = vmatprep.subr.mxu1 %v9804_v52 }
 0x4db   :  { %3300 = vmatpush1.msra.mxu0 %v9805_v45  ;;  %3371 = vmatpush1.msra.mxu1 %v9806_v23  ;;  %v5278_v45 = vld [vmem:[%s9548_s0 + $0x4] ss:$8 sm:$0xf] }
 0x4dc   :  { %3301 = vmatprep.subr.mxu0 %v9807_v28  ;;  %3372 = vmatprep.subr.mxu1 %v9808_v39  ;;  %v5279_v23 = vld [vmem:[%s9548_s0 + $0x24] ss:$8 sm:$0xf] }
 0x4dd   :  { %3302 = vmatpush1.msra.mxu0 %v9809_v46  ;;  %3373 = vmatpush1.msra.mxu1 %v9810_v13  ;;  %v5280_v28 = vld [vmem:[%s9548_s0 + $0x44] ss:$8 sm:$0xf] }
 0x4de   :  { %3303 = vmatprep.subr.mxu0 %v9811_v11  ;;  %3374 = vmatprep.subr.mxu1 %v9812_v14  ;;  %v5282_v39 = vld [vmem:[%s9548_s0 + $0x84] ss:$8 sm:$0xf] }
 0x4df   :  { %3304 = vmatpush1.msra.mxu0 %v9813_v15  ;;  %3375 = vmatpush1.msra.mxu1 %v9814_v43  ;;  %v5281_v15 = vld [vmem:[%s9548_s0 + $0x64] ss:$8 sm:$0xf] }
 0x4e0   :  { %3305 = vmatprep.subr.mxu0 %v9815_v16  ;;  %3376 = vmatprep.subr.mxu1 %v9816_v27  ;;  %v5283_v43 = vld [vmem:[%s9548_s0 + $0xa4] ss:$8 sm:$0xf] }
 0x4e1   :  { %3306 = vmatpush1.msra.mxu0 %v9817_v47  ;;  %3377 = vmatpush1.msra.mxu1 %v9818_v32  ;;  %v5284_v16 = vld [vmem:[%s9548_s0 + $0xc4] ss:$8 sm:$0xf] }
 0x4e2   :  { %3307 = vmatprep.subr.mxu0 %v9819_v35  ;;  %3378 = vmatprep.subr.mxu1 %v9820_v36  ;;  %v5285_v36 = vld [vmem:[%s9548_s0 + $0xe4] ss:$8 sm:$0xf] }
 0x4e3   :  { %3308 = vmatpush1.msra.mxu0 %v9821_v44  ;;  %3379 = vmatpush1.msra.mxu1 %v9822_v12 }
 0x4e4   :  { %3309 = vmatprep.subr.mxu0 %v9823_v18  ;;  %3380 = vmatprep.subr.mxu1 %v9824_v19 }
 0x4e5   :  { %3310 = vmatpush1.msra.mxu0 %v9825_v25  ;;  %3381 = vmatpush1.msra.mxu1 %v9826_v48 }
 0x4e6   :  { %3311 = vmatprep.subr.mxu0 %v9827_v40  ;;  %3382 = vmatprep.subr.mxu1 %v9828_v0 }
 0x4e7   :  { %3312 = vmatpush1.msra.mxu0 %v9829_v58  ;;  %3383 = vmatpush1.msra.mxu1 %v9830_v38 }
 0x4e8   :  { %3313 = vmatprep.subr.mxu0 %v9831_v50  ;;  %3384 = vmatprep.subr.mxu1 %v9832_v42 }
 0x4e9   :  { %3314 = vmatpush1.msra.mxu0 %v9833_v51  ;;  %3385 = vmatpush1.msra.mxu1 %v9834_v8 }
 0x4ea   :  { %3315 = vmatprep.subr.mxu0 %v9835_v1  ;;  %3386 = vmatprep.subr.mxu1 %v9836_v61 }
 0x4eb   :  { %3316 = vmatpush1.msra.mxu0 %v9837_v29  ;;  %3387 = vmatpush1.msra.mxu1 %v9838_v59 }
 0x4ec   :  { %3317 = vmatprep.subr.mxu0 %v9839_v5  ;;  %3388 = vmatprep.subr.mxu1 %v9840_v30 }
 0x4ed   :  { %3318 = vmatpush1.msra.mxu0 %v9841_v60  ;;  %3351 = vmatprep.mubr.f32.mxu0 %v9842_v37 }
 0x4ee   :  { %3389 = vmatpush1.msra.mxu1 %v9843_v7  ;;  %3422 = vmatprep.mubr.f32.mxu1 %v9842_v37 }
 0x58e   :  { %v2729_v6 = vpop.f32.mrf.mxu0  ;;  %v2800_v9 = vpop.f32.mrf.mxu1 }
 0x590   :  { %v2731_v33 = vpop.f32.mrf.mxu0  ;;  %v2802_v49 = vpop.f32.mrf.mxu1 }
 0x591   :  { %v2809_v41 = vcombine.low %v2729_v6, %v2731_v33  ;;  %v2810_v4 = vcombine.high %v2729_v6, %v2731_v33  ;;  %v2811_v54 = vcombine.low %v2800_v9, %v2802_v49  ;;  %v2812_v53 = vcombine.high %v2800_v9, %v2802_v49 }
 0x593   :  { %v2819_v62 = vrot.slane %v2809_v41, %v6925_v10  ;;  %v2826_v17 = vrot.slane %v2810_v4, %v6925_v10  ;;  %v2833_v3 = vrot.slane %v2811_v54, %v6925_v10  ;;  %v2840_v26 = vrot.slane %v2812_v53, %v6925_v10 }
 0x595   :  { %v2841_v63 = vcombine.low %v2819_v62, %v2833_v3  ;;  %v2842_v57 = vcombine.high %v2819_v62, %v2833_v3  ;;  %v2843_v55 = vcombine.low %v2826_v17, %v2840_v26  ;;  %v2844_v52 = vcombine.high %v2826_v17, %v2840_v26 }
 0x597   :  { %v2851_v46 = vrot.slane %v2841_v63, %v6925_v10  ;;  %v2858_v13 = vrot.slane %v2843_v55, %v6925_v10  ;;  %v2865_v11 = vrot.slane %v2842_v57, %v6925_v10  ;;  %v2872_v14 = vrot.slane %v2844_v52, %v6925_v10 }
 0x599   :  { %v2873_v27 = vcombine.high %v2851_v46, %v2851_v46  ;;  %v2874_v47 = vcombine.high %v2858_v13, %v2858_v13  ;;  %v2875_v32 = vcombine.high %v2865_v11, %v2865_v11  ;;  %v2876_v35 = vcombine.high %v2872_v14, %v2872_v14 }
 0x59a   :  { %v8501_v44 = vadd.f32 %v5278_v45, %v2851_v46  ;;  %v8503_v12 = vadd.f32 %v5279_v23, %v2865_v11  ;;  %v8505_v18 = vadd.f32 %v5282_v39, %v2858_v13  ;;  %v8511_v48 = vadd.f32 %v5283_v43, %v2872_v14 }
 0x59b   :  { %v8507_v19 = vadd.f32 %v5280_v28, %v2873_v27  ;;  %v8509_v25 = vadd.f32 %v5281_v15, %v2875_v32  ;;  %v8513_v40 = vadd.f32 %v5284_v16, %v2874_v47  ;;  %v8517_v38 = vadd.f32 %v5285_v36, %v2876_v35 }
 0x59c   :  { %v5286_v0 = vmul.f32 -1.442695, %v8501_v44  ;;  %v5287_v58 = vmul.f32 -1.442695, %v8503_v12  ;;  %v5290_v51 = vmul.f32 -1.442695, %v8505_v18 }
 0x59d   :  { %v5288_v50 = vmul.f32 -1.442695, %v8507_v19  ;;  %v5289_v42 = vmul.f32 -1.442695, %v8509_v25  ;;  %v2949_v8 = vrot.slane %v8501_v44, 1  ;;  %v2950_v61 = vrot.slane %v8503_v12, 1 }
 0x59e   :  { %5921 = vpow2.f32 %v5286_v0  ;;  %v5291_v1 = vmul.f32 -1.442695, %v8511_v48  ;;  %v5292_v29 = vmul.f32 -1.442695, %v8513_v40  ;;  %v2951_v59 = vrot.slane %v8507_v19, 1 }
 0x59f   :  { %5923 = vpow2.f32 %v5287_v58  ;;  %v5293_v5 = vmul.f32 -1.442695, %v8517_v38  ;;  %v2952_v30 = vrot.slane %v8509_v25, 1  ;;  %v2953_v60 = vrot.slane %v8505_v18, 1 }
 0x5a0   :  { %5925 = vpow2.f32 %v5288_v50  ;;  %v5294_v7 = vmul.f32 -1.442695, %v2949_v8  ;;  %v2954_v6 = vrot.slane %v8511_v48, 1  ;;  %v5295_v9 = vmul.f32 -1.442695, %v2950_v61 }
 0x5a1   :  { %5927 = vpow2.f32 %v5289_v42  ;;  %v2955_v33 = vrot.slane %v8513_v40, 1  ;;  %v5296_v49 = vmul.f32 -1.442695, %v2951_v59  ;;  %v2956_v41 = vrot.slane %v8517_v38, 1 }
 0x5a2   :  { %5929 = vpow2.f32 %v5290_v51  ;;  %v5297_v4 = vmul.f32 -1.442695, %v2952_v30  ;;  %v5298_v54 = vmul.f32 -1.442695, %v2953_v60  ;;  %v5299_v53 = vmul.f32 -1.442695, %v2954_v6 }
 0x5a3   :  { %5931 = vpow2.f32 %v5291_v1  ;;  %v5300_v62 = vmul.f32 -1.442695, %v2955_v33  ;;  %v5301_v17 = vmul.f32 -1.442695, %v2956_v41  ;;  %v3013_v59 = vrot.slane %v8501_v44, 2 }
 0x5a4   :  { %5933 = vpow2.f32 %v5292_v29  ;;  %v3014_v60 = vrot.slane %v8503_v12, 2  ;;  %v3015_v6 = vrot.slane %v8507_v19, 2  ;;  %v3016_v33 = vrot.slane %v8509_v25, 2 }
 0x5a5   :  { %5935 = vpow2.f32 %v5293_v5  ;;  %v3017_v41 = vrot.slane %v8505_v18, 2 }
 0x5a6   :  { %5937 = vpow2.f32 %v5294_v7 }
 0x5a7   :  { %5939 = vpow2.f32 %v5295_v9 }
 0x5a8   :  { %5941 = vpow2.f32 %v5296_v49 }
 0x5a9   :  { %5943 = vpow2.f32 %v5297_v4  ;;  %v3037_v4 = vrot.slane %v8501_v44, 3  ;;  %v3040_v44 = vrot.slane %v8509_v25, 3  ;;  %v3044_v25 = vrot.slane %v8517_v38, 3 }
 0x5aa   :  { %5945 = vpow2.f32 %v5298_v54 }
 0x5ab   :  { %v5922_v3 = vpop.eup %5921  ;;  %5947 = vpow2.f32 %v5299_v53  ;;  %v3018_v53 = vrot.slane %v8511_v48, 2 }
 0x5ac   :  { %v5924_v26 = vpop.eup %5923  ;;  %v2917_v63 = vadd.f32 1.0, %v5922_v3  ;;  %5949 = vpow2.f32 %v5300_v62  ;;  %v3038_v62 = vrot.slane %v8503_v12, 3  ;;  %v3019_v3 = vrot.slane %v8513_v40, 2 }
 0x5ad   :  { %v5926_v57 = vpop.eup %5925  ;;  %v2918_v55 = vadd.f32 1.0, %v5924_v26  ;;  %5951 = vpow2.f32 %v5301_v17  ;;  %v3039_v26 = vrot.slane %v8507_v19, 3  ;;  %v5302_v12 = vmul.f32 -1.442695, %v3037_v4 }
 0x5ae   :  { %v5928_v52 = vpop.eup %5927  ;;  %v2919_v45 = vadd.f32 1.0, %v5926_v57  ;;  %5953 = vrcp.f32 %v2917_v63  ;;  %v3020_v57 = vrot.slane %v8517_v38, 2  ;;  %v3043_v19 = vrot.slane %v8513_v40, 3 }
 0x5af   :  { %v5930_v23 = vpop.eup %5929  ;;  %v2920_v28 = vadd.f32 1.0, %v5928_v52  ;;  %5955 = vrcp.f32 %v2918_v55  ;;  %v3041_v52 = vrot.slane %v8505_v18, 3 }
 0x5b0   :  { %v5932_v39 = vpop.eup %5931  ;;  %v2921_v46 = vadd.f32 1.0, %v5930_v23  ;;  %5957 = vrcp.f32 %v2919_v45  ;;  %v3042_v23 = vrot.slane %v8511_v48, 3  ;;  %v5308_v48 = vmul.f32 -1.442695, %v3043_v19 }
 0x5b1   :  { %v5934_v13 = vpop.eup %5933  ;;  %v2922_v11 = vadd.f32 1.0, %v5932_v39  ;;  %5959 = vrcp.f32 %v2920_v28  ;;  %v5303_v28 = vmul.f32 -1.442695, %v3038_v62 }
 0x5b2   :  { %v5936_v14 = vpop.eup %5935  ;;  %v2923_v15 = vadd.f32 1.0, %v5934_v13  ;;  %5961 = vrcp.f32 %v2921_v46  ;;  %v5304_v46 = vmul.f32 -1.442695, %v3039_v26 }
 0x5b3   :  { %v5938_v43 = vpop.eup %5937  ;;  %v2924_v16 = vadd.f32 1.0, %v5936_v14  ;;  %5963 = vrcp.f32 %v2922_v11  ;;  %v5305_v11 = vmul.f32 -1.442695, %v3040_v44 }
 0x5b4   :  { %v5940_v27 = vpop.eup %5939  ;;  %5965 = vrcp.f32 %v2923_v15  ;;  %v2989_v47 = vadd.f32 1.0, %v5938_v43  ;;  %v5306_v15 = vmul.f32 -1.442695, %v3041_v52  ;;  %v5307_v43 = vmul.f32 -1.442695, %v3042_v23 }
 0x5b5   :  { %v5942_v32 = vpop.eup %5941  ;;  %5967 = vrcp.f32 %v2924_v16  ;;  %v2990_v35 = vadd.f32 1.0, %v5940_v27 }
 0x5b6   :  { %v5944_v36 = vpop.eup %5943  ;;  %v2991_v0 = vadd.f32 1.0, %v5942_v32  ;;  %5969 = vrcp.f32 %v2989_v47  ;;  %v5309_v47 = vmul.f32 -1.442695, %v3044_v25 }
 0x5b7   :  { %v5946_v58 = vpop.eup %5945  ;;  %v2992_v50 = vadd.f32 1.0, %v5944_v36  ;;  %5971 = vrcp.f32 %v2990_v35 }
 0x5b8   :  { %v5948_v42 = vpop.eup %5947  ;;  %v2993_v51 = vadd.f32 1.0, %v5946_v58  ;;  %5973 = vrcp.f32 %v2991_v0 }
 0x5b9   :  { %v5950_v8 = vpop.eup %5949  ;;  %v2994_v1 = vadd.f32 1.0, %v5948_v42  ;;  %5975 = vrcp.f32 %v2992_v50 }
 0x5ba   :  { %v5952_v61 = vpop.eup %5951  ;;  %v2995_v29 = vadd.f32 1.0, %v5950_v8  ;;  %5977 = vrcp.f32 %v2993_v51 }
 0x5bb   :  { %v5954_v5 = vpop.eup %5953  ;;  %v2996_v30 = vadd.f32 1.0, %v5952_v61  ;;  %5979 = vrcp.f32 %v2994_v1 }
 0x5bc   :  { %v5956_v7 = vpop.eup %5955  ;;  %5981 = vrcp.f32 %v2995_v29 }
 0x5bd   :  { %v5958_v9 = vpop.eup %5957  ;;  %5983 = vrcp.f32 %v2996_v30 }
 0x5be   :  { %v8537_v49 = vpop.eup %5959  ;;  %5985 = vtanh.f32 %v3013_v59 }
 0x5bf   :  { %v8541_v54 = vpop.eup %5961  ;;  %5987 = vtanh.f32 %v3014_v60 }
 0x5c0   :  { %v8545_v17 = vpop.eup %5963  ;;  %5989 = vtanh.f32 %v3015_v6 }
 0x5c1   :  { %v8549_v63 = vpop.eup %5965  ;;  %5991 = vtanh.f32 %v3016_v33 }
 0x5c2   :  { %v8553_v55 = vpop.eup %5967  ;;  %5993 = vtanh.f32 %v3017_v41 }
 0x5c3   :  { %v5970_v45 = vpop.eup %5969  ;;  %5995 = vtanh.f32 %v3018_v53 }
 0x5c4   :  { %v5972_v39 = vpop.eup %5971  ;;  %5997 = vtanh.f32 %v3019_v3  ;;  %v3101_v40 = vmul.f32 %v5970_v45, %v8343_v2 }
 0x5c5   :  { %v5974_v13 = vpop.eup %5973  ;;  %5999 = vtanh.f32 %v3020_v57  ;;  %v3102_v38 = vmul.f32 %v5972_v39, %v8347_v21 }
 0x5c6   :  { %v5976_v14 = vpop.eup %5975  ;;  %6001 = vpow2.f32 %v5302_v12  ;;  %v3103_v58 = vmul.f32 %v5974_v13, %v8350_v20 }
 0x5c7   :  { %v5978_v18 = vpop.eup %5977  ;;  %6003 = vpow2.f32 %v5303_v28  ;;  %v3104_v51 = vmul.f32 %v5976_v14, %v8354_v34 }
 0x5c8   :  { %v5980_v16 = vpop.eup %5979  ;;  %6005 = vpow2.f32 %v5304_v46  ;;  %v3105_v61 = vmul.f32 %v5978_v18, %v8357_v31 }
 0x5c9   :  { %v5982_v27 = vpop.eup %5981  ;;  %6007 = vpow2.f32 %v5305_v11  ;;  %v3106_v21 = vmul.f32 %v5980_v16, %v8360_v24 }
 0x5ca   :  { %v5984_v32 = vpop.eup %5983  ;;  %6009 = vpow2.f32 %v5306_v15 }
 0x5cb   :  { %v5986_v35 = vpop.eup %5985  ;;  %6011 = vpow2.f32 %v5307_v43  ;;  %v3108_v57 = vmul.f32 %v5984_v32, %v8371_v22 }
 0x5cc   :  { %v5988_v36 = vpop.eup %5987  ;;  %6013 = vpow2.f32 %v5308_v48  ;;  %v3109_v0 = vmul.f32 %v5986_v35, %v5954_v5 }
 0x5cd   :  { %v5990_v50 = vpop.eup %5989  ;;  %6015 = vpow2.f32 %v5309_v47  ;;  %v3110_v42 = vmul.f32 %v5988_v36, %v5956_v7 }
 0x5ce   :  { %v5992_v8 = vpop.eup %5991  ;;  %v3111_v1 = vmul.f32 %v5990_v50, %v5958_v9  ;;  %v8564_v29 = vadd.f32 %v3109_v0, %v3101_v40 }
 0x5cf   :  { %v5994_v2 = vpop.eup %5993  ;;  %v3112_v59 = vmul.f32 %v5992_v8, %v8537_v49  ;;  %v8568_v30 = vadd.f32 %v3110_v42, %v3102_v38 }
 0x5d0   :  { %v5996_v5 = vpop.eup %5995  ;;  %v3113_v20 = vmul.f32 %v5994_v2, %v8541_v54  ;;  %v8571_v60 = vadd.f32 %v3111_v1, %v3103_v58  ;;  %6017 = vtanh.f32 %v8564_v29 }
 0x5d1   :  { %v5998_v34 = vpop.eup %5997  ;;  %v3114_v7 = vmul.f32 %v5996_v5, %v8545_v17  ;;  %v8575_v31 = vadd.f32 %v3112_v59, %v3104_v51  ;;  %6019 = vtanh.f32 %v8568_v30  ;;  %v3107_v17 = vmul.f32 %v5982_v27, %v8369_v56 }
 0x5d2   :  { %v6000_v6 = vpop.eup %5999  ;;  %v8578_v9 = vadd.f32 %v3113_v20, %v3105_v61  ;;  %6021 = vtanh.f32 %v8571_v60  ;;  %v3115_v12 = vmul.f32 %v5998_v34, %v8549_v63 }
 0x5d3   :  { %v6002_v24 = vpop.eup %6001  ;;  %v8581_v33 = vadd.f32 %v3114_v7, %v3106_v21  ;;  %6023 = vtanh.f32 %v8575_v31  ;;  %v3116_v28 = vmul.f32 %v6000_v6, %v8553_v55 }
 0x5d4   :  { %v6004_v49 = vpop.eup %6003  ;;  %v3077_v41 = vadd.f32 1.0, %v6002_v24  ;;  %6025 = vtanh.f32 %v8578_v9  ;;  %v8590_v46 = vadd.f32 %v3115_v12, %v3107_v17  ;;  %v8653_v17 = vld [vmem:[%s9546_s1 + $0x1c8] sm:$0xff]  ;;  %v8687_v12 = vld [vmem:[%s9546_s1 + $0x1a0] sm:$0xff] }
 0x5d5   :  { %v6006_v4 = vpop.eup %6005  ;;  %v3078_v54 = vadd.f32 1.0, %v6004_v49  ;;  %6027 = vtanh.f32 %v8581_v33  ;;  %v8592_v13 = vadd.f32 %v3116_v28, %v3108_v57  ;;  %v8670_v57 = vld [vmem:[%s9546_s1 + $0x1d0] sm:$0xff]  ;;  %v8704_v28 = vld [vmem:[%s9546_s1 + $0x198] sm:$0xff] }
 0x5d6   :  { %v6008_v53 = vpop.eup %6007  ;;  %v3079_v62 = vadd.f32 1.0, %v6006_v4  ;;  %6029 = vrcp.f32 %v3077_v41  ;;  %v8631_v4 = vld [vmem:[%s9546_s1 + $0x1e8] sm:$0xff] }
 0x5d7   :  { %v6010_v3 = vpop.eup %6009  ;;  %v3080_v26 = vadd.f32 1.0, %v6008_v53  ;;  %6031 = vrcp.f32 %v3078_v54  ;;  %v8636_v54 = vld [vmem:[%s9546_s1 + $0x1f8] sm:$0xff]  ;;  %v8641_v53 = vld [vmem:[%s9546_s1 + $0x1e0] sm:$0xff]  ;;  %3911 = vmatprep.subr.mxu0 %v8631_v4 }
 0x5d8   :  { %v6012_v44 = vpop.eup %6011  ;;  %v3081_v52 = vadd.f32 1.0, %v6010_v3  ;;  %6033 = vrcp.f32 %v3079_v62  ;;  %3982 = vmatprep.subr.mxu1 %v8636_v54  ;;  %v8648_v62 = vld [vmem:[%s9546_s1 + $0x1f0] sm:$0xff]  ;;  %v8658_v3 = vld [vmem:[%s9546_s1 + $0x1d8] sm:$0xff] }
 0x5d9   :  { %v6014_v45 = vpop.eup %6013  ;;  %v3082_v23 = vadd.f32 1.0, %v6012_v44  ;;  %6035 = vrcp.f32 %v3080_v26  ;;  %v8665_v26 = vld [vmem:[%s9546_s1 + $0x1c0] sm:$0xff]  ;;  %v8675_v44 = vld [vmem:[%s9546_s1 + $0x1a8] sm:$0xff] }
 0x5da   :  { %v6016_v39 = vpop.eup %6015  ;;  %v3083_v19 = vadd.f32 1.0, %v6014_v45  ;;  %6037 = vrcp.f32 %v3081_v52  ;;  %v8682_v52 = vld [vmem:[%s9546_s1 + $0x1b8] sm:$0xff]  ;;  %v8692_v45 = vld [vmem:[%s9546_s1 + $0x1b0] sm:$0xff] }
 0x5db   :  { %v3084_v56 = vadd.f32 1.0, %v6016_v39  ;;  %6039 = vrcp.f32 %v3082_v23  ;;  %v8699_v23 = vld [vmem:[%s9546_s1 + $0x188] sm:$0xff]  ;;  %v8711_v39 = vld [vmem:[%s9546_s1 + $0x180] sm:$0xff] }
 0x5dc   :  { %6041 = vrcp.f32 %v3083_v19  ;;  %v8716_v19 = vld [vmem:[%s9546_s1 + $0x190] sm:$0xff] }
 0x5dd   :  { %v6018_v22 = vpop.eup %6017  ;;  %6043 = vrcp.f32 %v3084_v56  ;;  %v8723_v56 = vld [vmem:[%s9546_s1 + $0x168] sm:$0xff] }
 0x5de   :  { %v6020_v25 = vpop.eup %6019  ;;  %6045 = vtanh.f32 %v8590_v46 }
 0x5df   :  { %v6022_v63 = vpop.eup %6021  ;;  %6047 = vtanh.f32 %v8592_v13 }
 0x5e0   :  { %v6024_v11 = vpop.eup %6023 }
 0x5e1   :  { %v6026_v55 = vpop.eup %6025 }
 0x5e2   :  { %v6028_v14 = vpop.eup %6027 }
 0x5e3   :  { %v6030_v15 = vpop.eup %6029 }
 0x5e4   :  { %v6032_v18 = vpop.eup %6031  ;;  %v3133_v43 = vmul.f32 %v6030_v15, %v6018_v22  ;;  %v8728_v22 = vld [vmem:[%s9546_s1 + $0x178] sm:$0xff]  ;;  %v8764_v15 = vld [vmem:[%s9546_s1 + $0x150] sm:$0xff] }
 0x5e5   :  { %v6034_v16 = vpop.eup %6033  ;;  %v3134_v48 = vmul.f32 %v6032_v18, %v6020_v25  ;;  %v8735_v25 = vld [vmem:[%s9546_s1 + $0x160] sm:$0xff]  ;;  %v8771_v18 = vld [vmem:[%s9546_s1 + $0x128] sm:$0xff] }
 0x5e6   :  { %v6036_v27 = vpop.eup %6035  ;;  %v3135_v47 = vmul.f32 %v6034_v16, %v6022_v63  ;;  %3141 = vst [vmem:[%s9550_s4 + $0x4] sm:$0x1] %v3133_v43  ;;  %v8740_v63 = vld [vmem:[%s9546_s1 + $0x170] sm:$0xff]  ;;  %9844 = vst [vmem:[#allocation2_spill] sm:$0xff] %v8771_v18  ;;  %v8783_v16 = vld [vmem:[%s9546_s1 + $0x120] sm:$0xff] }
 0x5e7   :  { %v6038_v32 = vpop.eup %6037  ;;  %v3136_v40 = vmul.f32 %v6036_v27, %v6024_v11  ;;  %3142 = vst [vmem:[%s9550_s4 + $0xc] sm:$0x1] %v3134_v48  ;;  %v3237_v58 = vcombine.low %v3133_v43, %v3134_v48  ;;  %v8747_v11 = vld [vmem:[%s9546_s1 + $0x148] sm:$0xff]  ;;  %v8776_v43 = vld [vmem:[%s9546_s1 + $0x138] sm:$0xff]  ;;  %9846 = vst [vmem:[#allocation4_spill] sm:$0xff] %v8783_v16 }
 0x5e8   :  { %v6040_v35 = vpop.eup %6039  ;;  %v3137_v38 = vmul.f32 %v6038_v32, %v6026_v55  ;;  %3143 = vst [vmem:[%s9550_s4 + $0x14] sm:$0x1] %v3135_v47  ;;  %v8752_v55 = vld [vmem:[%s9546_s1 + $0x158] sm:$0xff]  ;;  %9845 = vst [vmem:[#allocation3_spill] sm:$0xff] %v8776_v43  ;;  %v8788_v48 = vld [vmem:[%s9546_s1 + $0x130] sm:$0xff] }
 0x5e9   :  { %v6042_v36 = vpop.eup %6041  ;;  %v3138_v0 = vmul.f32 %v6040_v35, %v6028_v14  ;;  %3144 = vst [vmem:[%s9550_s4 + $0x1c] sm:$0x1] %v3136_v40  ;;  %v3238_v50 = vcombine.low %v3135_v47, %v3136_v40  ;;  %v3247_v21 = vrot.slane %v3237_v58, %v6925_v10  ;;  %v8759_v14 = vld [vmem:[%s9546_s1 + $0x140] sm:$0xff]  ;;  %9847 = vst [vmem:[#allocation5_spill] sm:$0xff] %v8788_v48  ;;  %v8795_v27 = vld [vmem:[%s9546_s1 + $0x108] sm:$0xff] }
 0x5ea   :  { %v6044_v42 = vpop.eup %6043  ;;  %3145 = vst [vmem:[%s9550_s4 + $0x24] sm:$0x1] %v3137_v38  ;;  %9848 = vst [vmem:[#allocation6_spill] sm:$0xff] %v8795_v27  ;;  %v8800_v47 = vld [vmem:[%s9546_s1 + $0x118] sm:$0xff]  ;;  %v8807_v32 = vld [vmem:[%s9546_s1 + $0x100] sm:$0xff] }
 0x5eb   :  { %v6046_v51 = vpop.eup %6045  ;;  %3146 = vst [vmem:[%s9550_s4 + $0x2c] sm:$0x1] %v3138_v0  ;;  %v3254_v8 = vrot.slane %v3238_v50, %v6925_v10  ;;  %v3239_v59 = vcombine.low %v3137_v38, %v3138_v0  ;;  %9849 = vst [vmem:[#allocation7_spill] sm:$0xff] %v8800_v47  ;;  %v8812_v40 = vld [vmem:[%s9546_s1 + $0x110] sm:$0xff]  ;;  %v8819_v35 = vld [vmem:[%s9546_s1 + $0xe8] sm:$0xff] }
 0x5ec   :  { %v6048_v1 = vpop.eup %6047  ;;  %v3139_v61 = vmul.f32 %v6046_v51, %v6042_v36  ;;  %9850 = vst [vmem:[#allocation8_spill] sm:$0xff] %v8807_v32  ;;  %9851 = vst [vmem:[#allocation9_spill] sm:$0xff] %v8812_v40  ;;  %v8824_v38 = vld [vmem:[%s9546_s1 + $0xf8] sm:$0xff]  ;;  %v8831_v36 = vld [vmem:[%s9546_s1 + $0xe0] sm:$0xff] }
 0x5ed   :  { %v3140_v2 = vmul.f32 %v6048_v1, %v6044_v42  ;;  %v3269_v20 = vcombine.low %v3247_v21, %v3254_v8  ;;  %v3261_v34 = vrot.slane %v3239_v59, %v6925_v10  ;;  %9852 = vst [vmem:[#allocation10_spill] sm:$0xff] %v8819_v35  ;;  %9853 = vst [vmem:[#allocation11_spill] sm:$0xff] %v8824_v38  ;;  %v8836_v0 = vld [vmem:[%s9546_s1 + $0xf0] sm:$0xff]  ;;  %v8843_v58 = vld [vmem:[%s9546_s1 + $0xc8] sm:$0xff] }
 0x5ee   :  { %3147 = vst [vmem:[%s9550_s4 + $0x34] sm:$0x1] %v3139_v61  ;;  %9854 = vst [vmem:[#allocation12_spill] sm:$0xff] %v8831_v36  ;;  %v8848_v50 = vld [vmem:[%s9546_s1 + $0xd8] sm:$0xff]  ;;  %v8855_v42 = vld [vmem:[%s9546_s1 + $0xc0] sm:$0xff] }
 0x5ef   :  { %3148 = vst [vmem:[%s9550_s4 + $0x3c] sm:$0x1] %v3140_v2  ;;  %v3240_v5 = vcombine.low %v3139_v61, %v3140_v2  ;;  %v3277_v24 = vrot.slane %v3269_v20, %v6925_v10  ;;  %9855 = vst [vmem:[#allocation13_spill] sm:$0xff] %v8836_v0  ;;  %v8860_v51 = vld [vmem:[%s9546_s1 + $0xd0] sm:$0xff]  ;;  %v8867_v8 = vld [vmem:[%s9546_s1 + $0xa8] sm:$0xff] }
 0x5f0   :  { %9856 = vst [vmem:[#allocation14_spill] sm:$0xff] %v8843_v58  ;;  %9857 = vst [vmem:[#allocation15_spill] sm:$0xff] %v8848_v50  ;;  %v8872_v1 = vld [vmem:[%s9546_s1 + $0xb8] sm:$0xff]  ;;  %v8879_v61 = vld [vmem:[%s9546_s1 + $0xa0] sm:$0xff] }
 0x5f1   :  { %v3268_v7 = vrot.slane %v3240_v5, %v6925_v10  ;;  %9858 = vst [vmem:[#allocation16_spill] sm:$0xff] %v8855_v42  ;;  %9859 = vst [vmem:[#allocation17_spill] sm:$0xff] %v8860_v51  ;;  %v8884_v2 = vld [vmem:[%s9546_s1 + $0xb0] sm:$0xff]  ;;  %v8891_v59 = vld [vmem:[%s9546_s1 + $0x88] sm:$0xff] }
 0x5f2   :  { %9860 = vst [vmem:[#allocation18_spill] sm:$0xff] %v8867_v8  ;;  %9861 = vst [vmem:[#allocation19_spill] sm:$0xff] %v8872_v1  ;;  %v8896_v21 = vld [vmem:[%s9546_s1 + $0x98] sm:$0xff]  ;;  %v8903_v5 = vld [vmem:[%s9546_s1 + $0x80] sm:$0xff] }
 0x5f3   :  { %v3270_v6 = vcombine.low %v3261_v34, %v3268_v7  ;;  %9862 = vst [vmem:[#allocation20_spill] sm:$0xff] %v8879_v61  ;;  %9863 = vst [vmem:[#allocation21_spill] sm:$0xff] %v8884_v2  ;;  %v8908_v20 = vld [vmem:[%s9546_s1 + $0x90] sm:$0xff]  ;;  %v8915_v34 = vld [vmem:[%s9546_s1 + $0x68] sm:$0xff] }
 0x5f4   :  { %9864 = vst [vmem:[#allocation22_spill] sm:$0xff] %v8891_v59  ;;  %9865 = vst [vmem:[#allocation23_spill] sm:$0xff] %v8896_v21  ;;  %v8920_v7 = vld [vmem:[%s9546_s1 + $0x78] sm:$0xff] }
 0x5f5   :  { %v3284_v49 = vrot.slane %v3270_v6, %v6925_v10  ;;  %9866 = vst [vmem:[#allocation24_spill] sm:$0xff] %v8903_v5  ;;  %9867 = vst [vmem:[#allocation25_spill] sm:$0xff] %v8908_v20  ;;  %v8927_v6 = vld [vmem:[%s9546_s1 + $0x60] sm:$0xff] }
 0x5f6   :  { %9868 = vst [vmem:[#allocation26_spill] sm:$0xff] %v8915_v34  ;;  %9869 = vst [vmem:[#allocation27_spill] sm:$0xff] %v8920_v7 }
 0x5f7   :  { %v3285_v41 = vcombine.low %v3277_v24, %v3284_v49  ;;  %9870 = vst [vmem:[#allocation28_spill] sm:$0xff] %v8927_v6  ;;  %v8932_v24 = vld [vmem:[%s9546_s1 + $0x70] sm:$0xff]  ;;  %v8939_v49 = vld [vmem:[%s9546_s1 + $0x48] sm:$0xff] }
 0x5f8   :  { %9871 = vst [vmem:[#allocation29_spill] sm:$0xff] %v8932_v24  ;;  %9872 = vst [vmem:[#allocation30_spill] sm:$0xff] %v8939_v49 }
 0x5f9   :  { %3352 = vmatmul.mubr.f32.vlgmr.msra.gmra.mxu0 %v3285_v41  ;;  %3423 = vmatmul.mubr.f32.vlgmr.msra.gmra.mxu1 %v3285_v41  ;;  %v8944_v41 = vld [vmem:[%s9546_s1 + $0x58] sm:$0xff] }
 0x5fa   :  { %3975 = vmatprep.mubr.f32.mxu0 %v9842_v37  ;;  %4046 = vmatprep.mubr.f32.mxu1 %v9842_v37  ;;  %9873 = vst [vmem:[#allocation31_spill] sm:$0xff] %v8944_v41  ;;  %v8951_v37 = vld [vmem:[%s9546_s1 + $0x40] sm:$0xff] }
 0x5fb   :  { %3912 = vmatpush1.msra.mxu0 %v8641_v53  ;;  %3983 = vmatpush1.msra.mxu1 %v8648_v62  ;;  %9874 = vst [vmem:[#allocation32_spill] sm:$0xff] %v8951_v37 }
 0x5fc   :  { %3913 = vmatprep.subr.mxu0 %v8653_v17  ;;  %3984 = vmatprep.subr.mxu1 %v8658_v3 }
 0x5fd   :  { %3914 = vmatpush1.msra.mxu0 %v8665_v26  ;;  %3985 = vmatpush1.msra.mxu1 %v8670_v57 }
 0x5fe   :  { %3915 = vmatprep.subr.mxu0 %v8675_v44  ;;  %3986 = vmatprep.subr.mxu1 %v8682_v52 }
 0x5ff   :  { %3916 = vmatpush1.msra.mxu0 %v8687_v12  ;;  %3987 = vmatpush1.msra.mxu1 %v8692_v45 }
 0x600   :  { %3917 = vmatprep.subr.mxu0 %v8699_v23  ;;  %3988 = vmatprep.subr.mxu1 %v8704_v28 }
 0x601   :  { %3918 = vmatpush1.msra.mxu0 %v8711_v39  ;;  %3989 = vmatpush1.msra.mxu1 %v8716_v19 }
 0x602   :  { %3919 = vmatprep.subr.mxu0 %v8723_v56  ;;  %3990 = vmatprep.subr.mxu1 %v8728_v22 }
 0x603   :  { %3920 = vmatpush1.msra.mxu0 %v8735_v25  ;;  %3991 = vmatpush1.msra.mxu1 %v8740_v63 }
 0x604   :  { %3921 = vmatprep.subr.mxu0 %v8747_v11  ;;  %3992 = vmatprep.subr.mxu1 %v8752_v55 }
 0x605   :  { %3922 = vmatpush1.msra.mxu0 %v8759_v14  ;;  %3993 = vmatpush1.msra.mxu1 %v8764_v15 }
 0x606   :  { %3923 = vmatprep.subr.mxu0 %v8771_v18  ;;  %3994 = vmatprep.subr.mxu1 %v8776_v43 }
 0x607   :  { %3924 = vmatpush1.msra.mxu0 %v8783_v16  ;;  %3995 = vmatpush1.msra.mxu1 %v8788_v48 }
 0x608   :  { %3925 = vmatprep.subr.mxu0 %v8795_v27  ;;  %3996 = vmatprep.subr.mxu1 %v8800_v47 }
 0x609   :  { %3926 = vmatpush1.msra.mxu0 %v8807_v32  ;;  %3997 = vmatpush1.msra.mxu1 %v8812_v40 }
 0x60a   :  { %3927 = vmatprep.subr.mxu0 %v8819_v35  ;;  %3998 = vmatprep.subr.mxu1 %v8824_v38 }
 0x60b   :  { %3928 = vmatpush1.msra.mxu0 %v8831_v36  ;;  %3999 = vmatpush1.msra.mxu1 %v8836_v0 }
 0x60c   :  { %3929 = vmatprep.subr.mxu0 %v8843_v58  ;;  %4000 = vmatprep.subr.mxu1 %v8848_v50 }
 0x60d   :  { %3930 = vmatpush1.msra.mxu0 %v8855_v42  ;;  %4001 = vmatpush1.msra.mxu1 %v8860_v51 }
 0x60e   :  { %3931 = vmatprep.subr.mxu0 %v8867_v8  ;;  %4002 = vmatprep.subr.mxu1 %v8872_v1  ;;  %v5310_v8 = vld [vmem:[%s9548_s0 + $0x5] ss:$8 sm:$0xf] }
 0x60f   :  { %3932 = vmatpush1.msra.mxu0 %v8879_v61  ;;  %4003 = vmatpush1.msra.mxu1 %v8884_v2 }
 0x610   :  { %3933 = vmatprep.subr.mxu0 %v8891_v59  ;;  %4004 = vmatprep.subr.mxu1 %v8896_v21 }
 0x611   :  { %3934 = vmatpush1.msra.mxu0 %v8903_v5  ;;  %4005 = vmatpush1.msra.mxu1 %v8908_v20  ;;  %v8956_v20 = vld [vmem:[%s9546_s1 + $0x50] sm:$0xff] }
 0x612   :  { %3935 = vmatprep.subr.mxu0 %v8915_v34  ;;  %4006 = vmatprep.subr.mxu1 %v8920_v7  ;;  %9875 = vst [vmem:[#allocation33_spill] sm:$0xff] %v8956_v20  ;;  %v8963_v34 = vld [vmem:[%s9546_s1 + $0x28] sm:$0xff]  ;;  %v8968_v7 = vld [vmem:[%s9546_s1 + $0x38] sm:$0xff] }
 0x613   :  { %3936 = vmatpush1.msra.mxu0 %v8927_v6  ;;  %4007 = vmatpush1.msra.mxu1 %v8932_v24  ;;  %9876 = vst [vmem:[#allocation34_spill] sm:$0xff] %v8963_v34  ;;  %9877 = vst [vmem:[#allocation35_spill] sm:$0xff] %v8968_v7  ;;  %v8975_v6 = vld [vmem:[%s9546_s1 + $0x20] sm:$0xff]  ;;  %v8980_v24 = vld [vmem:[%s9546_s1 + $0x30] sm:$0xff] }
 0x614   :  { %3937 = vmatprep.subr.mxu0 %v8939_v49  ;;  %4008 = vmatprep.subr.mxu1 %v8944_v41  ;;  %9878 = vst [vmem:[#allocation36_spill] sm:$0xff] %v8975_v6  ;;  %9879 = vst [vmem:[#allocation37_spill] sm:$0xff] %v8980_v24  ;;  %v8987_v49 = vld [vmem:[%s9546_s1 + $0x8] sm:$0xff]  ;;  %v8992_v41 = vld [vmem:[%s9546_s1 + $0x18] sm:$0xff] }
 0x615   :  { %3938 = vmatpush1.msra.mxu0 %v8951_v37  ;;  %4009 = vmatpush1.msra.mxu1 %v8956_v20  ;;  %9880 = vst [vmem:[#allocation38_spill] sm:$0xff] %v8987_v49  ;;  %9881 = vst [vmem:[#allocation39_spill] sm:$0xff] %v8992_v41  ;;  %v8999_v37 = vld [vmem:[%s9546_s1] sm:$0xff]  ;;  %v9004_v20 = vld [vmem:[%s9546_s1 + $0x10] sm:$0xff] }
 0x616   :  { %3939 = vmatprep.subr.mxu0 %v8963_v34  ;;  %4010 = vmatprep.subr.mxu1 %v8968_v7  ;;  %9882 = vst [vmem:[#allocation40_spill] sm:$0xff] %v8999_v37  ;;  %9883 = vst [vmem:[#allocation41_spill] sm:$0xff] %v9004_v20 }
 0x617   :  { %3940 = vmatpush1.msra.mxu0 %v8975_v6  ;;  %4011 = vmatpush1.msra.mxu1 %v8980_v24 }
 0x618   :  { %3941 = vmatprep.subr.mxu0 %v8987_v49  ;;  %4012 = vmatprep.subr.mxu1 %v8992_v41 }
 0x619   :  { %3942 = vmatpush1.msra.mxu0 %v8999_v37  ;;  %4013 = vmatpush1.msra.mxu1 %v9004_v20 }
 0x61a   :  { %4535 = vmatprep.subr.mxu0 %v8631_v4  ;;  %4606 = vmatprep.subr.mxu1 %v8636_v54 }
 0x6b9   :  { %v3353_v7 = vpop.f32.mrf.mxu0  ;;  %v3424_v34 = vpop.f32.mrf.mxu1 }
 0x6bb   :  { %v3355_v5 = vpop.f32.mrf.mxu0  ;;  %v3426_v21 = vpop.f32.mrf.mxu1 }
 0x6bc   :  { %v3433_v59 = vcombine.low %v3353_v7, %v3355_v5  ;;  %v3434_v6 = vcombine.high %v3353_v7, %v3355_v5  ;;  %v3435_v2 = vcombine.low %v3424_v34, %v3426_v21  ;;  %v3436_v24 = vcombine.high %v3424_v34, %v3426_v21  ;;  %v5311_v21 = vld [vmem:[%s9548_s0 + $0x25] ss:$8 sm:$0xf] }
 0x6bd   :  { %v5313_v7 = vld [vmem:[%s9548_s0 + $0x65] ss:$8 sm:$0xf] }
 0x6be   :  { %v3443_v49 = vrot.slane %v3433_v59, %v6925_v10  ;;  %v3450_v41 = vrot.slane %v3434_v6, %v6925_v10  ;;  %v3457_v37 = vrot.slane %v3435_v2, %v6925_v10  ;;  %v3464_v20 = vrot.slane %v3436_v24, %v6925_v10  ;;  %v5312_v59 = vld [vmem:[%s9548_s0 + $0x45] ss:$8 sm:$0xf] }
 0x6bf   :  { %v5314_v2 = vld [vmem:[%s9548_s0 + $0x85] ss:$8 sm:$0xf] }
 0x6c0   :  { %v3465_v61 = vcombine.low %v3443_v49, %v3457_v37  ;;  %v3466_v4 = vcombine.high %v3443_v49, %v3457_v37  ;;  %v3467_v1 = vcombine.low %v3450_v41, %v3464_v20  ;;  %v3468_v54 = vcombine.high %v3450_v41, %v3464_v20  ;;  %v5315_v6 = vld [vmem:[%s9548_s0 + $0xa5] ss:$8 sm:$0xf] }
 0x6c1   :  { %v5316_v24 = vld [vmem:[%s9548_s0 + $0xc5] ss:$8 sm:$0xf] }
 0x6c2   :  { %v3475_v37 = vrot.slane %v3465_v61, %v6925_v10  ;;  %v3482_v5 = vrot.slane %v3467_v1, %v6925_v10  ;;  %v3489_v20 = vrot.slane %v3466_v4, %v6925_v10  ;;  %v3496_v34 = vrot.slane %v3468_v54, %v6925_v10  ;;  %v5317_v4 = vld [vmem:[%s9548_s0 + $0xe5] ss:$8 sm:$0xf] }
 0x6c4   :  { %v3497_v49 = vcombine.high %v3475_v37, %v3475_v37  ;;  %v3498_v61 = vcombine.high %v3482_v5, %v3482_v5  ;;  %v3499_v41 = vcombine.high %v3489_v20, %v3489_v20  ;;  %v3500_v1 = vcombine.high %v3496_v34, %v3496_v34 }
 0x6c5   :  { %v9046_v54 = vadd.f32 %v5310_v8, %v3475_v37  ;;  %v9048_v51 = vadd.f32 %v5311_v21, %v3489_v20  ;;  %v9050_v42 = vadd.f32 %v5314_v2, %v3482_v5  ;;  %v9056_v0 = vadd.f32 %v5315_v6, %v3496_v34 }
 0x6c6   :  { %v9052_v50 = vadd.f32 %v5312_v59, %v3497_v49  ;;  %v9054_v58 = vadd.f32 %v5313_v7, %v3499_v41  ;;  %v9058_v36 = vadd.f32 %v5316_v24, %v3498_v61  ;;  %v9062_v40 = vadd.f32 %v5317_v4, %v3500_v1 }
 0x6c7   :  { %v5318_v38 = vmul.f32 -1.442695, %v9046_v54  ;;  %v5319_v35 = vmul.f32 -1.442695, %v9048_v51  ;;  %v5322_v59 = vmul.f32 -1.442695, %v9050_v42 }
 0x6c8   :  { %v5320_v8 = vmul.f32 -1.442695, %v9052_v50  ;;  %v5321_v21 = vmul.f32 -1.442695, %v9054_v58  ;;  %v3573_v2 = vrot.slane %v9046_v54, 1  ;;  %v3574_v5 = vrot.slane %v9048_v51, 1 }
 0x6c9   :  { %6049 = vpow2.f32 %v5318_v38  ;;  %v5323_v37 = vmul.f32 -1.442695, %v9056_v0  ;;  %v5324_v20 = vmul.f32 -1.442695, %v9058_v36  ;;  %v3575_v34 = vrot.slane %v9052_v50, 1 }
 0x6ca   :  { %6051 = vpow2.f32 %v5319_v35  ;;  %v5325_v7 = vmul.f32 -1.442695, %v9062_v40  ;;  %v3576_v6 = vrot.slane %v9054_v58, 1  ;;  %v3577_v38 = vrot.slane %v9050_v42, 1 }
 0x6cb   :  { %6053 = vpow2.f32 %v5320_v8  ;;  %v5326_v24 = vmul.f32 -1.442695, %v3573_v2  ;;  %v3578_v35 = vrot.slane %v9056_v0, 1  ;;  %v5327_v49 = vmul.f32 -1.442695, %v3574_v5 }
 0x6cc   :  { %6055 = vpow2.f32 %v5321_v21  ;;  %v3579_v61 = vrot.slane %v9058_v36, 1  ;;  %v5328_v41 = vmul.f32 -1.442695, %v3575_v34  ;;  %v3580_v1 = vrot.slane %v9062_v40, 1 }
 0x6cd   :  { %6057 = vpow2.f32 %v5322_v59  ;;  %v5329_v4 = vmul.f32 -1.442695, %v3576_v6  ;;  %v5330_v8 = vmul.f32 -1.442695, %v3577_v38  ;;  %v5331_v21 = vmul.f32 -1.442695, %v3578_v35 }
 0x6ce   :  { %6059 = vpow2.f32 %v5323_v37  ;;  %v5332_v59 = vmul.f32 -1.442695, %v3579_v61  ;;  %v5333_v2 = vmul.f32 -1.442695, %v3580_v1 }
 0x6cf   :  { %6061 = vpow2.f32 %v5324_v20 }
 0x6d0   :  { %6063 = vpow2.f32 %v5325_v7 }
 0x6d1   :  { %6065 = vpow2.f32 %v5326_v24 }
 0x6d2   :  { %6067 = vpow2.f32 %v5327_v49 }
 0x6d3   :  { %6069 = vpow2.f32 %v5328_v41 }
 0x6d4   :  { %6071 = vpow2.f32 %v5329_v4 }
 0x6d5   :  { %6073 = vpow2.f32 %v5330_v8 }
 0x6d6   :  { %v6050_v37 = vpop.eup %6049  ;;  %6075 = vpow2.f32 %v5331_v21 }
 0x6d7   :  { %v6052_v5 = vpop.eup %6051  ;;  %v3541_v20 = vadd.f32 1.0, %v6050_v37  ;;  %6077 = vpow2.f32 %v5332_v59 }
 0x6d8   :  { %v6054_v32 = vpop.eup %6053  ;;  %v3542_v34 = vadd.f32 1.0, %v6052_v5  ;;  %6079 = vpow2.f32 %v5333_v2 }
 0x6d9   :  { %v6056_v7 = vpop.eup %6055  ;;  %v3543_v47 = vadd.f32 1.0, %v6054_v32  ;;  %6081 = vrcp.f32 %v3541_v20 }
 0x6da   :  { %v6058_v6 = vpop.eup %6057  ;;  %v3544_v38 = vadd.f32 1.0, %v6056_v7  ;;  %6083 = vrcp.f32 %v3542_v34 }
 0x6db   :  { %v6060_v24 = vpop.eup %6059  ;;  %v3545_v35 = vadd.f32 1.0, %v6058_v6  ;;  %6085 = vrcp.f32 %v3543_v47 }
 0x6dc   :  { %v6062_v49 = vpop.eup %6061  ;;  %v3546_v61 = vadd.f32 1.0, %v6060_v24  ;;  %6087 = vrcp.f32 %v3544_v38 }
 0x6dd   :  { %v6064_v41 = vpop.eup %6063  ;;  %v3547_v1 = vadd.f32 1.0, %v6062_v49  ;;  %6089 = vrcp.f32 %v3545_v35  ;;  %v3637_v49 = vrot.slane %v9046_v54, 2 }
 0x6de   :  { %v6066_v4 = vpop.eup %6065  ;;  %v3548_v8 = vadd.f32 1.0, %v6064_v41  ;;  %6091 = vrcp.f32 %v3546_v61 }
 0x6df   :  { %v6068_v21 = vpop.eup %6067  ;;  %6093 = vrcp.f32 %v3547_v1  ;;  %v3613_v59 = vadd.f32 1.0, %v6066_v4  ;;  %v3638_v1 = vrot.slane %v9048_v51, 2 }
 0x6e0   :  { %v6070_v32 = vpop.eup %6069  ;;  %6095 = vrcp.f32 %v3548_v8  ;;  %v3614_v2 = vadd.f32 1.0, %v6068_v21  ;;  %v3639_v8 = vrot.slane %v9052_v50, 2 }
 0x6e1   :  { %v6072_v37 = vpop.eup %6071  ;;  %v3615_v5 = vadd.f32 1.0, %v6070_v32  ;;  %6097 = vrcp.f32 %v3613_v59  ;;  %v3640_v59 = vrot.slane %v9054_v58, 2 }
 0x6e2   :  { %v6074_v20 = vpop.eup %6073  ;;  %v3616_v47 = vadd.f32 1.0, %v6072_v37  ;;  %6099 = vrcp.f32 %v3614_v2  ;;  %v3641_v2 = vrot.slane %v9050_v42, 2  ;;  %v3661_v37 = vrot.slane %v9046_v54, 3 }
 0x6e3   :  { %v6076_v34 = vpop.eup %6075  ;;  %v3617_v7 = vadd.f32 1.0, %v6074_v20  ;;  %6101 = vrcp.f32 %v3615_v5  ;;  %v3642_v20 = vrot.slane %v9056_v0, 2  ;;  %v3664_v54 = vrot.slane %v9054_v58, 3 }
 0x6e4   :  { %v6078_v6 = vpop.eup %6077  ;;  %v3618_v38 = vadd.f32 1.0, %v6076_v34  ;;  %6103 = vrcp.f32 %v3616_v47  ;;  %v3662_v47 = vrot.slane %v9048_v51, 3  ;;  %v5334_v51 = vmul.f32 -1.442695, %v3661_v37 }
 0x6e5   :  { %v6080_v24 = vpop.eup %6079  ;;  %v3619_v35 = vadd.f32 1.0, %v6078_v6  ;;  %6105 = vrcp.f32 %v3617_v7  ;;  %v3643_v7 = vrot.slane %v9058_v36, 2  ;;  %v3663_v6 = vrot.slane %v9052_v50, 3 }
 0x6e6   :  { %v6082_v61 = vpop.eup %6081  ;;  %v3620_v41 = vadd.f32 1.0, %v6080_v24  ;;  %6107 = vrcp.f32 %v3618_v38  ;;  %v3644_v24 = vrot.slane %v9062_v40, 2  ;;  %v3667_v50 = vrot.slane %v9058_v36, 3 }
 0x6e7   :  { %v6084_v4 = vpop.eup %6083  ;;  %6109 = vrcp.f32 %v3619_v35  ;;  %v5336_v48 = vmul.f32 -1.442695, %v3663_v6  ;;  %v3668_v58 = vrot.slane %v9062_v40, 3 }
 0x6e8   :  { %v6086_v21 = vpop.eup %6085  ;;  %6111 = vrcp.f32 %v3620_v41 }
 0x6e9   :  { %v9082_v32 = vpop.eup %6087  ;;  %6113 = vtanh.f32 %v3637_v49  ;;  %v3665_v49 = vrot.slane %v9050_v42, 3 }
 0x6ea   :  { %v9086_v5 = vpop.eup %6089  ;;  %6115 = vtanh.f32 %v3638_v1  ;;  %v3666_v1 = vrot.slane %v9056_v0, 3  ;;  %v5340_v0 = vmul.f32 -1.442695, %v3667_v50 }
 0x6eb   :  { %v9090_v34 = vpop.eup %6091  ;;  %6117 = vtanh.f32 %v3639_v8  ;;  %v5335_v8 = vmul.f32 -1.442695, %v3662_v47 }
 0x6ec   :  { %v9094_v38 = vpop.eup %6093  ;;  %6119 = vtanh.f32 %v3640_v59  ;;  %v5337_v59 = vmul.f32 -1.442695, %v3664_v54  ;;  %v5339_v37 = vmul.f32 -1.442695, %v3666_v1 }
 0x6ed   :  { %v9098_v35 = vpop.eup %6095  ;;  %6121 = vtanh.f32 %v3641_v2  ;;  %v5338_v2 = vmul.f32 -1.442695, %v3665_v49 }
 0x6ee   :  { %v6098_v41 = vpop.eup %6097  ;;  %6123 = vtanh.f32 %v3642_v20 }
 0x6ef   :  { %v6100_v27 = vpop.eup %6099  ;;  %6125 = vtanh.f32 %v3643_v7  ;;  %v5341_v7 = vmul.f32 -1.442695, %v3668_v58  ;;  %v3725_v36 = vmul.f32 %v6098_v41, %v8564_v29 }
 0x6f0   :  { %v6102_v16 = vpop.eup %6101  ;;  %6127 = vtanh.f32 %v3644_v24  ;;  %v3726_v40 = vmul.f32 %v6100_v27, %v8568_v30 }
 0x6f1   :  { %v6104_v43 = vpop.eup %6103  ;;  %6129 = vpow2.f32 %v5334_v51  ;;  %v3727_v49 = vmul.f32 %v6102_v16, %v8571_v60 }
 0x6f2   :  { %v6106_v42 = vpop.eup %6105  ;;  %6131 = vpow2.f32 %v5335_v8  ;;  %v3728_v1 = vmul.f32 %v6104_v43, %v8575_v31 }
 0x6f3   :  { %v6108_v20 = vpop.eup %6107  ;;  %6133 = vpow2.f32 %v5336_v48  ;;  %v3729_v58 = vmul.f32 %v6106_v42, %v8578_v9 }
 0x6f4   :  { %v6110_v47 = vpop.eup %6109  ;;  %6135 = vpow2.f32 %v5337_v59  ;;  %v3730_v30 = vmul.f32 %v6108_v20, %v8581_v33 }
 0x6f5   :  { %v6112_v18 = vpop.eup %6111  ;;  %6137 = vpow2.f32 %v5338_v2 }
 0x6f6   :  { %v6114_v6 = vpop.eup %6113  ;;  %6139 = vpow2.f32 %v5339_v37 }
 0x6f7   :  { %v6116_v24 = vpop.eup %6115  ;;  %6141 = vpow2.f32 %v5340_v0  ;;  %v3733_v54 = vmul.f32 %v6114_v6, %v6082_v61  ;;  %v3731_v0 = vmul.f32 %v6110_v47, %v8590_v46  ;;  %v3732_v6 = vmul.f32 %v6112_v18, %v8592_v13 }
 0x6f8   :  { %v6118_v51 = vpop.eup %6117  ;;  %6143 = vpow2.f32 %v5341_v7  ;;  %v3734_v48 = vmul.f32 %v6116_v24, %v6084_v4 }
 0x6f9   :  { %v6120_v8 = vpop.eup %6119  ;;  %v3735_v50 = vmul.f32 %v6118_v51, %v6086_v21  ;;  %v9109_v59 = vadd.f32 %v3733_v54, %v3725_v36 }
 0x6fa   :  { %v6122_v29 = vpop.eup %6121  ;;  %v3736_v41 = vmul.f32 %v6120_v8, %v9082_v32  ;;  %v9113_v27 = vadd.f32 %v3734_v48, %v3726_v40 }
 0x6fb   :  { %v6124_v61 = vpop.eup %6123  ;;  %v3737_v60 = vmul.f32 %v6122_v29, %v9086_v5  ;;  %v9116_v16 = vadd.f32 %v3735_v50, %v3727_v49  ;;  %6145 = vtanh.f32 %v9109_v59 }
 0x6fc   :  { %v6126_v31 = vpop.eup %6125  ;;  %v3738_v43 = vmul.f32 %v6124_v61, %v9090_v34  ;;  %v9120_v9 = vadd.f32 %v3736_v41, %v3728_v1  ;;  %6147 = vtanh.f32 %v9113_v27 }
 0x6fd   :  { %v6128_v4 = vpop.eup %6127  ;;  %v9123_v21 = vadd.f32 %v3737_v60, %v3729_v58  ;;  %6149 = vtanh.f32 %v9116_v16  ;;  %v3739_v54 = vmul.f32 %v6126_v31, %v9094_v38 }
 0x6fe   :  { %v6130_v33 = vpop.eup %6129  ;;  %v9126_v32 = vadd.f32 %v3738_v43, %v3730_v30  ;;  %6151 = vtanh.f32 %v9120_v9  ;;  %v3740_v48 = vmul.f32 %v6128_v4, %v9098_v35 }
 0x6ff   :  { %v6132_v5 = vpop.eup %6131  ;;  %v3701_v2 = vadd.f32 1.0, %v6130_v33  ;;  %6153 = vtanh.f32 %v9123_v21  ;;  %v9135_v50 = vadd.f32 %v3739_v54, %v3731_v0 }
 0x700   :  { %v6134_v42 = vpop.eup %6133  ;;  %v3702_v34 = vadd.f32 1.0, %v6132_v5  ;;  %6155 = vtanh.f32 %v9126_v32  ;;  %v9137_v47 = vadd.f32 %v3740_v48, %v3732_v6 }
 0x701   :  { %v6136_v37 = vpop.eup %6135  ;;  %v3703_v20 = vadd.f32 1.0, %v6134_v42  ;;  %6157 = vrcp.f32 %v3701_v2 }
 0x702   :  { %v6138_v7 = vpop.eup %6137  ;;  %v3704_v36 = vadd.f32 1.0, %v6136_v37  ;;  %6159 = vrcp.f32 %v3702_v34 }
 0x703   :  { %v6140_v40 = vpop.eup %6139  ;;  %v3705_v24 = vadd.f32 1.0, %v6138_v7  ;;  %6161 = vrcp.f32 %v3703_v20 }
 0x704   :  { %v6142_v49 = vpop.eup %6141  ;;  %v3706_v51 = vadd.f32 1.0, %v6140_v40  ;;  %6163 = vrcp.f32 %v3704_v36 }
 0x705   :  { %v6144_v1 = vpop.eup %6143  ;;  %v3707_v8 = vadd.f32 1.0, %v6142_v49  ;;  %6165 = vrcp.f32 %v3705_v24 }
 0x706   :  { %v3708_v46 = vadd.f32 1.0, %v6144_v1  ;;  %6167 = vrcp.f32 %v3706_v51 }
 0x707   :  { %6169 = vrcp.f32 %v3707_v8 }
 0x708   :  { %v6146_v13 = vpop.eup %6145  ;;  %6171 = vrcp.f32 %v3708_v46 }
 0x709   :  { %v6148_v18 = vpop.eup %6147  ;;  %6173 = vtanh.f32 %v9135_v50 }
 0x70a   :  { %v6150_v38 = vpop.eup %6149  ;;  %6175 = vtanh.f32 %v9137_v47 }
 0x70b   :  { %v6152_v58 = vpop.eup %6151 }
 0x70c   :  { %v6154_v35 = vpop.eup %6153 }
 0x70d   :  { %v6156_v29 = vpop.eup %6155 }
 0x70e   :  { %v6158_v41 = vpop.eup %6157 }
 0x70f   :  { %v6160_v30 = vpop.eup %6159  ;;  %v3757_v61 = vmul.f32 %v6158_v41, %v6146_v13  ;;  %v9908_v41 = vld [vmem:[#allocation26_spill] sm:$0xff] }
 0x710   :  { %v6162_v60 = vpop.eup %6161  ;;  %v3758_v31 = vmul.f32 %v6160_v30, %v6148_v18  ;;  %v9909_v30 = vld [vmem:[#allocation27_spill] sm:$0xff] }
 0x711   :  { %v6164_v43 = vpop.eup %6163  ;;  %v3759_v4 = vmul.f32 %v6162_v60, %v6150_v38  ;;  %3765 = vst [vmem:[%s9550_s4 + $0x5] sm:$0x1] %v3757_v61  ;;  %v9911_v60 = vld [vmem:[#allocation29_spill] sm:$0xff] }
 0x712   :  { %v6166_v33 = vpop.eup %6165  ;;  %v3760_v5 = vmul.f32 %v6164_v43, %v6152_v58  ;;  %3766 = vst [vmem:[%s9550_s4 + $0xd] sm:$0x1] %v3758_v31  ;;  %v3861_v20 = vcombine.low %v3757_v61, %v3758_v31  ;;  %v9910_v61 = vld [vmem:[#allocation28_spill] sm:$0xff]  ;;  %v9912_v31 = vld [vmem:[#allocation30_spill] sm:$0xff]  ;;  %v9913_v43 = vld [vmem:[#allocation31_spill] sm:$0xff] }
 0x713   :  { %v6168_v2 = vpop.eup %6167  ;;  %v3761_v42 = vmul.f32 %v6166_v33, %v6154_v35  ;;  %3767 = vst [vmem:[%s9550_s4 + $0x15] sm:$0x1] %v3759_v4  ;;  %v9906_v35 = vld [vmem:[#allocation24_spill] sm:$0xff]  ;;  %v9915_v33 = vld [vmem:[#allocation33_spill] sm:$0xff] }
 0x714   :  { %v6170_v34 = vpop.eup %6169  ;;  %v3762_v37 = vmul.f32 %v6168_v2, %v6156_v29  ;;  %3768 = vst [vmem:[%s9550_s4 + $0x1d] sm:$0x1] %v3760_v5  ;;  %v3862_v0 = vcombine.low %v3759_v4, %v3760_v5  ;;  %v3871_v51 = vrot.slane %v3861_v20, %v6925_v10  ;;  %v9907_v29 = vld [vmem:[#allocation25_spill] sm:$0xff]  ;;  %v9914_v4 = vld [vmem:[#allocation32_spill] sm:$0xff]  ;;  %v9916_v5 = vld [vmem:[#allocation34_spill] sm:$0xff] }
 0x715   :  { %v6172_v7 = vpop.eup %6171  ;;  %3769 = vst [vmem:[%s9550_s4 + $0x25] sm:$0x1] %v3761_v42  ;;  %v9917_v2 = vld [vmem:[#allocation35_spill] sm:$0xff] }
 0x716   :  { %v6174_v36 = vpop.eup %6173  ;;  %3770 = vst [vmem:[%s9550_s4 + $0x2d] sm:$0x1] %v3762_v37  ;;  %v3878_v6 = vrot.slane %v3862_v0, %v6925_v10  ;;  %v3863_v49 = vcombine.low %v3761_v42, %v3762_v37  ;;  %v9918_v42 = vld [vmem:[#allocation36_spill] sm:$0xff]  ;;  %v9920_v37 = vld [vmem:[#allocation38_spill] sm:$0xff]  ;;  %v9921_v20 = vld [vmem:[#allocation39_spill] sm:$0xff] }
 0x717   :  { %v6176_v40 = vpop.eup %6175  ;;  %v3763_v24 = vmul.f32 %v6174_v36, %v6170_v34  ;;  %v9919_v34 = vld [vmem:[#allocation37_spill] sm:$0xff]  ;;  %v9922_v0 = vld [vmem:[#allocation40_spill] sm:$0xff] }
 0x718   :  { %v3764_v54 = vmul.f32 %v6176_v40, %v6172_v7  ;;  %v3893_v1 = vcombine.low %v3871_v51, %v3878_v6  ;;  %v3885_v8 = vrot.slane %v3863_v49, %v6925_v10  ;;  %v9923_v7 = vmov 0.0   ;;  %v9924_v36 = vld [vmem:[#allocation41_spill] sm:$0xff] }
 0x719   :  { %3771 = vst [vmem:[%s9550_s4 + $0x35] sm:$0x1] %v3763_v24 }
 0x71a   :  { %3772 = vst [vmem:[%s9550_s4 + $0x3d] sm:$0x1] %v3764_v54  ;;  %v3864_v48 = vcombine.low %v3763_v24, %v3764_v54  ;;  %v3901_v18 = vrot.slane %v3893_v1, %v6925_v10 }
 0x71c   :  { %v3892_v46 = vrot.slane %v3864_v48, %v6925_v10 }
 0x71e   :  { %v3894_v13 = vcombine.low %v3885_v8, %v3892_v46 }
 0x720   :  { %v3908_v38 = vrot.slane %v3894_v13, %v6925_v10 }
 0x722   :  { %v3909_v58 = vcombine.low %v3901_v18, %v3908_v38 }
 0x724   :  { %3976 = vmatmul.mubr.f32.vlgmr.msra.gmra.mxu0 %v3909_v58  ;;  %4047 = vmatmul.mubr.f32.vlgmr.msra.gmra.mxu1 %v3909_v58 }
 0x725   :  { %4536 = vmatpush1.msra.mxu0 %v8641_v53  ;;  %4607 = vmatpush1.msra.mxu1 %v8648_v62  ;;  %v9884_v53 = vld [vmem:[#allocation2_spill] sm:$0xff]  ;;  %v9885_v62 = vld [vmem:[#allocation3_spill] sm:$0xff] }
 0x726   :  { %4537 = vmatprep.subr.mxu0 %v8653_v17  ;;  %4608 = vmatprep.subr.mxu1 %v8658_v3  ;;  %v9886_v17 = vld [vmem:[#allocation4_spill] sm:$0xff]  ;;  %v9887_v3 = vld [vmem:[#allocation5_spill] sm:$0xff] }
 0x727   :  { %4538 = vmatpush1.msra.mxu0 %v8665_v26  ;;  %4609 = vmatpush1.msra.mxu1 %v8670_v57  ;;  %v9888_v26 = vld [vmem:[#allocation6_spill] sm:$0xff]  ;;  %v9889_v57 = vld [vmem:[#allocation7_spill] sm:$0xff] }
 0x728   :  { %4539 = vmatprep.subr.mxu0 %v8675_v44  ;;  %4610 = vmatprep.subr.mxu1 %v8682_v52  ;;  %v9890_v44 = vld [vmem:[#allocation8_spill] sm:$0xff]  ;;  %v9891_v52 = vld [vmem:[#allocation9_spill] sm:$0xff] }
 0x729   :  { %4540 = vmatpush1.msra.mxu0 %v8687_v12  ;;  %4611 = vmatpush1.msra.mxu1 %v8692_v45  ;;  %v9892_v12 = vld [vmem:[#allocation10_spill] sm:$0xff]  ;;  %v9893_v45 = vld [vmem:[#allocation11_spill] sm:$0xff] }
 0x72a   :  { %4541 = vmatprep.subr.mxu0 %v8699_v23  ;;  %4612 = vmatprep.subr.mxu1 %v8704_v28  ;;  %v9894_v23 = vld [vmem:[#allocation12_spill] sm:$0xff]  ;;  %v9895_v28 = vld [vmem:[#allocation13_spill] sm:$0xff] }
 0x72b   :  { %4542 = vmatpush1.msra.mxu0 %v8711_v39  ;;  %4613 = vmatpush1.msra.mxu1 %v8716_v19  ;;  %v9896_v39 = vld [vmem:[#allocation14_spill] sm:$0xff]  ;;  %v9897_v19 = vld [vmem:[#allocation15_spill] sm:$0xff] }
 0x72c   :  { %4543 = vmatprep.subr.mxu0 %v8723_v56  ;;  %4614 = vmatprep.subr.mxu1 %v8728_v22  ;;  %v9898_v56 = vld [vmem:[#allocation16_spill] sm:$0xff]  ;;  %v9899_v22 = vld [vmem:[#allocation17_spill] sm:$0xff] }
 0x72d   :  { %4544 = vmatpush1.msra.mxu0 %v8735_v25  ;;  %4615 = vmatpush1.msra.mxu1 %v8740_v63  ;;  %v9900_v25 = vld [vmem:[#allocation18_spill] sm:$0xff]  ;;  %v9901_v63 = vld [vmem:[#allocation19_spill] sm:$0xff] }
 0x72e   :  { %4545 = vmatprep.subr.mxu0 %v8747_v11  ;;  %4616 = vmatprep.subr.mxu1 %v8752_v55  ;;  %v9902_v11 = vld [vmem:[#allocation20_spill] sm:$0xff]  ;;  %v9903_v55 = vld [vmem:[#allocation21_spill] sm:$0xff] }
 0x72f   :  { %4546 = vmatpush1.msra.mxu0 %v8759_v14  ;;  %4617 = vmatpush1.msra.mxu1 %v8764_v15  ;;  %v9904_v14 = vld [vmem:[#allocation22_spill] sm:$0xff]  ;;  %v9905_v15 = vld [vmem:[#allocation23_spill] sm:$0xff] }
 0x730   :  { %4547 = vmatprep.subr.mxu0 %v9884_v53  ;;  %4618 = vmatprep.subr.mxu1 %v9885_v62 }
 0x731   :  { %4548 = vmatpush1.msra.mxu0 %v9886_v17  ;;  %4619 = vmatpush1.msra.mxu1 %v9887_v3  ;;  %v5342_v17 = vld [vmem:[%s9548_s0 + $0x6] ss:$8 sm:$0xf] }
 0x732   :  { %4549 = vmatprep.subr.mxu0 %v9888_v26  ;;  %4620 = vmatprep.subr.mxu1 %v9889_v57  ;;  %v5343_v3 = vld [vmem:[%s9548_s0 + $0x26] ss:$8 sm:$0xf] }
 0x733   :  { %4550 = vmatpush1.msra.mxu0 %v9890_v44  ;;  %4621 = vmatpush1.msra.mxu1 %v9891_v52  ;;  %v5344_v26 = vld [vmem:[%s9548_s0 + $0x46] ss:$8 sm:$0xf] }
 0x734   :  { %4551 = vmatprep.subr.mxu0 %v9892_v12  ;;  %4622 = vmatprep.subr.mxu1 %v9893_v45  ;;  %v5346_v57 = vld [vmem:[%s9548_s0 + $0x86] ss:$8 sm:$0xf] }
 0x735   :  { %4552 = vmatpush1.msra.mxu0 %v9894_v23  ;;  %4623 = vmatpush1.msra.mxu1 %v9895_v28  ;;  %v5345_v23 = vld [vmem:[%s9548_s0 + $0x66] ss:$8 sm:$0xf] }
 0x736   :  { %4553 = vmatprep.subr.mxu0 %v9896_v39  ;;  %4624 = vmatprep.subr.mxu1 %v9897_v19  ;;  %v5347_v28 = vld [vmem:[%s9548_s0 + $0xa6] ss:$8 sm:$0xf] }
 0x737   :  { %4554 = vmatpush1.msra.mxu0 %v9898_v56  ;;  %4625 = vmatpush1.msra.mxu1 %v9899_v22  ;;  %v5348_v39 = vld [vmem:[%s9548_s0 + $0xc6] ss:$8 sm:$0xf] }
 0x738   :  { %4555 = vmatprep.subr.mxu0 %v9900_v25  ;;  %4626 = vmatprep.subr.mxu1 %v9901_v63  ;;  %v5349_v63 = vld [vmem:[%s9548_s0 + $0xe6] ss:$8 sm:$0xf] }
 0x739   :  { %4556 = vmatpush1.msra.mxu0 %v9902_v11  ;;  %4627 = vmatpush1.msra.mxu1 %v9903_v55 }
 0x73a   :  { %4557 = vmatprep.subr.mxu0 %v9904_v14  ;;  %4628 = vmatprep.subr.mxu1 %v9905_v15 }
 0x73b   :  { %4558 = vmatpush1.msra.mxu0 %v9906_v35  ;;  %4629 = vmatpush1.msra.mxu1 %v9907_v29 }
 0x73c   :  { %4559 = vmatprep.subr.mxu0 %v9908_v41  ;;  %4630 = vmatprep.subr.mxu1 %v9909_v30 }
 0x73d   :  { %4560 = vmatpush1.msra.mxu0 %v9910_v61  ;;  %4631 = vmatpush1.msra.mxu1 %v9911_v60 }
 0x73e   :  { %4561 = vmatprep.subr.mxu0 %v9912_v31  ;;  %4632 = vmatprep.subr.mxu1 %v9913_v43 }
 0x73f   :  { %4562 = vmatpush1.msra.mxu0 %v9914_v4  ;;  %4633 = vmatpush1.msra.mxu1 %v9915_v33 }
 0x740   :  { %4563 = vmatprep.subr.mxu0 %v9916_v5  ;;  %4634 = vmatprep.subr.mxu1 %v9917_v2 }
 0x741   :  { %4564 = vmatpush1.msra.mxu0 %v9918_v42  ;;  %4635 = vmatpush1.msra.mxu1 %v9919_v34 }
 0x742   :  { %4565 = vmatprep.subr.mxu0 %v9920_v37  ;;  %4636 = vmatprep.subr.mxu1 %v9921_v20 }
 0x743   :  { %4566 = vmatpush1.msra.mxu0 %v9922_v0  ;;  %4599 = vmatprep.mubr.f32.mxu0 %v9923_v7 }
 0x744   :  { %4637 = vmatpush1.msra.mxu1 %v9924_v36  ;;  %4670 = vmatprep.mubr.f32.mxu1 %v9923_v7 }
 0x7e4   :  { %v3977_v6 = vpop.f32.mrf.mxu0  ;;  %v4048_v40 = vpop.f32.mrf.mxu1 }
 0x7e6   :  { %v3979_v24 = vpop.f32.mrf.mxu0  ;;  %v4050_v54 = vpop.f32.mrf.mxu1 }
 0x7e7   :  { %v4057_v49 = vcombine.low %v3977_v6, %v3979_v24  ;;  %v4058_v51 = vcombine.high %v3977_v6, %v3979_v24  ;;  %v4059_v48 = vcombine.low %v4048_v40, %v4050_v54  ;;  %v4060_v1 = vcombine.high %v4048_v40, %v4050_v54 }
 0x7e9   :  { %v4067_v8 = vrot.slane %v4057_v49, %v6925_v10  ;;  %v4074_v46 = vrot.slane %v4058_v51, %v6925_v10  ;;  %v4081_v13 = vrot.slane %v4059_v48, %v6925_v10  ;;  %v4088_v18 = vrot.slane %v4060_v1, %v6925_v10 }
 0x7eb   :  { %v4089_v38 = vcombine.low %v4067_v8, %v4081_v13  ;;  %v4090_v58 = vcombine.high %v4067_v8, %v4081_v13  ;;  %v4091_v53 = vcombine.low %v4074_v46, %v4088_v18  ;;  %v4092_v62 = vcombine.high %v4074_v46, %v4088_v18 }
 0x7ed   :  { %v4099_v44 = vrot.slane %v4089_v38, %v6925_v10  ;;  %v4106_v52 = vrot.slane %v4091_v53, %v6925_v10  ;;  %v4113_v12 = vrot.slane %v4090_v58, %v6925_v10  ;;  %v4120_v45 = vrot.slane %v4092_v62, %v6925_v10 }
 0x7ef   :  { %v4121_v19 = vcombine.high %v4099_v44, %v4099_v44  ;;  %v4122_v56 = vcombine.high %v4106_v52, %v4106_v52  ;;  %v4123_v22 = vcombine.high %v4113_v12, %v4113_v12  ;;  %v4124_v25 = vcombine.high %v4120_v45, %v4120_v45 }
 0x7f0   :  { %v9267_v11 = vadd.f32 %v5342_v17, %v4099_v44  ;;  %v9269_v55 = vadd.f32 %v5343_v3, %v4113_v12  ;;  %v9271_v14 = vadd.f32 %v5346_v57, %v4106_v52  ;;  %v9277_v29 = vadd.f32 %v5347_v28, %v4120_v45 }
 0x7f1   :  { %v9273_v15 = vadd.f32 %v5344_v26, %v4121_v19  ;;  %v9275_v35 = vadd.f32 %v5345_v23, %v4123_v22  ;;  %v9279_v41 = vadd.f32 %v5348_v39, %v4122_v56  ;;  %v9283_v60 = vadd.f32 %v5349_v63, %v4124_v25 }
 0x7f2   :  { %v5350_v30 = vmul.f32 -1.442695, %v9267_v11  ;;  %v5351_v61 = vmul.f32 -1.442695, %v9269_v55  ;;  %v5354_v4 = vmul.f32 -1.442695, %v9271_v14 }
 0x7f3   :  { %v5352_v31 = vmul.f32 -1.442695, %v9273_v15  ;;  %v5353_v43 = vmul.f32 -1.442695, %v9275_v35  ;;  %v4197_v33 = vrot.slane %v9267_v11, 1  ;;  %v4198_v2 = vrot.slane %v9269_v55, 1 }
 0x7f4   :  { %6177 = vpow2.f32 %v5350_v30  ;;  %v5355_v5 = vmul.f32 -1.442695, %v9277_v29  ;;  %v5356_v42 = vmul.f32 -1.442695, %v9279_v41  ;;  %v4199_v34 = vrot.slane %v9273_v15, 1 }
 0x7f5   :  { %6179 = vpow2.f32 %v5351_v61  ;;  %v5357_v37 = vmul.f32 -1.442695, %v9283_v60  ;;  %v4200_v20 = vrot.slane %v9275_v35, 1  ;;  %v4201_v0 = vrot.slane %v9271_v14, 1 }
 0x7f6   :  { %6181 = vpow2.f32 %v5352_v31  ;;  %v5358_v7 = vmul.f32 -1.442695, %v4197_v33  ;;  %v4202_v36 = vrot.slane %v9277_v29, 1  ;;  %v5359_v6 = vmul.f32 -1.442695, %v4198_v2 }
 0x7f7   :  { %6183 = vpow2.f32 %v5353_v43  ;;  %v4203_v40 = vrot.slane %v9279_v41, 1  ;;  %v5360_v24 = vmul.f32 -1.442695, %v4199_v34  ;;  %v4204_v54 = vrot.slane %v9283_v60, 1 }
 0x7f8   :  { %6185 = vpow2.f32 %v5354_v4  ;;  %v5361_v49 = vmul.f32 -1.442695, %v4200_v20  ;;  %v5362_v51 = vmul.f32 -1.442695, %v4201_v0  ;;  %v5363_v48 = vmul.f32 -1.442695, %v4202_v36 }
 0x7f9   :  { %6187 = vpow2.f32 %v5355_v5  ;;  %v5364_v1 = vmul.f32 -1.442695, %v4203_v40  ;;  %v5365_v8 = vmul.f32 -1.442695, %v4204_v54  ;;  %v4262_v20 = vrot.slane %v9269_v55, 2 }
 0x7fa   :  { %6189 = vpow2.f32 %v5356_v42  ;;  %v4261_v42 = vrot.slane %v9267_v11, 2  ;;  %v4285_v54 = vrot.slane %v9267_v11, 3  ;;  %v4288_v11 = vrot.slane %v9275_v35, 3 }
 0x7fb   :  { %6191 = vpow2.f32 %v5357_v37 }
 0x7fc   :  { %6193 = vpow2.f32 %v5358_v7  ;;  %v4263_v7 = vrot.slane %v9273_v15, 2 }
 0x7fd   :  { %6195 = vpow2.f32 %v5359_v6  ;;  %v4264_v6 = vrot.slane %v9275_v35, 2  ;;  %v4292_v35 = vrot.slane %v9283_v60, 3 }
 0x7fe   :  { %6197 = vpow2.f32 %v5360_v24  ;;  %v4265_v24 = vrot.slane %v9271_v14, 2 }
 0x7ff   :  { %6199 = vpow2.f32 %v5361_v49 }
 0x800   :  { %6201 = vpow2.f32 %v5362_v51  ;;  %v4266_v51 = vrot.slane %v9277_v29, 2 }
 0x801   :  { %v6178_v46 = vpop.eup %6177  ;;  %6203 = vpow2.f32 %v5363_v48  ;;  %v4286_v48 = vrot.slane %v9269_v55, 3  ;;  %v5366_v55 = vmul.f32 -1.442695, %v4285_v54 }
 0x802   :  { %v6180_v13 = vpop.eup %6179  ;;  %v4165_v18 = vadd.f32 1.0, %v6178_v46  ;;  %6205 = vpow2.f32 %v5364_v1  ;;  %v4287_v46 = vrot.slane %v9273_v15, 3  ;;  %v4291_v15 = vrot.slane %v9279_v41, 3 }
 0x803   :  { %v6182_v38 = vpop.eup %6181  ;;  %v4166_v58 = vadd.f32 1.0, %v6180_v13  ;;  %6207 = vpow2.f32 %v5365_v8  ;;  %v4267_v8 = vrot.slane %v9279_v41, 2 }
 0x804   :  { %v6184_v53 = vpop.eup %6183  ;;  %v4167_v62 = vadd.f32 1.0, %v6182_v38  ;;  %6209 = vrcp.f32 %v4165_v18  ;;  %v4268_v18 = vrot.slane %v9283_v60, 2 }
 0x805   :  { %v6186_v17 = vpop.eup %6185  ;;  %v4168_v3 = vadd.f32 1.0, %v6184_v53  ;;  %6211 = vrcp.f32 %v4166_v58  ;;  %v4289_v58 = vrot.slane %v9271_v14, 3 }
 0x806   :  { %v6188_v26 = vpop.eup %6187  ;;  %v4169_v57 = vadd.f32 1.0, %v6186_v17  ;;  %6213 = vrcp.f32 %v4167_v62  ;;  %v4290_v62 = vrot.slane %v9277_v29, 3  ;;  %v5367_v17 = vmul.f32 -1.442695, %v4286_v48 }
 0x807   :  { %v6190_v44 = vpop.eup %6189  ;;  %v4170_v52 = vadd.f32 1.0, %v6188_v26  ;;  %6215 = vrcp.f32 %v4168_v3  ;;  %v5368_v26 = vmul.f32 -1.442695, %v4287_v46  ;;  %v5372_v29 = vmul.f32 -1.442695, %v4291_v15 }
 0x808   :  { %v6192_v12 = vpop.eup %6191  ;;  %v4171_v45 = vadd.f32 1.0, %v6190_v44  ;;  %6217 = vrcp.f32 %v4169_v57  ;;  %v5369_v44 = vmul.f32 -1.442695, %v4288_v11 }
 0x809   :  { %v6194_v23 = vpop.eup %6193  ;;  %v4172_v28 = vadd.f32 1.0, %v6192_v12  ;;  %6219 = vrcp.f32 %v4170_v52  ;;  %v5370_v12 = vmul.f32 -1.442695, %v4289_v58 }
 0x80a   :  { %v6196_v39 = vpop.eup %6195  ;;  %6221 = vrcp.f32 %v4171_v45  ;;  %v4237_v19 = vadd.f32 1.0, %v6194_v23  ;;  %v5371_v45 = vmul.f32 -1.442695, %v4290_v62 }
 0x80b   :  { %v6198_v56 = vpop.eup %6197  ;;  %6223 = vrcp.f32 %v4172_v28  ;;  %v4238_v22 = vadd.f32 1.0, %v6196_v39  ;;  %v5373_v39 = vmul.f32 -1.442695, %v4292_v35 }
 0x80c   :  { %v6200_v25 = vpop.eup %6199  ;;  %v4239_v63 = vadd.f32 1.0, %v6198_v56  ;;  %6225 = vrcp.f32 %v4237_v19 }
 0x80d   :  { %v6202_v30 = vpop.eup %6201  ;;  %v4240_v61 = vadd.f32 1.0, %v6200_v25  ;;  %6227 = vrcp.f32 %v4238_v22 }
 0x80e   :  { %v6204_v31 = vpop.eup %6203  ;;  %v4241_v43 = vadd.f32 1.0, %v6202_v30  ;;  %6229 = vrcp.f32 %v4239_v63 }
 0x80f   :  { %v6206_v4 = vpop.eup %6205  ;;  %v4242_v33 = vadd.f32 1.0, %v6204_v31  ;;  %6231 = vrcp.f32 %v4240_v61 }
 0x810   :  { %v6208_v5 = vpop.eup %6207  ;;  %v4243_v2 = vadd.f32 1.0, %v6206_v4  ;;  %6233 = vrcp.f32 %v4241_v43 }
 0x811   :  { %v6210_v34 = vpop.eup %6209  ;;  %v4244_v37 = vadd.f32 1.0, %v6208_v5  ;;  %6235 = vrcp.f32 %v4242_v33 }
 0x812   :  { %v6212_v0 = vpop.eup %6211  ;;  %6237 = vrcp.f32 %v4243_v2 }
 0x813   :  { %v6214_v36 = vpop.eup %6213  ;;  %6239 = vrcp.f32 %v4244_v37 }
 0x814   :  { %v9303_v40 = vpop.eup %6215  ;;  %6241 = vtanh.f32 %v4261_v42 }
 0x815   :  { %v9307_v49 = vpop.eup %6217  ;;  %6243 = vtanh.f32 %v4262_v20 }
 0x816   :  { %v9311_v1 = vpop.eup %6219  ;;  %6245 = vtanh.f32 %v4263_v7 }
 0x817   :  { %v9315_v13 = vpop.eup %6221  ;;  %6247 = vtanh.f32 %v4264_v6 }
 0x818   :  { %v9319_v38 = vpop.eup %6223  ;;  %6249 = vtanh.f32 %v4265_v24 }
 0x819   :  { %v6226_v53 = vpop.eup %6225  ;;  %6251 = vtanh.f32 %v4266_v51 }
 0x81a   :  { %v6228_v3 = vpop.eup %6227  ;;  %6253 = vtanh.f32 %v4267_v8  ;;  %v4349_v41 = vmul.f32 %v6226_v53, %v9109_v59 }
 0x81b   :  { %v6230_v57 = vpop.eup %6229  ;;  %6255 = vtanh.f32 %v4268_v18  ;;  %v4350_v60 = vmul.f32 %v6228_v3, %v9113_v27 }
 0x81c   :  { %v6232_v52 = vpop.eup %6231  ;;  %6257 = vpow2.f32 %v5366_v55  ;;  %v4351_v63 = vmul.f32 %v6230_v57, %v9116_v16 }
 0x81d   :  { %v6234_v14 = vpop.eup %6233  ;;  %6259 = vpow2.f32 %v5367_v17  ;;  %v4352_v31 = vmul.f32 %v6232_v52, %v9120_v9 }
 0x81e   :  { %v6236_v23 = vpop.eup %6235  ;;  %6261 = vpow2.f32 %v5368_v26  ;;  %v4353_v33 = vmul.f32 %v6234_v14, %v9123_v21 }
 0x81f   :  { %v6238_v28 = vpop.eup %6237  ;;  %6263 = vpow2.f32 %v5369_v44  ;;  %v4354_v27 = vmul.f32 %v6236_v23, %v9126_v32 }
 0x820   :  { %v6240_v19 = vpop.eup %6239  ;;  %6265 = vpow2.f32 %v5370_v12  ;;  %v4355_v48 = vmul.f32 %v6238_v28, %v9135_v50 }
 0x821   :  { %v6242_v56 = vpop.eup %6241  ;;  %6267 = vpow2.f32 %v5371_v45  ;;  %v4356_v46 = vmul.f32 %v6240_v19, %v9137_v47 }
 0x822   :  { %v6244_v22 = vpop.eup %6243  ;;  %6269 = vpow2.f32 %v5372_v29  ;;  %v4357_v25 = vmul.f32 %v6242_v56, %v6210_v34 }
 0x823   :  { %v6246_v30 = vpop.eup %6245  ;;  %6271 = vpow2.f32 %v5373_v39  ;;  %v4358_v61 = vmul.f32 %v6244_v22, %v6212_v0 }
 0x824   :  { %v6248_v43 = vpop.eup %6247  ;;  %v4359_v4 = vmul.f32 %v6246_v30, %v6214_v36  ;;  %v9330_v5 = vadd.f32 %v4357_v25, %v4349_v41 }
 0x825   :  { %v6250_v59 = vpop.eup %6249  ;;  %v4360_v2 = vmul.f32 %v6248_v43, %v9303_v40  ;;  %v9334_v42 = vadd.f32 %v4358_v61, %v4350_v60 }
 0x826   :  { %v6252_v34 = vpop.eup %6251  ;;  %v4361_v16 = vmul.f32 %v6250_v59, %v9307_v49  ;;  %v9337_v37 = vadd.f32 %v4359_v4, %v4351_v63  ;;  %6273 = vtanh.f32 %v9330_v5 }
 0x827   :  { %v6254_v9 = vpop.eup %6253  ;;  %v4362_v20 = vmul.f32 %v6252_v34, %v9311_v1  ;;  %v9341_v21 = vadd.f32 %v4360_v2, %v4352_v31  ;;  %6275 = vtanh.f32 %v9334_v42 }
 0x828   :  { %v6256_v0 = vpop.eup %6255  ;;  %v9344_v7 = vadd.f32 %v4361_v16, %v4353_v33  ;;  %6277 = vtanh.f32 %v9337_v37  ;;  %v4363_v58 = vmul.f32 %v6254_v9, %v9315_v13 }
 0x829   :  { %v6258_v32 = vpop.eup %6257  ;;  %v9347_v36 = vadd.f32 %v4362_v20, %v4354_v27  ;;  %6279 = vtanh.f32 %v9341_v21  ;;  %v4364_v62 = vmul.f32 %v6256_v0, %v9319_v38 }
 0x82a   :  { %v6260_v6 = vpop.eup %6259  ;;  %v4325_v40 = vadd.f32 1.0, %v6258_v32  ;;  %6281 = vtanh.f32 %v9344_v7  ;;  %v9356_v15 = vadd.f32 %v4363_v58, %v4355_v48 }
 0x82b   :  { %v6262_v24 = vpop.eup %6261  ;;  %v4326_v54 = vadd.f32 1.0, %v6260_v6  ;;  %6283 = vtanh.f32 %v9347_v36  ;;  %v9358_v26 = vadd.f32 %v4364_v62, %v4356_v46 }
 0x82c   :  { %v6264_v49 = vpop.eup %6263  ;;  %v4327_v51 = vadd.f32 1.0, %v6262_v24  ;;  %6285 = vrcp.f32 %v4325_v40 }
 0x82d   :  { %v6266_v1 = vpop.eup %6265  ;;  %v4328_v8 = vadd.f32 1.0, %v6264_v49  ;;  %6287 = vrcp.f32 %v4326_v54 }
 0x82e   :  { %v6268_v18 = vpop.eup %6267  ;;  %v4329_v11 = vadd.f32 1.0, %v6266_v1  ;;  %6289 = vrcp.f32 %v4327_v51 }
 0x82f   :  { %v6270_v55 = vpop.eup %6269  ;;  %v4330_v53 = vadd.f32 1.0, %v6268_v18  ;;  %6291 = vrcp.f32 %v4328_v8 }
 0x830   :  { %v6272_v17 = vpop.eup %6271  ;;  %v4331_v3 = vadd.f32 1.0, %v6270_v55  ;;  %6293 = vrcp.f32 %v4329_v11 }
 0x831   :  { %v4332_v50 = vadd.f32 1.0, %v6272_v17  ;;  %6295 = vrcp.f32 %v4330_v53 }
 0x832   :  { %6297 = vrcp.f32 %v4331_v3  ;;  %v5374_v3 = vld [vmem:[%s9548_s0 + $0x7] ss:$8 sm:$0xf] }
 0x833   :  { %v6274_v47 = vpop.eup %6273  ;;  %6299 = vrcp.f32 %v4332_v50  ;;  %v5375_v50 = vld [vmem:[%s9548_s0 + $0x27] ss:$8 sm:$0xf] }
 0x834   :  { %v6276_v57 = vpop.eup %6275  ;;  %6301 = vtanh.f32 %v9356_v15 }
 0x835   :  { %v6278_v13 = vpop.eup %6277  ;;  %6303 = vtanh.f32 %v9358_v26 }
 0x836   :  { %v6280_v35 = vpop.eup %6279 }
 0x837   :  { %v6282_v38 = vpop.eup %6281 }
 0x838   :  { %v6284_v44 = vpop.eup %6283 }
 0x839   :  { %v6286_v52 = vpop.eup %6285 }
 0x83a   :  { %v6288_v12 = vpop.eup %6287  ;;  %v4381_v14 = vmul.f32 %v6286_v52, %v6274_v47  ;;  %v5376_v47 = vld [vmem:[%s9548_s0 + $0x47] ss:$8 sm:$0xf] }
 0x83b   :  { %v6290_v45 = vpop.eup %6289  ;;  %v4382_v23 = vmul.f32 %v6288_v12, %v6276_v57  ;;  %v5378_v57 = vld [vmem:[%s9548_s0 + $0x87] ss:$8 sm:$0xf] }
 0x83c   :  { %v6292_v29 = vpop.eup %6291  ;;  %v4383_v28 = vmul.f32 %v6290_v45, %v6278_v13  ;;  %4389 = vst [vmem:[%s9550_s4 + $0x6] sm:$0x1] %v4381_v14  ;;  %v5377_v52 = vld [vmem:[%s9548_s0 + $0x67] ss:$8 sm:$0xf] }
 0x83d   :  { %v6294_v39 = vpop.eup %6293  ;;  %v4384_v19 = vmul.f32 %v6292_v29, %v6280_v35  ;;  %4390 = vst [vmem:[%s9550_s4 + $0xe] sm:$0x1] %v4382_v23  ;;  %v4485_v25 = vcombine.low %v4381_v14, %v4382_v23  ;;  %v5379_v12 = vld [vmem:[%s9548_s0 + $0xa7] ss:$8 sm:$0xf] }
 0x83e   :  { %v6296_v41 = vpop.eup %6295  ;;  %v4385_v56 = vmul.f32 %v6294_v39, %v6282_v38  ;;  %4391 = vst [vmem:[%s9550_s4 + $0x16] sm:$0x1] %v4383_v28  ;;  %v5380_v14 = vld [vmem:[%s9548_s0 + $0xc7] ss:$8 sm:$0xf] }
 0x83f   :  { %v6298_v60 = vpop.eup %6297  ;;  %v4386_v22 = vmul.f32 %v6296_v41, %v6284_v44  ;;  %4392 = vst [vmem:[%s9550_s4 + $0x1e] sm:$0x1] %v4384_v19  ;;  %v4486_v63 = vcombine.low %v4383_v28, %v4384_v19  ;;  %v4495_v2 = vrot.slane %v4485_v25, %v6925_v10  ;;  %v5381_v39 = vld [vmem:[%s9548_s0 + $0xe7] ss:$8 sm:$0xf] }
 0x840   :  { %v6300_v30 = vpop.eup %6299  ;;  %4393 = vst [vmem:[%s9550_s4 + $0x26] sm:$0x1] %v4385_v56 }
 0x841   :  { %v6302_v61 = vpop.eup %6301  ;;  %4394 = vst [vmem:[%s9550_s4 + $0x2e] sm:$0x1] %v4386_v22  ;;  %v4502_v31 = vrot.slane %v4486_v63, %v6925_v10  ;;  %v4487_v59 = vcombine.low %v4385_v56, %v4386_v22 }
 0x842   :  { %v6304_v43 = vpop.eup %6303  ;;  %v4387_v4 = vmul.f32 %v6302_v61, %v6298_v60 }
 0x843   :  { %v4388_v33 = vmul.f32 %v6304_v43, %v6300_v30  ;;  %v4517_v34 = vcombine.low %v4495_v2, %v4502_v31  ;;  %v4509_v16 = vrot.slane %v4487_v59, %v6925_v10 }
 0x844   :  { %4395 = vst [vmem:[%s9550_s4 + $0x36] sm:$0x1] %v4387_v4 }
 0x845   :  { %4396 = vst [vmem:[%s9550_s4 + $0x3e] sm:$0x1] %v4388_v33  ;;  %v4488_v27 = vcombine.low %v4387_v4, %v4388_v33  ;;  %v4525_v0 = vrot.slane %v4517_v34, %v6925_v10 }
 0x847   :  { %v4516_v9 = vrot.slane %v4488_v27, %v6925_v10 }
 0x849   :  { %v4518_v20 = vcombine.low %v4509_v16, %v4516_v9 }
 0x84b   :  { %v4532_v32 = vrot.slane %v4518_v20, %v6925_v10 }
 0x84d   :  { %v4533_v6 = vcombine.low %v4525_v0, %v4532_v32 }
 0x84f   :  { %4600 = vmatmul.mubr.f32.vlgmr.msra.gmra.mxu0 %v4533_v6  ;;  %4671 = vmatmul.mubr.f32.vlgmr.msra.gmra.mxu1 %v4533_v6 }
 0x90f   :  { %v4601_v40 = vpop.f32.mrf.mxu0  ;;  %v4672_v24 = vpop.f32.mrf.mxu1 }
 0x911   :  { %v4603_v54 = vpop.f32.mrf.mxu0  ;;  %v4674_v49 = vpop.f32.mrf.mxu1 }
 0x912   :  { %v4681_v51 = vcombine.low %v4601_v40, %v4603_v54  ;;  %v4682_v48 = vcombine.high %v4601_v40, %v4603_v54  ;;  %v4683_v1 = vcombine.low %v4672_v24, %v4674_v49  ;;  %v4684_v8 = vcombine.high %v4672_v24, %v4674_v49 }
 0x914   :  { %v4691_v46 = vrot.slane %v4681_v51, %v6925_v10  ;;  %v4698_v18 = vrot.slane %v4682_v48, %v6925_v10  ;;  %v4705_v11 = vrot.slane %v4683_v1, %v6925_v10  ;;  %v4712_v58 = vrot.slane %v4684_v8, %v6925_v10 }
 0x916   :  { %v4713_v55 = vcombine.low %v4691_v46, %v4705_v11  ;;  %v4714_v53 = vcombine.high %v4691_v46, %v4705_v11  ;;  %v4715_v62 = vcombine.low %v4698_v18, %v4712_v58  ;;  %v4716_v17 = vcombine.high %v4698_v18, %v4712_v58 }
 0x918   :  { %v4723_v13 = vrot.slane %v4713_v55, %v6925_v10  ;;  %v4730_v35 = vrot.slane %v4715_v62, %v6925_v10  ;;  %v4737_v38 = vrot.slane %v4714_v53, %v6925_v10  ;;  %v4744_v44 = vrot.slane %v4716_v17, %v6925_v10 }
 0x91a   :  { %v4745_v45 = vcombine.high %v4723_v13, %v4723_v13  ;;  %v4746_v23 = vcombine.high %v4730_v35, %v4730_v35  ;;  %v4747_v29 = vcombine.high %v4737_v38, %v4737_v38  ;;  %v4748_v28 = vcombine.high %v4744_v44, %v4744_v44 }
 0x91b   :  { %v9424_v19 = vadd.f32 %v5374_v3, %v4723_v13  ;;  %v9426_v41 = vadd.f32 %v5375_v50, %v4737_v38  ;;  %v9428_v56 = vadd.f32 %v5378_v57, %v4730_v35  ;;  %v9434_v25 = vadd.f32 %v5379_v12, %v4744_v44 }
 0x91c   :  { %v9430_v60 = vadd.f32 %v5376_v47, %v4745_v45  ;;  %v9432_v22 = vadd.f32 %v5377_v52, %v4747_v29  ;;  %v9436_v63 = vadd.f32 %v5380_v14, %v4746_v23  ;;  %v9440_v31 = vadd.f32 %v5381_v39, %v4748_v28 }
 0x91d   :  { %v5382_v30 = vmul.f32 -1.442695, %v9424_v19  ;;  %v5383_v61 = vmul.f32 -1.442695, %v9426_v41  ;;  %v5386_v33 = vmul.f32 -1.442695, %v9428_v56 }
 0x91e   :  { %v5384_v43 = vmul.f32 -1.442695, %v9430_v60  ;;  %v5385_v4 = vmul.f32 -1.442695, %v9432_v22  ;;  %v4821_v59 = vrot.slane %v9424_v19, 1  ;;  %v4822_v27 = vrot.slane %v9426_v41, 1 }
 0x91f   :  { %6305 = vpow2.f32 %v5382_v30  ;;  %v5387_v2 = vmul.f32 -1.442695, %v9434_v25  ;;  %v5388_v34 = vmul.f32 -1.442695, %v9436_v63  ;;  %v4823_v16 = vrot.slane %v9430_v60, 1 }
 0x920   :  { %6307 = vpow2.f32 %v5383_v61  ;;  %v5389_v9 = vmul.f32 -1.442695, %v9440_v31  ;;  %v4824_v20 = vrot.slane %v9432_v22, 1  ;;  %v4825_v0 = vrot.slane %v9428_v56, 1 }
 0x921   :  { %6309 = vpow2.f32 %v5384_v43  ;;  %v5390_v32 = vmul.f32 -1.442695, %v4821_v59  ;;  %v4826_v6 = vrot.slane %v9434_v25, 1  ;;  %v5391_v40 = vmul.f32 -1.442695, %v4822_v27 }
 0x922   :  { %6311 = vpow2.f32 %v5385_v4  ;;  %v4827_v24 = vrot.slane %v9436_v63, 1  ;;  %v5392_v54 = vmul.f32 -1.442695, %v4823_v16  ;;  %v4828_v49 = vrot.slane %v9440_v31, 1 }
 0x923   :  { %6313 = vpow2.f32 %v5386_v33  ;;  %v5393_v51 = vmul.f32 -1.442695, %v4824_v20  ;;  %v5394_v48 = vmul.f32 -1.442695, %v4825_v0  ;;  %v5395_v1 = vmul.f32 -1.442695, %v4826_v6 }
 0x924   :  { %6315 = vpow2.f32 %v5387_v2  ;;  %v5396_v8 = vmul.f32 -1.442695, %v4827_v24  ;;  %v5397_v46 = vmul.f32 -1.442695, %v4828_v49  ;;  %v4886_v20 = vrot.slane %v9426_v41, 2 }
 0x925   :  { %6317 = vpow2.f32 %v5388_v34  ;;  %v4885_v34 = vrot.slane %v9424_v19, 2  ;;  %v4909_v49 = vrot.slane %v9424_v19, 3  ;;  %v4912_v19 = vrot.slane %v9432_v22, 3 }
 0x926   :  { %6319 = vpow2.f32 %v5389_v9 }
 0x927   :  { %6321 = vpow2.f32 %v5390_v32  ;;  %v4887_v32 = vrot.slane %v9430_v60, 2 }
 0x928   :  { %6323 = vpow2.f32 %v5391_v40  ;;  %v4888_v40 = vrot.slane %v9432_v22, 2  ;;  %v4916_v22 = vrot.slane %v9440_v31, 3 }
 0x929   :  { %6325 = vpow2.f32 %v5392_v54  ;;  %v4889_v54 = vrot.slane %v9428_v56, 2 }
 0x92a   :  { %6327 = vpow2.f32 %v5393_v51 }
 0x92b   :  { %6329 = vpow2.f32 %v5394_v48  ;;  %v4890_v48 = vrot.slane %v9434_v25, 2 }
 0x92c   :  { %v6306_v18 = vpop.eup %6305  ;;  %6331 = vpow2.f32 %v5395_v1  ;;  %v4910_v1 = vrot.slane %v9426_v41, 3  ;;  %v5398_v41 = vmul.f32 -1.442695, %v4909_v49 }
 0x92d   :  { %v6308_v11 = vpop.eup %6307  ;;  %v4789_v58 = vadd.f32 1.0, %v6306_v18  ;;  %6333 = vpow2.f32 %v5396_v8  ;;  %v4911_v18 = vrot.slane %v9430_v60, 3  ;;  %v4915_v60 = vrot.slane %v9436_v63, 3 }
 0x92e   :  { %v6310_v55 = vpop.eup %6309  ;;  %v4790_v53 = vadd.f32 1.0, %v6308_v11  ;;  %6335 = vpow2.f32 %v5397_v46  ;;  %v4891_v46 = vrot.slane %v9436_v63, 2 }
 0x92f   :  { %v6312_v62 = vpop.eup %6311  ;;  %v4791_v17 = vadd.f32 1.0, %v6310_v55  ;;  %6337 = vrcp.f32 %v4789_v58  ;;  %v4892_v58 = vrot.slane %v9440_v31, 2 }
 0x930   :  { %v6314_v3 = vpop.eup %6313  ;;  %v4792_v50 = vadd.f32 1.0, %v6312_v62  ;;  %6339 = vrcp.f32 %v4790_v53  ;;  %v4913_v53 = vrot.slane %v9428_v56, 3 }
 0x931   :  { %v6316_v47 = vpop.eup %6315  ;;  %v4793_v57 = vadd.f32 1.0, %v6314_v3  ;;  %6341 = vrcp.f32 %v4791_v17  ;;  %v4914_v17 = vrot.slane %v9434_v25, 3  ;;  %v5399_v3 = vmul.f32 -1.442695, %v4910_v1 }
 0x932   :  { %v6318_v13 = vpop.eup %6317  ;;  %v4794_v35 = vadd.f32 1.0, %v6316_v47  ;;  %6343 = vrcp.f32 %v4792_v50  ;;  %v5400_v47 = vmul.f32 -1.442695, %v4911_v18  ;;  %v5404_v25 = vmul.f32 -1.442695, %v4915_v60 }
 0x933   :  { %v6320_v38 = vpop.eup %6319  ;;  %v4795_v44 = vadd.f32 1.0, %v6318_v13  ;;  %6345 = vrcp.f32 %v4793_v57  ;;  %v5401_v13 = vmul.f32 -1.442695, %v4912_v19 }
 0x934   :  { %v6322_v52 = vpop.eup %6321  ;;  %v4796_v12 = vadd.f32 1.0, %v6320_v38  ;;  %6347 = vrcp.f32 %v4794_v35  ;;  %v5402_v38 = vmul.f32 -1.442695, %v4913_v53 }
 0x935   :  { %v6324_v14 = vpop.eup %6323  ;;  %6349 = vrcp.f32 %v4795_v44  ;;  %v4861_v45 = vadd.f32 1.0, %v6322_v52  ;;  %v5403_v44 = vmul.f32 -1.442695, %v4914_v17 }
 0x936   :  { %v6326_v23 = vpop.eup %6325  ;;  %6351 = vrcp.f32 %v4796_v12  ;;  %v4862_v29 = vadd.f32 1.0, %v6324_v14  ;;  %v5405_v14 = vmul.f32 -1.442695, %v4916_v22 }
 0x937   :  { %v6328_v28 = vpop.eup %6327  ;;  %v4863_v39 = vadd.f32 1.0, %v6326_v23  ;;  %6353 = vrcp.f32 %v4861_v45 }
 0x938   :  { %v6330_v30 = vpop.eup %6329  ;;  %v4864_v61 = vadd.f32 1.0, %v6328_v28  ;;  %6355 = vrcp.f32 %v4862_v29 }
 0x939   :  { %v6332_v43 = vpop.eup %6331  ;;  %v4865_v4 = vadd.f32 1.0, %v6330_v30  ;;  %6357 = vrcp.f32 %v4863_v39 }
 0x93a   :  { %v6334_v33 = vpop.eup %6333  ;;  %v4866_v59 = vadd.f32 1.0, %v6332_v43  ;;  %6359 = vrcp.f32 %v4864_v61 }
 0x93b   :  { %v6336_v2 = vpop.eup %6335  ;;  %v4867_v27 = vadd.f32 1.0, %v6334_v33  ;;  %6361 = vrcp.f32 %v4865_v4 }
 0x93c   :  { %v9457_v16 = vpop.eup %6337  ;;  %v4868_v9 = vadd.f32 1.0, %v6336_v2  ;;  %6363 = vrcp.f32 %v4866_v59 }
 0x93d   :  { %v9460_v0 = vpop.eup %6339  ;;  %6365 = vrcp.f32 %v4867_v27 }
 0x93e   :  { %v9463_v6 = vpop.eup %6341  ;;  %6367 = vrcp.f32 %v4868_v9 }
 0x93f   :  { %v9466_v24 = vpop.eup %6343  ;;  %6369 = vtanh.f32 %v4885_v34 }
 0x940   :  { %v9470_v51 = vpop.eup %6345  ;;  %6371 = vtanh.f32 %v4886_v20 }
 0x941   :  { %v9474_v8 = vpop.eup %6347  ;;  %6373 = vtanh.f32 %v4887_v32 }
 0x942   :  { %v9478_v11 = vpop.eup %6349  ;;  %6375 = vtanh.f32 %v4888_v40 }
 0x943   :  { %v9482_v55 = vpop.eup %6351  ;;  %6377 = vtanh.f32 %v4889_v54 }
 0x944   :  { %v6354_v62 = vpop.eup %6353  ;;  %6379 = vtanh.f32 %v4890_v48 }
 0x945   :  { %v6356_v50 = vpop.eup %6355  ;;  %6381 = vtanh.f32 %v4891_v46  ;;  %v4973_v63 = vmul.f32 %v6354_v62, %v9330_v5 }
 0x946   :  { %v6358_v57 = vpop.eup %6357  ;;  %6383 = vtanh.f32 %v4892_v58  ;;  %v4974_v31 = vmul.f32 %v6356_v50, %v9334_v42 }
 0x947   :  { %v6360_v35 = vpop.eup %6359  ;;  %6385 = vpow2.f32 %v5398_v41  ;;  %v4975_v28 = vmul.f32 %v6358_v57, %v9337_v37 }
 0x948   :  { %v6362_v56 = vpop.eup %6361  ;;  %6387 = vpow2.f32 %v5399_v3  ;;  %v4976_v61 = vmul.f32 %v6360_v35, %v9341_v21 }
 0x949   :  { %v6364_v52 = vpop.eup %6363  ;;  %6389 = vpow2.f32 %v5400_v47  ;;  %v4977_v33 = vmul.f32 %v6362_v56, %v9344_v7 }
 0x94a   :  { %v6366_v12 = vpop.eup %6365  ;;  %6391 = vpow2.f32 %v5401_v13  ;;  %v4978_v42 = vmul.f32 %v6364_v52, %v9347_v36 }
 0x94b   :  { %v6368_v45 = vpop.eup %6367  ;;  %6393 = vpow2.f32 %v5402_v38 }
 0x94c   :  { %v6370_v23 = vpop.eup %6369  ;;  %6395 = vpow2.f32 %v5403_v44 }
 0x94d   :  { %v6372_v29 = vpop.eup %6371  ;;  %6397 = vpow2.f32 %v5404_v25  ;;  %v4981_v39 = vmul.f32 %v6370_v23, %v9457_v16  ;;  %v4979_v16 = vmul.f32 %v6366_v12, %v9356_v15 }
 0x94e   :  { %v6374_v30 = vpop.eup %6373  ;;  %6399 = vpow2.f32 %v5405_v14  ;;  %v4982_v43 = vmul.f32 %v6372_v29, %v9460_v0  ;;  %v4980_v0 = vmul.f32 %v6368_v45, %v9358_v26 }
 0x94f   :  { %v6376_v4 = vpop.eup %6375  ;;  %v4983_v5 = vmul.f32 %v6374_v30, %v9463_v6  ;;  %v4989_v59 = vadd.f32 %v4981_v39, %v4973_v63 }
 0x950   :  { %v6378_v2 = vpop.eup %6377  ;;  %v4984_v27 = vmul.f32 %v6376_v4, %v9466_v24  ;;  %v4990_v37 = vadd.f32 %v4982_v43, %v4974_v31 }
 0x951   :  { %v6380_v34 = vpop.eup %6379  ;;  %v4985_v9 = vmul.f32 %v6378_v2, %v9470_v51  ;;  %v4991_v21 = vadd.f32 %v4983_v5, %v4975_v28  ;;  %6401 = vtanh.f32 %v4989_v59 }
 0x952   :  { %v6382_v20 = vpop.eup %6381  ;;  %v4986_v7 = vmul.f32 %v6380_v34, %v9474_v8  ;;  %v4992_v32 = vadd.f32 %v4984_v27, %v4976_v61  ;;  %6403 = vtanh.f32 %v4990_v37  ;;  %v5088_v24 = vcombine.low %v4989_v59, %v4990_v37 }
 0x953   :  { %v6384_v6 = vpop.eup %6383  ;;  %v4987_v36 = vmul.f32 %v6382_v20, %v9478_v11  ;;  %v4993_v40 = vadd.f32 %v4985_v9, %v4977_v33  ;;  %6405 = vtanh.f32 %v4991_v21 }
 0x954   :  { %v6386_v54 = vpop.eup %6385  ;;  %v4988_v15 = vmul.f32 %v6384_v6, %v9482_v55  ;;  %v4994_v49 = vadd.f32 %v4986_v7, %v4978_v42  ;;  %6407 = vtanh.f32 %v4992_v32  ;;  %v5089_v51 = vcombine.low %v4991_v21, %v4992_v32 }
 0x955   :  { %v6388_v48 = vpop.eup %6387  ;;  %v4949_v1 = vadd.f32 1.0, %v6386_v54  ;;  %v4995_v46 = vadd.f32 %v4987_v36, %v4979_v16  ;;  %6409 = vtanh.f32 %v4993_v40  ;;  %v5098_v53 = vrot.slane %v5088_v24, %v6925_v10 }
 0x956   :  { %v6390_v26 = vpop.eup %6389  ;;  %v4950_v8 = vadd.f32 1.0, %v6388_v48  ;;  %v4996_v18 = vadd.f32 %v4988_v15, %v4980_v0  ;;  %6411 = vtanh.f32 %v4994_v49  ;;  %v5090_v58 = vcombine.low %v4993_v40, %v4994_v49 }
 0x957   :  { %v6392_v19 = vpop.eup %6391  ;;  %v4951_v11 = vadd.f32 1.0, %v6390_v26  ;;  %6413 = vrcp.f32 %v4949_v1  ;;  %v5105_v41 = vrot.slane %v5089_v51, %v6925_v10 }
 0x958   :  { %v6394_v55 = vpop.eup %6393  ;;  %v4952_v62 = vadd.f32 1.0, %v6392_v19  ;;  %6415 = vrcp.f32 %v4950_v8  ;;  %v5091_v17 = vcombine.low %v4995_v46, %v4996_v18  ;;  %v5112_v22 = vrot.slane %v5090_v58, %v6925_v10 }
 0x959   :  { %v6396_v3 = vpop.eup %6395  ;;  %v4953_v50 = vadd.f32 1.0, %v6394_v55  ;;  %6417 = vrcp.f32 %v4951_v11  ;;  %v5120_v60 = vcombine.low %v5098_v53, %v5105_v41 }
 0x95a   :  { %v6398_v47 = vpop.eup %6397  ;;  %v4954_v57 = vadd.f32 1.0, %v6396_v3  ;;  %6419 = vrcp.f32 %v4952_v62  ;;  %v5119_v13 = vrot.slane %v5091_v17, %v6925_v10 }
 0x95b   :  { %v6400_v35 = vpop.eup %6399  ;;  %v4955_v38 = vadd.f32 1.0, %v6398_v47  ;;  %6421 = vrcp.f32 %v4953_v50  ;;  %v5128_v52 = vrot.slane %v5120_v60, %v6925_v10 }
 0x95c   :  { %v4956_v56 = vadd.f32 1.0, %v6400_v35  ;;  %6423 = vrcp.f32 %v4954_v57  ;;  %v5121_v44 = vcombine.low %v5112_v22, %v5119_v13 }
 0x95d   :  { %6425 = vrcp.f32 %v4955_v38 }
 0x95e   :  { %v6402_v25 = vpop.eup %6401  ;;  %6427 = vrcp.f32 %v4956_v56  ;;  %v5135_v12 = vrot.slane %v5121_v44, %v6925_v10 }
 0x95f   :  { %v6404_v14 = vpop.eup %6403  ;;  %6429 = vtanh.f32 %v4995_v46 }
 0x960   :  { %v6406_v45 = vpop.eup %6405  ;;  %6431 = vtanh.f32 %v4996_v18  ;;  %v5136_v63 = vcombine.low %v5128_v52, %v5135_v12 }
 0x961   :  { %v6408_v23 = vpop.eup %6407 }
 0x962   :  { %v6410_v31 = vpop.eup %6409  ;;  %5138 = vst [vmem:[%s9551_s6] sm:$0xff] %v5136_v63 }
 0x963   :  { %v6412_v29 = vpop.eup %6411 }
 0x964   :  { %v6414_v28 = vpop.eup %6413 }
 0x965   :  { %v6416_v39 = vpop.eup %6415  ;;  %v5005_v30 = vmul.f32 %v6414_v28, %v6402_v25 }
 0x966   :  { %v6418_v61 = vpop.eup %6417  ;;  %v5006_v43 = vmul.f32 %v6416_v39, %v6404_v14 }
 0x967   :  { %v6420_v4 = vpop.eup %6419  ;;  %v5007_v33 = vmul.f32 %v6418_v61, %v6406_v45  ;;  %5013 = vst [vmem:[%s9550_s4 + $0x7] sm:$0x1] %v5005_v30 }
 0x968   :  { %v6422_v5 = vpop.eup %6421  ;;  %v5008_v59 = vmul.f32 %v6420_v4, %v6408_v23  ;;  %5014 = vst [vmem:[%s9550_s4 + $0xf] sm:$0x1] %v5006_v43  ;;  %v5029_v34 = vcombine.low %v5005_v30, %v5006_v43 }
 0x969   :  { %v6424_v2 = vpop.eup %6423  ;;  %v5009_v42 = vmul.f32 %v6422_v5, %v6410_v31  ;;  %5015 = vst [vmem:[%s9550_s4 + $0x17] sm:$0x1] %v5007_v33 }
 0x96a   :  { %v6426_v27 = vpop.eup %6425  ;;  %v5010_v37 = vmul.f32 %v6424_v2, %v6412_v29  ;;  %5016 = vst [vmem:[%s9550_s4 + $0x1f] sm:$0x1] %v5008_v59  ;;  %v5030_v16 = vcombine.low %v5007_v33, %v5008_v59  ;;  %v5039_v36 = vrot.slane %v5029_v34, %v6925_v10 }
 0x96b   :  { %v6428_v9 = vpop.eup %6427  ;;  %5017 = vst [vmem:[%s9550_s4 + $0x27] sm:$0x1] %v5009_v42 }
 0x96c   :  { %v6430_v21 = vpop.eup %6429  ;;  %5018 = vst [vmem:[%s9550_s4 + $0x2f] sm:$0x1] %v5010_v37  ;;  %v5046_v20 = vrot.slane %v5030_v16, %v6925_v10  ;;  %v5031_v6 = vcombine.low %v5009_v42, %v5010_v37 }
 0x96d   :  { %v6432_v0 = vpop.eup %6431  ;;  %v5011_v7 = vmul.f32 %v6430_v21, %v6426_v27 }
 0x96e   :  { %v5012_v32 = vmul.f32 %v6432_v0, %v6428_v9  ;;  %v5061_v24 = vcombine.low %v5039_v36, %v5046_v20  ;;  %v5053_v54 = vrot.slane %v5031_v6, %v6925_v10 }
 0x96f   :  { %5019 = vst [vmem:[%s9550_s4 + $0x37] sm:$0x1] %v5011_v7 }
 0x970   :  { %5020 = vst [vmem:[%s9550_s4 + $0x3f] sm:$0x1] %v5012_v32  ;;  %v5032_v40 = vcombine.low %v5011_v7, %v5012_v32  ;;  %v5069_v51 = vrot.slane %v5061_v24, %v6925_v10 }
 0x972   :  { %v5060_v15 = vrot.slane %v5032_v40, %v6925_v10 }
 0x974   :  { %v5062_v49 = vcombine.low %v5053_v54, %v5060_v15 }
 0x976   :  { %v5076_v48 = vrot.slane %v5062_v49, %v6925_v10 }
 0x978   :  { %v5077_v1 = vcombine.low %v5069_v51, %v5076_v48 }
 0x97a   :  { %5079 = vst [vmem:[%s9552_s5] sm:$0xff] %v5077_v1 }

</bundles_post_ra>
